<compile_context>
chip_gen: v7x
topology: tpu7x:2x2x1
jax: 0.10.0
libtpu: 0.0.40
codegen_flags: <defaults>
</compile_context>

<pallas_src>
from functools import partial

import jax
import jax.numpy as jnp
from jax.experimental import pallas as pl
from jax.experimental.pallas import tpu as pltpu

K = 5          # depthwise kernel size
PAD = K // 2   # SAME padding


def _dwsep_kernel(x_ref, w_ref, b_ref, o_ref, xp_ref, pat_ref,
                  *, H, W, Cin, Cout):
    """One batch image per grid step: im2col + single fused MXU matmul.

    x_ref  : (1, Cin, H, W)         f32 input tile (one image)
    w_ref  : (Cout, K*K*Cin)        combined weights, col index = t*Cin + c
    b_ref  : (Cout, 1)              combined bias (pb + pw @ db)
    o_ref  : (1, Cout, H*W)         output tile (lane-dense, 256 lanes)
    xp_ref : (Cin, H+2P, W+2P)      VMEM scratch: zero-padded image
    pat_ref: (K*K*Cin, H*W)         VMEM scratch: im2col patch matrix
    """
    Wp = W + 2 * PAD
    HW = H * W

    # --- SAME padding: zero only the 4 halo strips, then write the interior.
    #     (Done every step -> no cross-step / cross-core state; no full memset.)
    xp_ref[:, :PAD, :] = jnp.zeros((Cin, PAD, Wp), jnp.float32)
    xp_ref[:, PAD + H:, :] = jnp.zeros((Cin, PAD, Wp), jnp.float32)
    xp_ref[:, PAD:PAD + H, :PAD] = jnp.zeros((Cin, H, PAD), jnp.float32)
    xp_ref[:, PAD:PAD + H, PAD + W:] = jnp.zeros((Cin, H, PAD), jnp.float32)
    xp_ref[:, PAD:PAD + H, PAD:PAD + W] = x_ref[0]

    # --- im2col: 25 block copies; patch row (t*Cin + c) holds channel c shifted
    #     by tap t = dy*K + dx, flattened over the H*W output positions.
    for dy in range(K):
        for dx in range(K):
            t = dy * K + dx
            pat_ref[t * Cin:(t + 1) * Cin, :] = (
                xp_ref[:, dy:dy + H, dx:dx + W].reshape(Cin, HW))

    # --- one MXU matmul does depthwise + pointwise at once, bias fused.
    y = jnp.dot(w_ref[...], pat_ref[...],
                preferred_element_type=jnp.float32) + b_ref[...]
    o_ref[0] = y.astype(o_ref.dtype)


def dwsep_conv5(x, dw, db, pw, pb):
    """x: (N, Cin, H, W) f32; dw: (Cin, 1, K, K); db: (Cin,);
       pw: (Cout, Cin, 1, 1); pb: (Cout,). Returns (N, Cout, H, W)."""
    N, Cin, H, W = x.shape
    Cout = pw.shape[0]
    KK = K * K

    # Hoist all weight preparation out of the kernel (wrapper, runs once):
    dw_k = dw.reshape(Cin, KK)                       # (Cin, 25), tap = dy*K+dx
    pw_k = pw.reshape(Cout, Cin)                     # (Cout, Cin)
    # w_comb[o, t*Cin + c] = pw[o, c] * dw[c, t]
    w_comb = (pw_k[:, None, :] * dw_k.T[None, :, :]).reshape(Cout, KK * Cin)
    # b_comb = pb + pw @ db  (depthwise bias folded through the pointwise conv)
    b_comb = (pb + pw_k @ db).reshape(Cout, 1)

    kernel = partial(_dwsep_kernel, H=H, W=W, Cin=Cin, Cout=Cout)
    out = pl.pallas_call(
        kernel,
        out_shape=jax.ShapeDtypeStruct((N, Cout, H * W), jnp.float32),
        grid_spec=pltpu.PrefetchScalarGridSpec(
            num_scalar_prefetch=0,
            grid=(N,),
            in_specs=[
                pl.BlockSpec((1, Cin, H, W), lambda n: (n, 0, 0, 0)),
                pl.BlockSpec((Cout, KK * Cin), lambda n: (0, 0)),
                pl.BlockSpec((Cout, 1), lambda n: (0, 0)),
            ],
            out_specs=pl.BlockSpec((1, Cout, H * W), lambda n: (n, 0, 0)),
            scratch_shapes=[
                pltpu.VMEM((Cin, H + 2 * PAD, W + 2 * PAD), jnp.float32),
                pltpu.VMEM((KK * Cin, H * W), jnp.float32),
            ]),
        compiler_params=pltpu.CompilerParams(
            dimension_semantics=("parallel",)),   # second TC on v7x
    )(x, w_comb, b_comb)
    return out.reshape(N, Cout, H, W)             # contiguous reshape only


def init_params(key, in_ch, out_ch):
    """PyTorch Conv2d default init: U(-k, k), k = 1/sqrt(fan_in)."""
    k1, k2, k3, k4 = jax.random.split(key, 4)
    bd = 1.0 / float(1 * K * K) ** 0.5          # depthwise fan_in = 25
    dw = jax.random.uniform(k1, (in_ch, 1, K, K), jnp.float32, -bd, bd)
    db = jax.random.uniform(k2, (in_ch,), jnp.float32, -bd, bd)
    bp = 1.0 / float(in_ch) ** 0.5              # pointwise fan_in = Cin
    pw = jax.random.uniform(k3, (out_ch, in_ch, 1, 1), jnp.float32, -bp, bp)
    pb = jax.random.uniform(k4, (out_ch,), jnp.float32, -bp, bp)
    return dw, db, pw, pb


def reference(x, dw, db, pw, pb):
    """Pure-JAX reference (grouped depthwise conv + 1x1 conv), NCHW."""
    Cin = x.shape[1]
    y = jax.lax.conv_general_dilated(
        x, dw, window_strides=(1, 1), padding=((PAD, PAD), (PAD, PAD)),
        dimension_numbers=("NCHW", "OIHW", "NCHW"),
        feature_group_count=Cin)
    y = y + db.reshape(1, Cin, 1, 1)
    z = jax.lax.conv_general_dilated(
        y, pw, window_strides=(1, 1), padding="VALID",
        dimension_numbers=("NCHW", "OIHW", "NCHW"))
    return z + pb.reshape(1, -1, 1, 1)


if __name__ == "__main__":
    N, Cin, Cout, H, W = 2, 4, 8, 16, 16

    root = jax.random.PRNGKey(0)
    kx, kp = jax.random.split(root)
    x = jax.random.normal(kx, (N, Cin, H, W), jnp.float32)   # NCHW input
    dw, db, pw, pb = init_params(kp, Cin, Cout)

    out = jax.block_until_ready(dwsep_conv5(x, dw, db, pw, pb))
    ref = jax.block_until_ready(reference(x, dw, db, pw, pb))

    assert out.shape == (N, Cout, H, W), out.shape
    err = float(jnp.max(jnp.abs(out - ref)))
    assert jnp.allclose(out, ref, atol=1e-4, rtol=1e-4), err

    print("KERNEL_OK")
</pallas_src>

<mosaic_0001>
module attributes {stable_mosaic.version = 11 : i64} {
  func.func @_dwsep_kernel(%arg0: i32, %arg1: memref<1x4x16x16xf32, #tpu.memory_space<vmem>>, %arg2: memref<8x100xf32, #tpu.memory_space<vmem>>, %arg3: memref<8x1xf32, #tpu.memory_space<vmem>>, %arg4: memref<1x8x256xf32, #tpu.memory_space<vmem>>, %arg5: memref<4x20x20xf32, #tpu.memory_space<vmem>>, %arg6: memref<100x256xf32, #tpu.memory_space<vmem>>) attributes {dimension_semantics = [#tpu.dimension_semantics<parallel>], iteration_bounds = array<i64: 2>, scalar_prefetch = 0 : i64, scratch_operands = 2 : i64, tpu.core_type = #tpu.core_type<tc>, window_params = [{transform_indices = @transform_0, window_bounds = array<i64: 1, 4, 16, 16>}, {pipeline_mode = #tpu.pipeline_mode<synchronous>, transform_indices = @transform_1, window_bounds = array<i64: 8, 100>}, {pipeline_mode = #tpu.pipeline_mode<synchronous>, transform_indices = @transform_2, window_bounds = array<i64: 8, 1>}, {transform_indices = @transform_3, window_bounds = array<i64: 1, 8, 256>}]} {
    %cst = arith.constant 0.000000e+00 : f32
    %0 = vector.broadcast %cst : f32 to vector<4x2x20xf32>
    %c0 = arith.constant 0 : index
    %c0_0 = arith.constant 0 : index
    %c0_1 = arith.constant 0 : index
    %1 = vector.load %arg5[%c0, %c0_0, %c0_1] : memref<4x20x20xf32, #tpu.memory_space<vmem>>, vector<4x2x20xf32>
    tpu.vector_store %arg5[%c0, %c0_0, %c0_1], %0 {strides = array<i32>} : memref<4x20x20xf32, #tpu.memory_space<vmem>>, vector<4x2x20xf32>,
    %cst_2 = arith.constant 0.000000e+00 : f32
    %2 = vector.broadcast %cst_2 : f32 to vector<4x2x20xf32>
    %c0_3 = arith.constant 0 : index
    %c18 = arith.constant 18 : index
    %c0_4 = arith.constant 0 : index
    %3 = vector.load %arg5[%c0_3, %c18, %c0_4] : memref<4x20x20xf32, #tpu.memory_space<vmem>>, vector<4x2x20xf32>
    tpu.vector_store %arg5[%c0_3, %c18, %c0_4], %2 {strides = array<i32>} : memref<4x20x20xf32, #tpu.memory_space<vmem>>, vector<4x2x20xf32>,
    %cst_5 = arith.constant 0.000000e+00 : f32
    %4 = vector.broadcast %cst_5 : f32 to vector<4x16x2xf32>
    %c0_6 = arith.constant 0 : index
    %c2 = arith.constant 2 : index
    %c0_7 = arith.constant 0 : index
    %5 = vector.load %arg5[%c0_6, %c2, %c0_7] : memref<4x20x20xf32, #tpu.memory_space<vmem>>, vector<4x16x2xf32>
    tpu.vector_store %arg5[%c0_6, %c2, %c0_7], %4 {strides = array<i32>} : memref<4x20x20xf32, #tpu.memory_space<vmem>>, vector<4x16x2xf32>,
    %cst_8 = arith.constant 0.000000e+00 : f32
    %6 = vector.broadcast %cst_8 : f32 to vector<4x16x2xf32>
    %c0_9 = arith.constant 0 : index
    %c2_10 = arith.constant 2 : index
    %c18_11 = arith.constant 18 : index
    %7 = vector.load %arg5[%c0_9, %c2_10, %c18_11] : memref<4x20x20xf32, #tpu.memory_space<vmem>>, vector<4x16x2xf32>
    tpu.vector_store %arg5[%c0_9, %c2_10, %c18_11], %6 {strides = array<i32>} : memref<4x20x20xf32, #tpu.memory_space<vmem>>, vector<4x16x2xf32>,
    %c0_12 = arith.constant 0 : index
    %c0_13 = arith.constant 0 : index
    %c0_14 = arith.constant 0 : index
    %c0_15 = arith.constant 0 : index
    %8 = vector.load %arg1[%c0_12, %c0_13, %c0_14, %c0_15] : memref<1x4x16x16xf32, #tpu.memory_space<vmem>>, vector<1x4x16x16xf32>
    %9 = vector.shape_cast %8 : vector<1x4x16x16xf32> to vector<4x16x16xf32>
    %c0_16 = arith.constant 0 : index
    %c2_17 = arith.constant 2 : index
    %c2_18 = arith.constant 2 : index
    %10 = vector.load %arg5[%c0_16, %c2_17, %c2_18] : memref<4x20x20xf32, #tpu.memory_space<vmem>>, vector<4x16x16xf32>
    tpu.vector_store %arg5[%c0_16, %c2_17, %c2_18], %9 {strides = array<i32>} : memref<4x20x20xf32, #tpu.memory_space<vmem>>, vector<4x16x16xf32>,
    %c0_19 = arith.constant 0 : index
    %c0_20 = arith.constant 0 : index
    %c0_21 = arith.constant 0 : index
    %11 = vector.load %arg5[%c0_19, %c0_20, %c0_21] : memref<4x20x20xf32, #tpu.memory_space<vmem>>, vector<4x16x16xf32>
    %12 = vector.shape_cast %11 : vector<4x16x16xf32> to vector<4x256xf32>
    %c0_22 = arith.constant 0 : index
    %c0_23 = arith.constant 0 : index
    %13 = vector.load %arg6[%c0_22, %c0_23] : memref<100x256xf32, #tpu.memory_space<vmem>>, vector<4x256xf32>
    tpu.vector_store %arg6[%c0_22, %c0_23], %12 {strides = array<i32>} : memref<100x256xf32, #tpu.memory_space<vmem>>, vector<4x256xf32>,
    %c0_24 = arith.constant 0 : index
    %c0_25 = arith.constant 0 : index
    %c1 = arith.constant 1 : index
    %14 = vector.load %arg5[%c0_24, %c0_25, %c1] : memref<4x20x20xf32, #tpu.memory_space<vmem>>, vector<4x16x16xf32>
    %15 = vector.shape_cast %14 : vector<4x16x16xf32> to vector<4x256xf32>
    %c4 = arith.constant 4 : index
    %c0_26 = arith.constant 0 : index
    %16 = vector.load %arg6[%c4, %c0_26] : memref<100x256xf32, #tpu.memory_space<vmem>>, vector<4x256xf32>
    tpu.vector_store %arg6[%c4, %c0_26], %15 {strides = array<i32>} : memref<100x256xf32, #tpu.memory_space<vmem>>, vector<4x256xf32>,
    %c0_27 = arith.constant 0 : index
    %c0_28 = arith.constant 0 : index
    %c2_29 = arith.constant 2 : index
    %17 = vector.load %arg5[%c0_27, %c0_28, %c2_29] : memref<4x20x20xf32, #tpu.memory_space<vmem>>, vector<4x16x16xf32>
    %18 = vector.shape_cast %17 : vector<4x16x16xf32> to vector<4x256xf32>
    %c8 = arith.constant 8 : index
    %c0_30 = arith.constant 0 : index
    %19 = vector.load %arg6[%c8, %c0_30] : memref<100x256xf32, #tpu.memory_space<vmem>>, vector<4x256xf32>
    tpu.vector_store %arg6[%c8, %c0_30], %18 {strides = array<i32>} : memref<100x256xf32, #tpu.memory_space<vmem>>, vector<4x256xf32>,
    %c0_31 = arith.constant 0 : index
    %c0_32 = arith.constant 0 : index
    %c3 = arith.constant 3 : index
    %20 = vector.load %arg5[%c0_31, %c0_32, %c3] : memref<4x20x20xf32, #tpu.memory_space<vmem>>, vector<4x16x16xf32>
    %21 = vector.shape_cast %20 : vector<4x16x16xf32> to vector<4x256xf32>
    %c12 = arith.constant 12 : index
    %c0_33 = arith.constant 0 : index
    %22 = vector.load %arg6[%c12, %c0_33] : memref<100x256xf32, #tpu.memory_space<vmem>>, vector<4x256xf32>
    tpu.vector_store %arg6[%c12, %c0_33], %21 {strides = array<i32>} : memref<100x256xf32, #tpu.memory_space<vmem>>, vector<4x256xf32>,
    %c0_34 = arith.constant 0 : index
    %c0_35 = arith.constant 0 : index
    %c4_36 = arith.constant 4 : index
    %23 = vector.load %arg5[%c0_34, %c0_35, %c4_36] : memref<4x20x20xf32, #tpu.memory_space<vmem>>, vector<4x16x16xf32>
    %24 = vector.shape_cast %23 : vector<4x16x16xf32> to vector<4x256xf32>
    %c16 = arith.constant 16 : index
    %c0_37 = arith.constant 0 : index
    %25 = vector.load %arg6[%c16, %c0_37] : memref<100x256xf32, #tpu.memory_space<vmem>>, vector<4x256xf32>
    tpu.vector_store %arg6[%c16, %c0_37], %24 {strides = array<i32>} : memref<100x256xf32, #tpu.memory_space<vmem>>, vector<4x256xf32>,
    %c0_38 = arith.constant 0 : index
    %c1_39 = arith.constant 1 : index
    %c0_40 = arith.constant 0 : index
    %26 = vector.load %arg5[%c0_38, %c1_39, %c0_40] : memref<4x20x20xf32, #tpu.memory_space<vmem>>, vector<4x16x16xf32>
    %27 = vector.shape_cast %26 : vector<4x16x16xf32> to vector<4x256xf32>
    %c20 = arith.constant 20 : index
    %c0_41 = arith.constant 0 : index
    %28 = vector.load %arg6[%c20, %c0_41] : memref<100x256xf32, #tpu.memory_space<vmem>>, vector<4x256xf32>
    tpu.vector_store %arg6[%c20, %c0_41], %27 {strides = array<i32>} : memref<100x256xf32, #tpu.memory_space<vmem>>, vector<4x256xf32>,
    %c0_42 = arith.constant 0 : index
    %c1_43 = arith.constant 1 : index
    %c1_44 = arith.constant 1 : index
    %29 = vector.load %arg5[%c0_42, %c1_43, %c1_44] : memref<4x20x20xf32, #tpu.memory_space<vmem>>, vector<4x16x16xf32>
    %30 = vector.shape_cast %29 : vector<4x16x16xf32> to vector<4x256xf32>
    %c24 = arith.constant 24 : index
    %c0_45 = arith.constant 0 : index
    %31 = vector.load %arg6[%c24, %c0_45] : memref<100x256xf32, #tpu.memory_space<vmem>>, vector<4x256xf32>
    tpu.vector_store %arg6[%c24, %c0_45], %30 {strides = array<i32>} : memref<100x256xf32, #tpu.memory_space<vmem>>, vector<4x256xf32>,
    %c0_46 = arith.constant 0 : index
    %c1_47 = arith.constant 1 : index
    %c2_48 = arith.constant 2 : index
    %32 = vector.load %arg5[%c0_46, %c1_47, %c2_48] : memref<4x20x20xf32, #tpu.memory_space<vmem>>, vector<4x16x16xf32>
    %33 = vector.shape_cast %32 : vector<4x16x16xf32> to vector<4x256xf32>
    %c28 = arith.constant 28 : index
    %c0_49 = arith.constant 0 : index
    %34 = vector.load %arg6[%c28, %c0_49] : memref<100x256xf32, #tpu.memory_space<vmem>>, vector<4x256xf32>
    tpu.vector_store %arg6[%c28, %c0_49], %33 {strides = array<i32>} : memref<100x256xf32, #tpu.memory_space<vmem>>, vector<4x256xf32>,
    %c0_50 = arith.constant 0 : index
    %c1_51 = arith.constant 1 : index
    %c3_52 = arith.constant 3 : index
    %35 = vector.load %arg5[%c0_50, %c1_51, %c3_52] : memref<4x20x20xf32, #tpu.memory_space<vmem>>, vector<4x16x16xf32>
    %36 = vector.shape_cast %35 : vector<4x16x16xf32> to vector<4x256xf32>
    %c32 = arith.constant 32 : index
    %c0_53 = arith.constant 0 : index
    %37 = vector.load %arg6[%c32, %c0_53] : memref<100x256xf32, #tpu.memory_space<vmem>>, vector<4x256xf32>
    tpu.vector_store %arg6[%c32, %c0_53], %36 {strides = array<i32>} : memref<100x256xf32, #tpu.memory_space<vmem>>, vector<4x256xf32>,
    %c0_54 = arith.constant 0 : index
    %c1_55 = arith.constant 1 : index
    %c4_56 = arith.constant 4 : index
    %38 = vector.load %arg5[%c0_54, %c1_55, %c4_56] : memref<4x20x20xf32, #tpu.memory_space<vmem>>, vector<4x16x16xf32>
    %39 = vector.shape_cast %38 : vector<4x16x16xf32> to vector<4x256xf32>
    %c36 = arith.constant 36 : index
    %c0_57 = arith.constant 0 : index
    %40 = vector.load %arg6[%c36, %c0_57] : memref<100x256xf32, #tpu.memory_space<vmem>>, vector<4x256xf32>
    tpu.vector_store %arg6[%c36, %c0_57], %39 {strides = array<i32>} : memref<100x256xf32, #tpu.memory_space<vmem>>, vector<4x256xf32>,
    %c0_58 = arith.constant 0 : index
    %c2_59 = arith.constant 2 : index
    %c0_60 = arith.constant 0 : index
    %41 = vector.load %arg5[%c0_58, %c2_59, %c0_60] : memref<4x20x20xf32, #tpu.memory_space<vmem>>, vector<4x16x16xf32>
    %42 = vector.shape_cast %41 : vector<4x16x16xf32> to vector<4x256xf32>
    %c40 = arith.constant 40 : index
    %c0_61 = arith.constant 0 : index
    %43 = vector.load %arg6[%c40, %c0_61] : memref<100x256xf32, #tpu.memory_space<vmem>>, vector<4x256xf32>
    tpu.vector_store %arg6[%c40, %c0_61], %42 {strides = array<i32>} : memref<100x256xf32, #tpu.memory_space<vmem>>, vector<4x256xf32>,
    %c0_62 = arith.constant 0 : index
    %c2_63 = arith.constant 2 : index
    %c1_64 = arith.constant 1 : index
    %44 = vector.load %arg5[%c0_62, %c2_63, %c1_64] : memref<4x20x20xf32, #tpu.memory_space<vmem>>, vector<4x16x16xf32>
    %45 = vector.shape_cast %44 : vector<4x16x16xf32> to vector<4x256xf32>
    %c44 = arith.constant 44 : index
    %c0_65 = arith.constant 0 : index
    %46 = vector.load %arg6[%c44, %c0_65] : memref<100x256xf32, #tpu.memory_space<vmem>>, vector<4x256xf32>
    tpu.vector_store %arg6[%c44, %c0_65], %45 {strides = array<i32>} : memref<100x256xf32, #tpu.memory_space<vmem>>, vector<4x256xf32>,
    %c0_66 = arith.constant 0 : index
    %c2_67 = arith.constant 2 : index
    %c2_68 = arith.constant 2 : index
    %47 = vector.load %arg5[%c0_66, %c2_67, %c2_68] : memref<4x20x20xf32, #tpu.memory_space<vmem>>, vector<4x16x16xf32>
    %48 = vector.shape_cast %47 : vector<4x16x16xf32> to vector<4x256xf32>
    %c48 = arith.constant 48 : index
    %c0_69 = arith.constant 0 : index
    %49 = vector.load %arg6[%c48, %c0_69] : memref<100x256xf32, #tpu.memory_space<vmem>>, vector<4x256xf32>
    tpu.vector_store %arg6[%c48, %c0_69], %48 {strides = array<i32>} : memref<100x256xf32, #tpu.memory_space<vmem>>, vector<4x256xf32>,
    %c0_70 = arith.constant 0 : index
    %c2_71 = arith.constant 2 : index
    %c3_72 = arith.constant 3 : index
    %50 = vector.load %arg5[%c0_70, %c2_71, %c3_72] : memref<4x20x20xf32, #tpu.memory_space<vmem>>, vector<4x16x16xf32>
    %51 = vector.shape_cast %50 : vector<4x16x16xf32> to vector<4x256xf32>
    %c52 = arith.constant 52 : index
    %c0_73 = arith.constant 0 : index
    %52 = vector.load %arg6[%c52, %c0_73] : memref<100x256xf32, #tpu.memory_space<vmem>>, vector<4x256xf32>
    tpu.vector_store %arg6[%c52, %c0_73], %51 {strides = array<i32>} : memref<100x256xf32, #tpu.memory_space<vmem>>, vector<4x256xf32>,
    %c0_74 = arith.constant 0 : index
    %c2_75 = arith.constant 2 : index
    %c4_76 = arith.constant 4 : index
    %53 = vector.load %arg5[%c0_74, %c2_75, %c4_76] : memref<4x20x20xf32, #tpu.memory_space<vmem>>, vector<4x16x16xf32>
    %54 = vector.shape_cast %53 : vector<4x16x16xf32> to vector<4x256xf32>
    %c56 = arith.constant 56 : index
    %c0_77 = arith.constant 0 : index
    %55 = vector.load %arg6[%c56, %c0_77] : memref<100x256xf32, #tpu.memory_space<vmem>>, vector<4x256xf32>
    tpu.vector_store %arg6[%c56, %c0_77], %54 {strides = array<i32>} : memref<100x256xf32, #tpu.memory_space<vmem>>, vector<4x256xf32>,
    %c0_78 = arith.constant 0 : index
    %c3_79 = arith.constant 3 : index
    %c0_80 = arith.constant 0 : index
    %56 = vector.load %arg5[%c0_78, %c3_79, %c0_80] : memref<4x20x20xf32, #tpu.memory_space<vmem>>, vector<4x16x16xf32>
    %57 = vector.shape_cast %56 : vector<4x16x16xf32> to vector<4x256xf32>
    %c60 = arith.constant 60 : index
    %c0_81 = arith.constant 0 : index
    %58 = vector.load %arg6[%c60, %c0_81] : memref<100x256xf32, #tpu.memory_space<vmem>>, vector<4x256xf32>
    tpu.vector_store %arg6[%c60, %c0_81], %57 {strides = array<i32>} : memref<100x256xf32, #tpu.memory_space<vmem>>, vector<4x256xf32>,
    %c0_82 = arith.constant 0 : index
    %c3_83 = arith.constant 3 : index
    %c1_84 = arith.constant 1 : index
    %59 = vector.load %arg5[%c0_82, %c3_83, %c1_84] : memref<4x20x20xf32, #tpu.memory_space<vmem>>, vector<4x16x16xf32>
    %60 = vector.shape_cast %59 : vector<4x16x16xf32> to vector<4x256xf32>
    %c64 = arith.constant 64 : index
    %c0_85 = arith.constant 0 : index
    %61 = vector.load %arg6[%c64, %c0_85] : memref<100x256xf32, #tpu.memory_space<vmem>>, vector<4x256xf32>
    tpu.vector_store %arg6[%c64, %c0_85], %60 {strides = array<i32>} : memref<100x256xf32, #tpu.memory_space<vmem>>, vector<4x256xf32>,
    %c0_86 = arith.constant 0 : index
    %c3_87 = arith.constant 3 : index
    %c2_88 = arith.constant 2 : index
    %62 = vector.load %arg5[%c0_86, %c3_87, %c2_88] : memref<4x20x20xf32, #tpu.memory_space<vmem>>, vector<4x16x16xf32>
    %63 = vector.shape_cast %62 : vector<4x16x16xf32> to vector<4x256xf32>
    %c68 = arith.constant 68 : index
    %c0_89 = arith.constant 0 : index
    %64 = vector.load %arg6[%c68, %c0_89] : memref<100x256xf32, #tpu.memory_space<vmem>>, vector<4x256xf32>
    tpu.vector_store %arg6[%c68, %c0_89], %63 {strides = array<i32>} : memref<100x256xf32, #tpu.memory_space<vmem>>, vector<4x256xf32>,
    %c0_90 = arith.constant 0 : index
    %c3_91 = arith.constant 3 : index
    %c3_92 = arith.constant 3 : index
    %65 = vector.load %arg5[%c0_90, %c3_91, %c3_92] : memref<4x20x20xf32, #tpu.memory_space<vmem>>, vector<4x16x16xf32>
    %66 = vector.shape_cast %65 : vector<4x16x16xf32> to vector<4x256xf32>
    %c72 = arith.constant 72 : index
    %c0_93 = arith.constant 0 : index
    %67 = vector.load %arg6[%c72, %c0_93] : memref<100x256xf32, #tpu.memory_space<vmem>>, vector<4x256xf32>
    tpu.vector_store %arg6[%c72, %c0_93], %66 {strides = array<i32>} : memref<100x256xf32, #tpu.memory_space<vmem>>, vector<4x256xf32>,
    %c0_94 = arith.constant 0 : index
    %c3_95 = arith.constant 3 : index
    %c4_96 = arith.constant 4 : index
    %68 = vector.load %arg5[%c0_94, %c3_95, %c4_96] : memref<4x20x20xf32, #tpu.memory_space<vmem>>, vector<4x16x16xf32>
    %69 = vector.shape_cast %68 : vector<4x16x16xf32> to vector<4x256xf32>
    %c76 = arith.constant 76 : index
    %c0_97 = arith.constant 0 : index
    %70 = vector.load %arg6[%c76, %c0_97] : memref<100x256xf32, #tpu.memory_space<vmem>>, vector<4x256xf32>
    tpu.vector_store %arg6[%c76, %c0_97], %69 {strides = array<i32>} : memref<100x256xf32, #tpu.memory_space<vmem>>, vector<4x256xf32>,
    %c0_98 = arith.constant 0 : index
    %c4_99 = arith.constant 4 : index
    %c0_100 = arith.constant 0 : index
    %71 = vector.load %arg5[%c0_98, %c4_99, %c0_100] : memref<4x20x20xf32, #tpu.memory_space<vmem>>, vector<4x16x16xf32>
    %72 = vector.shape_cast %71 : vector<4x16x16xf32> to vector<4x256xf32>
    %c80 = arith.constant 80 : index
    %c0_101 = arith.constant 0 : index
    %73 = vector.load %arg6[%c80, %c0_101] : memref<100x256xf32, #tpu.memory_space<vmem>>, vector<4x256xf32>
    tpu.vector_store %arg6[%c80, %c0_101], %72 {strides = array<i32>} : memref<100x256xf32, #tpu.memory_space<vmem>>, vector<4x256xf32>,
    %c0_102 = arith.constant 0 : index
    %c4_103 = arith.constant 4 : index
    %c1_104 = arith.constant 1 : index
    %74 = vector.load %arg5[%c0_102, %c4_103, %c1_104] : memref<4x20x20xf32, #tpu.memory_space<vmem>>, vector<4x16x16xf32>
    %75 = vector.shape_cast %74 : vector<4x16x16xf32> to vector<4x256xf32>
    %c84 = arith.constant 84 : index
    %c0_105 = arith.constant 0 : index
    %76 = vector.load %arg6[%c84, %c0_105] : memref<100x256xf32, #tpu.memory_space<vmem>>, vector<4x256xf32>
    tpu.vector_store %arg6[%c84, %c0_105], %75 {strides = array<i32>} : memref<100x256xf32, #tpu.memory_space<vmem>>, vector<4x256xf32>,
    %c0_106 = arith.constant 0 : index
    %c4_107 = arith.constant 4 : index
    %c2_108 = arith.constant 2 : index
    %77 = vector.load %arg5[%c0_106, %c4_107, %c2_108] : memref<4x20x20xf32, #tpu.memory_space<vmem>>, vector<4x16x16xf32>
    %78 = vector.shape_cast %77 : vector<4x16x16xf32> to vector<4x256xf32>
    %c88 = arith.constant 88 : index
    %c0_109 = arith.constant 0 : index
    %79 = vector.load %arg6[%c88, %c0_109] : memref<100x256xf32, #tpu.memory_space<vmem>>, vector<4x256xf32>
    tpu.vector_store %arg6[%c88, %c0_109], %78 {strides = array<i32>} : memref<100x256xf32, #tpu.memory_space<vmem>>, vector<4x256xf32>,
    %c0_110 = arith.constant 0 : index
    %c4_111 = arith.constant 4 : index
    %c3_112 = arith.constant 3 : index
    %80 = vector.load %arg5[%c0_110, %c4_111, %c3_112] : memref<4x20x20xf32, #tpu.memory_space<vmem>>, vector<4x16x16xf32>
    %81 = vector.shape_cast %80 : vector<4x16x16xf32> to vector<4x256xf32>
    %c92 = arith.constant 92 : index
    %c0_113 = arith.constant 0 : index
    %82 = vector.load %arg6[%c92, %c0_113] : memref<100x256xf32, #tpu.memory_space<vmem>>, vector<4x256xf32>
    tpu.vector_store %arg6[%c92, %c0_113], %81 {strides = array<i32>} : memref<100x256xf32, #tpu.memory_space<vmem>>, vector<4x256xf32>,
    %c0_114 = arith.constant 0 : index
    %c4_115 = arith.constant 4 : index
    %c4_116 = arith.constant 4 : index
    %83 = vector.load %arg5[%c0_114, %c4_115, %c4_116] : memref<4x20x20xf32, #tpu.memory_space<vmem>>, vector<4x16x16xf32>
    %84 = vector.shape_cast %83 : vector<4x16x16xf32> to vector<4x256xf32>
    %c96 = arith.constant 96 : index
    %c0_117 = arith.constant 0 : index
    %85 = vector.load %arg6[%c96, %c0_117] : memref<100x256xf32, #tpu.memory_space<vmem>>, vector<4x256xf32>
    tpu.vector_store %arg6[%c96, %c0_117], %84 {strides = array<i32>} : memref<100x256xf32, #tpu.memory_space<vmem>>, vector<4x256xf32>,
    %c0_118 = arith.constant 0 : index
    %c0_119 = arith.constant 0 : index
    %86 = vector.load %arg2[%c0_118, %c0_119] : memref<8x100xf32, #tpu.memory_space<vmem>>, vector<8x100xf32>
    %c0_120 = arith.constant 0 : index
    %c0_121 = arith.constant 0 : index
    %87 = vector.load %arg6[%c0_120, %c0_121] : memref<100x256xf32, #tpu.memory_space<vmem>>, vector<100x256xf32>
    %cst_122 = arith.constant dense<0.000000e+00> : vector<8x256xf32>
    %88 = tpu.matmul %86, %87, %cst_122 {dimension_numbers = #tpu.dot_dimension_numbers<[1], [0], [0], [1], [0, 0, 1, 1], [], []>} : vector<8x100xf32>, vector<100x256xf32>, vector<8x256xf32> -> vector<8x256xf32>
    %c0_123 = arith.constant 0 : index
    %c0_124 = arith.constant 0 : index
    %89 = vector.load %arg3[%c0_123, %c0_124] : memref<8x1xf32, #tpu.memory_space<vmem>>, vector<8x1xf32>
    %90 = vector.broadcast %89 : vector<8x1xf32> to vector<8x256xf32>
    %91 = arith.addf %88, %90 : vector<8x256xf32>
    %c0_125 = arith.constant 0 : index
    %c0_126 = arith.constant 0 : index
    %c0_127 = arith.constant 0 : index
    %92 = vector.load %arg4[%c0_125, %c0_126, %c0_127] : memref<1x8x256xf32, #tpu.memory_space<vmem>>, vector<1x8x256xf32>
    %93 = vector.shape_cast %92 : vector<1x8x256xf32> to vector<8x256xf32>
    %94 = vector.shape_cast %91 : vector<8x256xf32> to vector<1x8x256xf32>
    tpu.vector_store %arg4[%c0_125, %c0_126, %c0_127], %94 {strides = array<i32>} : memref<1x8x256xf32, #tpu.memory_space<vmem>>, vector<1x8x256xf32>,
    return
  }
  func.func @transform_0(%arg0: i32) -> (i32, i32, i32, i32) {
    %c0_i32 = arith.constant 0 : i32
    %c0_i32_0 = arith.constant 0 : i32
    %c0_i32_1 = arith.constant 0 : i32
    %c0_i32_2 = arith.constant 0 : i32
    return %arg0, %c0_i32, %c0_i32_0, %c0_i32_1 : i32, i32, i32, i32
  }
  func.func @transform_1(%arg0: i32) -> (i32, i32) {
    %c0_i32 = arith.constant 0 : i32
    %c0_i32_0 = arith.constant 0 : i32
    %c0_i32_1 = arith.constant 0 : i32
    return %c0_i32, %c0_i32_0 : i32, i32
  }
  func.func @transform_2(%arg0: i32) -> (i32, i32) {
    %c0_i32 = arith.constant 0 : i32
    %c0_i32_0 = arith.constant 0 : i32
    %c0_i32_1 = arith.constant 0 : i32
    return %c0_i32, %c0_i32_0 : i32, i32
  }
  func.func @transform_3(%arg0: i32) -> (i32, i32, i32) {
    %c0_i32 = arith.constant 0 : i32
    %c0_i32_0 = arith.constant 0 : i32
    %c0_i32_1 = arith.constant 0 : i32
    return %arg0, %c0_i32, %c0_i32_0 : i32, i32, i32
  }
}

</mosaic_0001>

<bundles_post_ra>
// kernel: tpu_custom_call.1
= control target key start
LH: loop header
LB: loop body
LE: loop exit
PB: predicated region body
PF: predicated region fallthrough
CT: control target
= control target key end

     0   :  { %8 = vsyncpa [#allocation5], 0  ;;  %s9966_s0 = inlined_call_operand.hbm [shape: f32[2,4,16,16], index: 0, kind: input, shape index: {}]   ;;  %s9967_s1 = inlined_call_operand.vmem [shape: f32[8,100], index: 1, kind: input, shape index: {}]   ;;  %s9968_s2 = inlined_call_operand.vmem [shape: f32[8,1], index: 2, kind: input, shape index: {}]   ;;  %s9969_s3 = inlined_call_operand.hbm [shape: f32[2,8,256], index: 3, kind: output, shape index: {}]  }
   0x1   :  { %10 = vsyncpa [#allocation5 + $0x1], 0 }
   0x2   :  { %11 = vsyncpa [#allocation6], 0 }
   0x3   :  { %13 = vsyncpa [#allocation6 + $0x1], 0  ;;  %s6877_s12 = smov 0   ;;  %s6879_s13 = smov 0  }
   0x4   :  { %s6881_s14 = smov 0   ;;  %s6883_s15 = smov 0  }
   0x5 LB: > { %s6898_s16 = sadd.s32 4294967295, %s6835_s15   ;;  %s6586_s17 = sadd.s32 4294967294, %s6835_s15   ;;  %s6835_s15 = sphi %s6883_s15, %s10061_s15   ;;  %s6831_s14 = sphi %s6881_s14, %s10060_s14   ;;  %s6827_s13 = sphi %s6879_s13, %s10059_s13   ;;  %s6823_s12 = sphi %s6877_s12, %s10058_s12  }
   0x6   : > { %s6902_s18 = sadd.s32 1, %s6835_s15   ;;  %s26_s19 = sadd.s32 1, %s6831_s14 }
   0x7   : > { %s23_s20 = ssub.s32 %s6835_s15, %s6902_s18  ;;  %p33_p0 = scmp.ne.s32.totalorder %s6831_s14, %s6827_s13 }
   0x8   : > { %p24_p1 = scmp.eq.s32.totalorder %s23_s20, 0  ;;  %p34_p2 = scmp.eq.s32.totalorder %s6835_s15, 0 }
   0x9   : > { %p39_p3 = scmp.ne.s32.totalorder %s6827_s13, %s6823_s12  ;;  %p40_p4 = scmp.eq.s32.totalorder %s6898_s16, 0 }
   0xa   : > { %s6914_s21 = scalar_select %p24_p1, %s6831_s14, %s26_s19  }
   0xb   : > { %p6916_p5 = por %p34_p2, %p33_p0  ;;  %p6920_p6 = por %p40_p4, %p39_p3 }
   0xc   : > { %p105_p7 = scmp.eq.s32.totalorder %s6898_s16, 1  ;;  %p111_p8 = scmp.eq.s32.totalorder %s6586_s17, 1 }
   0xd   : > { %p6641_p10 = scmp.lt.s32.totalorder %s6835_s15, 2  ;;  %s137_s26 = sand.u32 1, %s6831_s14  }
   0xe   : > { %p6927_p11 = por %p105_p7, %p33_p0  ;;  %p6931_p12 = por %p111_p8, %p39_p3 }
   0xf   : > { %s6603_s27 = sshll.u32 %s6835_s15, 10  ;;  %s6589_s28 = sshll.u32 %s137_s26, 6 }
  0x10   : > { %s9993_s24 = scalar_select %p6927_p11, 1, 0 }
  0x11   : > { %s9994_s25 = scalar_select %p6931_p12, 1, 0 }
  0x12   : > { %s6940_s4 = scalar_lea.hbm %s9966_s0, %s6603_s27  ;;  %s141_s5 = scalar_lea.vmem [#allocation4], %s6589_s28 }
  0x13   : > { %s148_s6 = sshll.u32 %s141_s5, 4  ;;  %p6944_p13 = pnand %p6641_p10, %p6916_p5  ;;  %s6948_s6 = int_to_ptr.vmem [resolvable:$true] %s148_s6 }
  0x14   : > { %s6950_s8 = scalar_lea.sflag [#allocation5], %s137_s26  ;;  %s6739_s9 = scalar_lea.hbm %s6940_s4, 1024 }
  0x15   : > { %p6740_p0 = scmp.ne.s32.totalorder %s6940_s4, %s6739_s9  ;;  %p6741_p1 = pneg %p6944_p13 }
  0x16   : > { %s6744_s17 = scalar_lea.hbm %s9966_s0, 2048  ;;  %p6745_p4 = scmp.lt.u32.totalorder %s6940_s4, %s9966_s0 }
  0x17   : > { %p6742_p2 = pnand %p6741_p1, %p6740_p0  ;;  %p6746_p5 = scmp.lt.u32.totalorder %s6744_s17, %s6739_s9 }
  0x18   : > { %p6748_p8 = scmp.lt.u32.totalorder %s6739_s9, %s6940_s4 }
  0x19   : > { %p6743_p3 = pneg %p6742_p2  ;;  %p6747_p7 = por %p6746_p5, %p6745_p4 }
  0x1b   : > { %p6749_p10 = por %p6748_p8, %p6747_p7 }
  0x1d   : > { %p6750_p9 = pnand %p6749_p10, %p6743_p3 }
  0x1f   : > { %6753 = shalt.err (!%p6750_p9)
}
  0x20   : > { %s6754_s22 = scalar_lea.vmem %s6948_s6, 1024  ;;  %s6837_s26 = smov [#allocation4]  }
  0x21   : > { %p6755_p0 = scmp.ne.s32.totalorder %s6948_s6, %s6754_s22  ;;  %s6759_s27 = sshll.u32 %s6837_s26, 4  ;;  %s6760_s27 = int_to_ptr.vmem [resolvable:$false] %s6759_s27 }
  0x22   : > { %s6761_s28 = scalar_lea.vmem %s6760_s27, 2048  ;;  %p6762_p11 = scmp.lt.s32.totalorder %s6948_s6, %s6760_s27 }
  0x23   : > { %p6757_p2 = pnand %p6755_p0, %p6741_p1  ;;  %p6763_p4 = scmp.lt.s32.totalorder %s6761_s28, %s6754_s22 }
  0x25   : > { %p6758_p12 = pneg %p6757_p2  ;;  %p6764_p5 = por %p6763_p4, %p6762_p11 }
  0x27   : > { %p6765_p7 = pnand %p6764_p5, %p6758_p12 }
  0x29   : > { %6768 = shalt.err (!%p6765_p7)
}
  0x2a   : > { %s6838_s29 = smov 128   ;;  %s6839_s30 = smov 8  }
  0x2b   : > { %6636 = dma.hbm_to_vmem [thread:$0]  (!%p6944_p13), %s6940_s4, 1024, %s6948_s6, %s6950_s8, %s6838_s29, %s6838_s29, %s6839_s30  }
  0x2c   : > { %p6592_p9 = scmp.ge.s32.totalorder %s6835_s15, 1  ;;  %p156_p1 = scmp.lt.s32.totalorder %s6835_s15, 3 }
  0x2e   : > { %p157_p3 = pnand %p6592_p9, %p156_p1 }
  0x30   : > { %160 = sbr.rel (%p157_p3) target bundleno = 2575 (0xa0f), region = 32 }
  0x37   : > { %s6981_s5 = sand.u32 1, %s6827_s13  }
  0x38   : > { %s6593_s9 = sshll.u32 %s6981_s5, 6  ;;  %s163_s10 = scalar_lea.sflag [#allocation5], %s6981_s5 }
  0x39   : > { %s6985_s11 = scalar_lea.vmem [#allocation4], %s6593_s9 }
  0x3a   : > { %6814 = dma.done.wait (%p6920_p6), %s163_s10, 1024  }
  0x3b   : > { %6816 = vsyncadd (%p6920_p6), %s163_s10, 4294966272  ;;  %vm198_vm0 = vcmask 15360   ;;  %vm207_vm1 = vcmask 162960   ;;  %v9973_v0 = vmov 0.0   ;;  %vm189_vm2 = vcmask 156672   ;;  %v218_v1 = vld [vmem:[%s6985_s11 + $0x10] sm:$0xff] }
  0x3c   : > { %201 = vst.msk [vmem:[#allocation2 + $0x1a] sm:$0xff] %vm198_vm0, %v9973_v0  ;;  %199 = vst.msk [vmem:[#allocation2 + $0x2] sm:$0xff] %vm198_vm0, %v9973_v0  ;;  %6492 = vmatprep.mubr.f32.mxu0 %v9973_v0  ;;  %v216_v2 = vld [vmem:[%s6985_s11] sm:$0xff]  ;;  %s6841_s23 = smov 2   ;;  %v219_v3 = vld [vmem:[%s6985_s11 + $0x18] sm:$0xff]  ;;  %vm256_vm3 = vcmask 146448   ;;  %v278_v19 = vlaneseq }
  0x3d   : > { %200 = vst.msk [vmem:[#allocation2 + $0xa] sm:$0xff] %vm198_vm0, %v9973_v0  ;;  %202 = vst.msk [vmem:[#allocation2 + $0x22] sm:$0xff] %vm198_vm0, %v9973_v0  ;;  %236 = vrot.lane.b32.xlu1 %v218_v1, %s6841_s23  ;;  %232 = vrot.lane.b32.xlu0 %v216_v2, %s6841_s23  ;;  %v217_v4 = vld [vmem:[%s6985_s11 + $0x8] sm:$0xff]  ;;  %v220_v6 = vld [vmem:[%s6985_s11 + $0x20] sm:$0xff]  ;;  %s6842_s4 = smov 127   ;;  %s6844_s6 = smov 126  }
  0x3e   : > { %203 = vst.msk [vmem:[#allocation2 + $0x32] sm:$0xff] %vm198_vm0, %v9973_v0  ;;  %204 = vst.msk [vmem:[#allocation2 + $0x3a] sm:$0xff] %vm198_vm0, %v9973_v0  ;;  %v221_v5 = vld [vmem:[%s6985_s11 + $0x28] sm:$0xff]  ;;  %v223_v7 = vld [vmem:[%s6985_s11 + $0x38] sm:$0xff]  ;;  %v6843_v17 = vmov 1983009808  }
  0x3f   : > { %205 = vst.msk [vmem:[#allocation2 + $0x4a] sm:$0xff] %vm198_vm0, %v9973_v0  ;;  %206 = vst.msk [vmem:[#allocation2 + $0x52] sm:$0xff] %vm198_vm0, %v9973_v0  ;;  %v222_v8 = vld [vmem:[%s6985_s11 + $0x30] sm:$0xff]  ;;  %v276_v18 = vunpack.c.l.s4 %v6843_v17  ;;  %v279_v24 = vshrl.u32 %v278_v19, 7  ;;  %s6845_s7 = smov 125   ;;  %s6846_s8 = smov 124  }
  0x40   : > { %210 = vst.msk [vmem:[#allocation2 + $0x1a] sm:$0xff] %vm207_vm1, %v9973_v0  ;;  %208 = vst.msk [vmem:[#allocation2 + $0x2] sm:$0xff] %vm207_vm1, %v9973_v0  ;;  %v6847_v43 = vmov 1934713408   ;;  %s6848_s17 = smov 32   ;;  %s6849_s19 = smov 64  }
  0x41   : > { %209 = vst.msk [vmem:[#allocation2 + $0xa] sm:$0xff] %vm207_vm1, %v9973_v0  ;;  %211 = vst.msk [vmem:[#allocation2 + $0x22] sm:$0xff] %vm207_vm1, %v9973_v0  ;;  %238 = vrot.lane.b32.xlu1 %v219_v3, %s6841_s23  ;;  %234 = vrot.lane.b32.xlu0 %v217_v4, %s6841_s23  ;;  %v277_v23 = vunpack.c.0.s8 %v276_v18  ;;  %v308_v44 = vunpack.c.l.s4 %v6847_v43  ;;  %s6850_s20 = smov 96   ;;  %s6851_s22 = smov 16   ;;  %vm465_vm4 = vcmask 130048   ;;  %vm467_vm5 = vcmask 261120  }
  0x42   : > { %212 = vst.msk [vmem:[#allocation2 + $0x32] sm:$0xff] %vm207_vm1, %v9973_v0  ;;  %213 = vst.msk [vmem:[#allocation2 + $0x3a] sm:$0xff] %vm207_vm1, %v9973_v0  ;;  %s6852_s26 = smov 48   ;;  %s6853_s27 = smov 80   ;;  %vm469_vm6 = vcmask 392192   ;;  %vm471_vm7 = vcmask 523264  }
  0x43   : > { %214 = vst.msk [vmem:[#allocation2 + $0x4a] sm:$0xff] %vm207_vm1, %v9973_v0  ;;  %215 = vst.msk [vmem:[#allocation2 + $0x52] sm:$0xff] %vm207_vm1, %v9973_v0  ;;  %v7059_v28 = vsub.s32 %v277_v23, %v279_v24  ;;  %v309_v47 = vunpack.c.0.s8 %v308_v44  ;;  %s6854_s28 = smov 112   ;;  %vm473_vm8 = vcmask 654336   ;;  %vm475_vm9 = vcmask 785408   ;;  %s6594_s11 = sshll.u32 %s6981_s5, 4 }
  0x44   : > { %190 = vst.msk [vmem:[#allocation2] sm:$0x3] %vm189_vm2, %v9973_v0  ;;  %191 = vst.msk [vmem:[#allocation2 + $0x18] sm:$0x3] %vm189_vm2, %v9973_v0  ;;  %vm477_vm10 = vcmask 916480   ;;  %vm6421_vm11 = vcmask 1043456  }
  0x45   : > { %192 = vst.msk [vmem:[#allocation2 + $0x30] sm:$0x3] %vm189_vm2, %v9973_v0  ;;  %193 = vst.msk [vmem:[#allocation2 + $0x48] sm:$0x3] %vm189_vm2, %v9973_v0  ;;  %242 = vrot.lane.b32.xlu1 %v221_v5, %s6841_s23  ;;  %240 = vrot.lane.b32.xlu0 %v220_v6, %s6841_s23  ;;  %v7133_v53 = vsub.s32 %v309_v47, %v279_v24  ;;  %vm6417_vm12 = vcmask 818176   ;;  %p10055_p11 = scmp.ne.s32.totalorder %s9993_s24, 0 }
  0x46   : > { %194 = vst.msk [vmem:[#allocation2 + $0x12] sm:$0x3] %vm189_vm2, %v9973_v0  ;;  %195 = vst.msk [vmem:[#allocation2 + $0x2a] sm:$0x3] %vm189_vm2, %v9973_v0 }
  0x47   : > { %196 = vst.msk [vmem:[#allocation2 + $0x42] sm:$0x3] %vm189_vm2, %v9973_v0  ;;  %197 = vst.msk [vmem:[#allocation2 + $0x5a] sm:$0x3] %vm189_vm2, %v9973_v0 }
  0x49   : > { %246 = vrot.lane.b32.xlu1 %v223_v7, %s6841_s23  ;;  %244 = vrot.lane.b32.xlu0 %v222_v8, %s6841_s23  ;;  %s6604_s23 = sshll.u32 %s6898_s16, 8 }
  0xaf   : > { %v237_v9 = vpop.permute.xlu1 %236  ;;  %v233_v10 = vpop.permute.xlu0 %232 }
  0xb0   : > { %259 = vst.msk [vmem:[#allocation2 + $0x1a] sm:$0xff] %vm256_vm3, %v237_v9  ;;  %257 = vst.msk [vmem:[#allocation2 + $0x2] sm:$0xff] %vm256_vm3, %v233_v10 }
  0xb3   : > { %v239_v11 = vpop.permute.xlu1 %238  ;;  %v235_v12 = vpop.permute.xlu0 %234 }
  0xb4   : > { %260 = vst.msk [vmem:[#allocation2 + $0x22] sm:$0xff] %vm256_vm3, %v239_v11  ;;  %258 = vst.msk [vmem:[#allocation2 + $0xa] sm:$0xff] %vm256_vm3, %v235_v12 }
  0xb7   : > { %v243_v13 = vpop.permute.xlu1 %242  ;;  %v241_v14 = vpop.permute.xlu0 %240  ;;  %v488_v15 = vld [vmem:[#allocation2] sm:$0xff]  ;;  %v490_v16 = vld [vmem:[#allocation2 + $0x18] sm:$0xff] }
  0xb8   : > { %262 = vst.msk [vmem:[#allocation2 + $0x3a] sm:$0xff] %vm256_vm3, %v243_v13  ;;  %261 = vst.msk [vmem:[#allocation2 + $0x32] sm:$0xff] %vm256_vm3, %v241_v14  ;;  %504 = vrot.lane.b32.xlu0 %v488_v15, %s6842_s4  ;;  %v1714_v50 = vld [vmem:[#allocation2 + $0x1] sm:$0xff]  ;;  %v1716_v57 = vld [vmem:[#allocation2 + $0x19] sm:$0xff] }
  0xbb   : > { %v247_v20 = vpop.permute.xlu1 %246  ;;  %v245_v21 = vpop.permute.xlu0 %244  ;;  %v7047_v22 = vld [vmem:[#allocation2 + $0x8] sm:$0xff]  ;;  %v7054_v25 = vld [vmem:[#allocation2 + $0x20] sm:$0xff] }
  0xbc   : > { %264 = vst.msk [vmem:[#allocation2 + $0x52] sm:$0xff] %vm256_vm3, %v247_v20  ;;  %263 = vst.msk [vmem:[#allocation2 + $0x4a] sm:$0xff] %vm256_vm3, %v245_v21  ;;  %506 = vrot.lane.b32.xlu1 %v7047_v22, %s6842_s4  ;;  %508 = vrot.lane.b32.xlu0 %v490_v16, %s6842_s4  ;;  %v1715_v56 = vld [vmem:[#allocation2 + $0x9] sm:$0xff]  ;;  %v1717_v60 = vld [vmem:[#allocation2 + $0x21] sm:$0xff] }
  0xbf   : > { %v492_v26 = vld [vmem:[#allocation2 + $0x30] sm:$0xff]  ;;  %v7061_v30 = vld [vmem:[#allocation2 + $0x38] sm:$0xff] }
  0xc0   : > { %510 = vrot.lane.b32.xlu1 %v7054_v25, %s6842_s4  ;;  %512 = vrot.lane.b32.xlu0 %v492_v26, %s6842_s4  ;;  %v274_v27 = vcombine.high %v488_v15, %v492_v26  ;;  %v273_v29 = vcombine.low %v488_v15, %v492_v26  ;;  %v341_v46 = vcombine.low %v7047_v22, %v7061_v30  ;;  %v7143_v61 = vld [vmem:[#allocation2 + $0x39] sm:$0xff]  ;;  %v7156_v5 = vld [vmem:[#allocation2 + $0x31] sm:$0xff] }
  0xc1   : > { %v342_v52 = vcombine.high %v7047_v22, %v7061_v30  ;;  %v1568_v3 = vcombine.low %v1715_v56, %v7143_v61  ;;  %v1569_v11 = vcombine.high %v1715_v56, %v7143_v61  ;;  %v1500_v13 = vcombine.low %v1714_v50, %v7156_v5 }
  0xc2   : > { %v7067_v34 = vrot.slane %v273_v29, %v7059_v28  ;;  %v7073_v37 = vrot.slane %v274_v27, %v7059_v28  ;;  %v7129_v51 = vrot.slane %v341_v46, %v7059_v28 }
  0xc3   : > { %v494_v31 = vld [vmem:[#allocation2 + $0x48] sm:$0xff]  ;;  %v495_v36 = vld [vmem:[#allocation2 + $0x50] sm:$0xff]  ;;  %v356_v59 = vrot.slane %v342_v52, %v7059_v28  ;;  %v1576_v12 = vrot.slane %v1568_v3, %v7059_v28  ;;  %v1583_v20 = vrot.slane %v1569_v11, %v7059_v28  ;;  %v1508_v21 = vrot.slane %v1500_v13, %v7059_v28 }
  0xc4   : > { %514 = vrot.lane.b32.xlu1 %v7061_v30, %s6842_s4  ;;  %516 = vrot.lane.b32.xlu0 %v494_v31, %s6842_s4  ;;  %v289_v32 = vcombine.low %v490_v16, %v494_v31  ;;  %v290_v33 = vcombine.high %v490_v16, %v494_v31  ;;  %v357_v45 = vcombine.low %v7054_v25, %v495_v36  ;;  %v7138_v58 = vld [vmem:[#allocation2 + $0x51] sm:$0xff]  ;;  %v7149_v2 = vld [vmem:[#allocation2 + $0x49] sm:$0xff] }
  0xc5   : > { %v358_v49 = vcombine.high %v7054_v25, %v495_v36  ;;  %v1584_v1 = vcombine.low %v1717_v60, %v7138_v58  ;;  %v1585_v4 = vcombine.high %v1717_v60, %v7138_v58  ;;  %v1516_v6 = vcombine.low %v1716_v57, %v7149_v2 }
  0xc6   : > { %v7070_v35 = vrot.slane %v289_v32, %v7059_v28  ;;  %v7076_v38 = vrot.slane %v290_v33, %v7059_v28  ;;  %v7123_v48 = vrot.slane %v357_v45, %v7059_v28  ;;  %v1517_v19 = vcombine.high %v1716_v57, %v7149_v2 }
  0xc7   : > { %v372_v55 = vrot.slane %v358_v49, %v7059_v28  ;;  %v7165_v10 = vrot.slane %v1584_v1, %v7059_v28  ;;  %v1599_v14 = vrot.slane %v1585_v4, %v7059_v28 }
  0xc8   : > { %518 = vrot.lane.b32.xlu1 %v495_v36, %s6842_s4  ;;  %758 = vrot.lane.b32.xlu0 %v488_v15, %s6844_s6  ;;  %v306_v39 = vcombine.high %v7067_v34, %v7070_v35  ;;  %v321_v40 = vcombine.low %v7073_v37, %v7076_v38  ;;  %v322_v41 = vcombine.high %v7073_v37, %v7076_v38 }
  0xc9   : > { %v305_v42 = vcombine.low %v7067_v34, %v7070_v35  ;;  %v374_v54 = vcombine.high %v7129_v51, %v7123_v48  ;;  %v389_v63 = vcombine.low %v356_v59, %v372_v55  ;;  %v390_v9 = vcombine.high %v356_v59, %v372_v55 }
  0xca   : > { %v320_v8 = vrot.slane %v306_v39, %v7133_v53  ;;  %v329_v17 = vrot.slane %v321_v40, %v7133_v53  ;;  %v1601_v18 = vcombine.high %v1576_v12, %v7165_v10  ;;  %v1616_v23 = vcombine.low %v1583_v20, %v1599_v14 }
  0xcb   : > { %v7146_v62 = vrot.slane %v374_v54, %v7133_v53  ;;  %v397_v7 = vrot.slane %v389_v63, %v7133_v53  ;;  %v1531_v27 = vrot.slane %v1517_v19, %v7059_v28  ;;  %v1617_v32 = vcombine.high %v1583_v20, %v1599_v14 }
  0xcc   : > { %760 = vrot.lane.b32.xlu1 %v7047_v22, %s6844_s6  ;;  %762 = vrot.lane.b32.xlu0 %v490_v16, %s6844_s6  ;;  %v1615_v24 = vrot.slane %v1601_v18, %v7133_v53  ;;  %v7207_v40 = vrot.slane %v305_v42, %v7133_v53  ;;  %v338_v35 = vcombine.high %v320_v8, %v9973_v0 }
  0xcd   : > { %v1631_v37 = vrot.slane %v1617_v32, %v7133_v53  ;;  %v406_v42 = vcombine.high %v7146_v62, %v9973_v0  ;;  %v339_v45 = vcombine.high %v329_v17, %v9973_v0  ;;  %v407_v47 = vcombine.high %v397_v7, %v9973_v0 }
  0xce   : > { %v337_v43 = vcombine.high %v7207_v40, %v9973_v0 }
  0xd0   : > { %764 = vrot.lane.b32.xlu1 %v7054_v25, %s6844_s6  ;;  %766 = vrot.lane.b32.xlu0 %v492_v26, %s6844_s6 }
  0xd4   : > { %768 = vrot.lane.b32.xlu1 %v7061_v30, %s6844_s6  ;;  %770 = vrot.lane.b32.xlu0 %v494_v31, %s6844_s6 }
  0xd8   : > { %772 = vrot.lane.b32.xlu1 %v495_v36, %s6844_s6  ;;  %1006 = vrot.lane.b32.xlu0 %v488_v15, %s6845_s7 }
  0xdc   : > { %1008 = vrot.lane.b32.xlu1 %v7047_v22, %s6845_s7  ;;  %1010 = vrot.lane.b32.xlu0 %v490_v16, %s6845_s7 }
  0xe0   : > { %1012 = vrot.lane.b32.xlu1 %v7054_v25, %s6845_s7  ;;  %1014 = vrot.lane.b32.xlu0 %v492_v26, %s6845_s7 }
  0xe4   : > { %1016 = vrot.lane.b32.xlu1 %v7061_v30, %s6845_s7  ;;  %1018 = vrot.lane.b32.xlu0 %v494_v31, %s6845_s7 }
  0xe8   : > { %1020 = vrot.lane.b32.xlu1 %v495_v36, %s6845_s7  ;;  %1260 = vrot.lane.b32.xlu0 %v488_v15, %s6846_s8  ;;  %v1524_v15 = vrot.slane %v1516_v6, %v7059_v28 }
  0xea   : > { %v1532_v46 = vcombine.low %v1508_v21, %v1524_v15 }
  0xec   : > { %1262 = vrot.lane.b32.xlu1 %v7047_v22, %s6846_s8  ;;  %1264 = vrot.lane.b32.xlu0 %v490_v16, %s6846_s8  ;;  %v404_v16 = vrot.slane %v390_v9, %v7133_v53  ;;  %v1501_v22 = vcombine.high %v1714_v50, %v7156_v5  ;;  %v7232_v49 = vrot.slane %v1532_v46, %v7133_v53 }
  0xee   : > { %v1515_v29 = vrot.slane %v1501_v22, %v7059_v28  ;;  %v1564_v52 = vcombine.high %v7232_v49, %v9973_v0 }
  0xf0   : > { %1266 = vrot.lane.b32.xlu1 %v7054_v25, %s6846_s8  ;;  %1268 = vrot.lane.b32.xlu0 %v492_v26, %s6846_s8  ;;  %v336_v25 = vrot.slane %v322_v41, %v7133_v53  ;;  %v1533_v26 = vcombine.high %v1508_v21, %v1524_v15  ;;  %v1548_v33 = vcombine.low %v1515_v29, %v1531_v27 }
  0xf1   : > { %v1549_v39 = vcombine.high %v1515_v29, %v1531_v27 }
  0xf2   : > { %v1556_v38 = vrot.slane %v1548_v33, %v7133_v53 }
  0xf3   : > { %v1563_v41 = vrot.slane %v1549_v39, %v7133_v53 }
  0xf4   : > { %1270 = vrot.lane.b32.xlu1 %v7061_v30, %s6846_s8  ;;  %1272 = vrot.lane.b32.xlu0 %v494_v31, %s6846_s8  ;;  %v1624_v30 = vrot.slane %v1616_v23, %v7133_v53  ;;  %v1547_v31 = vrot.slane %v1533_v26, %v7133_v53  ;;  %v1566_v63 = vcombine.high %v1556_v38, %v9973_v0 }
  0xf5   : > { %v1567_v6 = vcombine.high %v1563_v41, %v9973_v0 }
  0xf6   : > { %v1634_v4 = vcombine.high %v1624_v30, %v9973_v0 }
  0xf8   : > { %1274 = vrot.lane.b32.xlu1 %v495_v36, %s6846_s8  ;;  %1730 = vrot.lane.b32.xlu0 %v1714_v50, %s6842_s4  ;;  %v373_v36 = vcombine.low %v7129_v51, %v7123_v48  ;;  %v340_v48 = vcombine.high %v336_v25, %v9973_v0  ;;  %v1600_v50 = vcombine.low %v1576_v12, %v7165_v10 }
  0xf9   : > { %v408_v51 = vcombine.high %v404_v16, %v9973_v0  ;;  %v1635_v10 = vcombine.high %v1631_v37, %v9973_v0 }
  0xfa   : > { %v7215_v44 = vrot.slane %v373_v36, %v7133_v53  ;;  %v7241_v54 = vrot.slane %v1600_v50, %v7133_v53 }
  0xfc   : > { %1732 = vrot.lane.b32.xlu1 %v1715_v56, %s6842_s4  ;;  %1734 = vrot.lane.b32.xlu0 %v1716_v57, %s6842_s4  ;;  %v405_v34 = vcombine.high %v7215_v44, %v9973_v0  ;;  %v1632_v56 = vcombine.high %v7241_v54, %v9973_v0  ;;  %v1565_v57 = vcombine.high %v1547_v31, %v9973_v0 }
 0x100   : > { %1736 = vrot.lane.b32.xlu1 %v1717_v60, %s6842_s4  ;;  %442 = vrot.lane.b32.xlu0 %v7146_v62, %s6848_s17  ;;  %v1633_v62 = vcombine.high %v1615_v24, %v9973_v0 }
 0x104   : > { %450 = vrot.lane.b32.xlu0 %v397_v7, %s6849_s19  ;;  %414 = vrot.lane.b32.xlu1 %v320_v8, %s6848_s17 }
 0x108   : > { %458 = vrot.lane.b32.xlu0 %v404_v16, %s6850_s20  ;;  %422 = vrot.lane.b32.xlu1 %v329_v17, %s6849_s19 }
 0x10c   : > { %1669 = vrot.lane.b32.xlu0 %v1615_v24, %s6848_s17  ;;  %430 = vrot.lane.b32.xlu1 %v336_v25, %s6850_s20 }
 0x110   : > { %1677 = vrot.lane.b32.xlu0 %v1624_v30, %s6849_s19  ;;  %1641 = vrot.lane.b32.xlu1 %v1547_v31, %s6848_s17 }
 0x114   : > { %1685 = vrot.lane.b32.xlu0 %v1631_v37, %s6850_s20  ;;  %1649 = vrot.lane.b32.xlu1 %v1556_v38, %s6849_s19 }
 0x118   : > { %1657 = vrot.lane.b32.xlu1 %v1563_v41, %s6850_s20  ;;  %410 = vrot.lane.b32.xlu0 %v337_v43, %s6851_s22 }
 0x11c   : > { %438 = vrot.lane.b32.xlu1 %v405_v34, %s6851_s22  ;;  %418 = vrot.lane.b32.xlu0 %v338_v35, %s6852_s26 }
 0x120   : > { %446 = vrot.lane.b32.xlu1 %v406_v42, %s6852_s26  ;;  %426 = vrot.lane.b32.xlu0 %v339_v45, %s6853_s27 }
 0x124   : > { %454 = vrot.lane.b32.xlu1 %v407_v47, %s6853_s27  ;;  %434 = vrot.lane.b32.xlu0 %v340_v48, %s6854_s28 }
 0x128   : > { %462 = vrot.lane.b32.xlu1 %v408_v51, %s6854_s28  ;;  %1637 = vrot.lane.b32.xlu0 %v1564_v52, %s6851_s22 }
 0x12a   : > { %v505_v55 = vpop.permute.xlu0 %504 }
 0x12c   : > { %1665 = vrot.lane.b32.xlu1 %v1632_v56, %s6851_s22  ;;  %1645 = vrot.lane.b32.xlu0 %v1565_v57, %s6852_s26 }
 0x12e   : > { %v507_v59 = vpop.permute.xlu1 %506  ;;  %v509_v60 = vpop.permute.xlu0 %508 }
 0x130   : > { %1673 = vrot.lane.b32.xlu1 %v1633_v62, %s6852_s26  ;;  %1653 = vrot.lane.b32.xlu0 %v1566_v63, %s6853_s27 }
 0x132   : > { %v511_v1 = vpop.permute.xlu1 %510  ;;  %v513_v3 = vpop.permute.xlu0 %512 }
 0x133   : > { %v528_v7 = vcombine.low %v505_v55, %v513_v3  ;;  %v529_v13 = vcombine.high %v505_v55, %v513_v3 }
 0x134   : > { %1681 = vrot.lane.b32.xlu1 %v1634_v4, %s6853_s27  ;;  %1661 = vrot.lane.b32.xlu0 %v1567_v6, %s6854_s28 }
 0x135   : > { %v7263_v14 = vrot.slane %v528_v7, %v7059_v28  ;;  %v543_v24 = vrot.slane %v529_v13, %v7059_v28 }
 0x136   : > { %v515_v8 = vpop.permute.xlu1 %514  ;;  %v517_v9 = vpop.permute.xlu0 %516 }
 0x137   : > { %v544_v11 = vcombine.low %v509_v60, %v517_v9  ;;  %v545_v12 = vcombine.high %v509_v60, %v517_v9  ;;  %v596_v15 = vcombine.low %v507_v59, %v515_v8  ;;  %v597_v20 = vcombine.high %v507_v59, %v515_v8 }
 0x138   : > { %1689 = vrot.lane.b32.xlu1 %v1635_v10, %s6854_s28  ;;  %1738 = vrot.lane.b32.xlu0 %v7156_v5, %s6842_s4 }
 0x139   : > { %v7266_v16 = vrot.slane %v544_v11, %v7059_v28  ;;  %v559_v17 = vrot.slane %v545_v12, %v7059_v28  ;;  %v7275_v5 = vrot.slane %v596_v15, %v7059_v28  ;;  %v611_v32 = vrot.slane %v597_v20, %v7059_v28 }
 0x13a   : > { %v519_v18 = vpop.permute.xlu1 %518  ;;  %v759_v19 = vpop.permute.xlu0 %758 }
 0x13b   : > { %v612_v21 = vcombine.low %v511_v1, %v519_v18  ;;  %v613_v22 = vcombine.high %v511_v1, %v519_v18  ;;  %v561_v23 = vcombine.high %v7263_v14, %v7266_v16  ;;  %v576_v31 = vcombine.low %v543_v24, %v559_v17 }
 0x13c   : > { %1740 = vrot.lane.b32.xlu1 %v7143_v61, %s6842_s4  ;;  %v577_v41 = vcombine.high %v543_v24, %v559_v17 }
 0x13d   : > { %v7278_v25 = vrot.slane %v612_v21, %v7059_v28  ;;  %v627_v26 = vrot.slane %v613_v22, %v7059_v28  ;;  %v7282_v27 = vrot.slane %v561_v23, %v7133_v53  ;;  %v7293_v39 = vrot.slane %v576_v31, %v7133_v53 }
 0x13e   : > { %v761_v29 = vpop.permute.xlu1 %760  ;;  %v763_v30 = vpop.permute.xlu0 %762  ;;  %v7303_v46 = vrot.slane %v577_v41, %v7133_v53 }
 0x13f   : > { %v629_v33 = vcombine.high %v7275_v5, %v7278_v25  ;;  %v644_v36 = vcombine.low %v611_v32, %v627_v26  ;;  %v645_v43 = vcombine.high %v611_v32, %v627_v26 }
 0x140   : > { %669 = vrot.lane.b32.xlu1 %v7282_v27, %s6848_s17 }
 0x141   : > { %v7290_v61 = vrot.slane %v629_v33, %v7133_v53  ;;  %v7300_v35 = vrot.slane %v644_v36, %v7133_v53  ;;  %v7310_v51 = vrot.slane %v645_v43, %v7133_v53 }
 0x142   : > { %v765_v37 = vpop.permute.xlu1 %764  ;;  %v767_v38 = vpop.permute.xlu0 %766 }
 0x143   : > { %697 = vrot.lane.b32.xlu0 %v7290_v61, %s6848_s17  ;;  %v782_v34 = vcombine.low %v759_v19, %v767_v38  ;;  %v783_v47 = vcombine.high %v759_v19, %v767_v38 }
 0x144   : > { %677 = vrot.lane.b32.xlu1 %v7293_v39, %s6849_s19 }
 0x145   : > { %v7313_v52 = vrot.slane %v782_v34, %v7059_v28  ;;  %v797_v62 = vrot.slane %v783_v47, %v7059_v28 }
 0x146   : > { %v769_v42 = vpop.permute.xlu1 %768  ;;  %v771_v45 = vpop.permute.xlu0 %770 }
 0x147   : > { %v798_v48 = vcombine.low %v763_v30, %v771_v45  ;;  %v799_v50 = vcombine.high %v763_v30, %v771_v45  ;;  %705 = vrot.lane.b32.xlu0 %v7300_v35, %s6849_s19  ;;  %v850_v55 = vcombine.low %v761_v29, %v769_v42  ;;  %v851_v4 = vcombine.high %v761_v29, %v769_v42 }
 0x148   : > { %685 = vrot.lane.b32.xlu1 %v7303_v46, %s6850_s20 }
 0x149   : > { %v7316_v56 = vrot.slane %v798_v48, %v7059_v28  ;;  %v813_v57 = vrot.slane %v799_v50, %v7059_v28  ;;  %v7325_v6 = vrot.slane %v850_v55, %v7059_v28  ;;  %v865_v15 = vrot.slane %v851_v4, %v7059_v28 }
 0x14a   : > { %v773_v59 = vpop.permute.xlu1 %772  ;;  %v1007_v60 = vpop.permute.xlu0 %1006 }
 0x14b   : > { %v866_v63 = vcombine.low %v765_v37, %v773_v59  ;;  %v867_v1 = vcombine.high %v765_v37, %v773_v59  ;;  %713 = vrot.lane.b32.xlu0 %v7310_v51, %s6850_s20  ;;  %v815_v3 = vcombine.high %v7313_v52, %v7316_v56  ;;  %v830_v9 = vcombine.low %v797_v62, %v813_v57 }
 0x14c   : > { %v831_v19 = vcombine.high %v797_v62, %v813_v57 }
 0x14d   : > { %v7328_v7 = vrot.slane %v866_v63, %v7059_v28  ;;  %v7331_v8 = vrot.slane %v815_v3, %v7133_v53  ;;  %v881_v10 = vrot.slane %v867_v1, %v7059_v28  ;;  %v7340_v17 = vrot.slane %v830_v9, %v7133_v53 }
 0x14e   : > { %v1009_v11 = vpop.permute.xlu1 %1008  ;;  %v1011_v12 = vpop.permute.xlu0 %1010  ;;  %v7350_v24 = vrot.slane %v831_v19, %v7133_v53 }
 0x14f   : > { %923 = vrot.lane.b32.xlu1 %v7331_v8, %s6848_s17  ;;  %v883_v13 = vcombine.high %v7325_v6, %v7328_v7  ;;  %v898_v22 = vcombine.low %v865_v15, %v881_v10  ;;  %v899_v31 = vcombine.high %v865_v15, %v881_v10 }
 0x151   : > { %v7343_v18 = vrot.slane %v883_v13, %v7133_v53  ;;  %v7353_v30 = vrot.slane %v898_v22, %v7133_v53  ;;  %v7367_v45 = vrot.slane %v899_v31, %v7133_v53 }
 0x152   : > { %v1013_v20 = vpop.permute.xlu1 %1012  ;;  %v1015_v21 = vpop.permute.xlu0 %1014 }
 0x153   : > { %931 = vrot.lane.b32.xlu1 %v7340_v17, %s6849_s19  ;;  %951 = vrot.lane.b32.xlu0 %v7343_v18, %s6848_s17  ;;  %v1030_v23 = vcombine.low %v1007_v60, %v1015_v21  ;;  %v1031_v32 = vcombine.high %v1007_v60, %v1015_v21 }
 0x155   : > { %v7360_v37 = vrot.slane %v1030_v23, %v7059_v28  ;;  %v1045_v47 = vrot.slane %v1031_v32, %v7059_v28 }
 0x156   : > { %v1017_v26 = vpop.permute.xlu1 %1016  ;;  %v1019_v29 = vpop.permute.xlu0 %1018 }
 0x157   : > { %v1046_v33 = vcombine.low %v1011_v12, %v1019_v29  ;;  %v1047_v36 = vcombine.high %v1011_v12, %v1019_v29  ;;  %939 = vrot.lane.b32.xlu1 %v7350_v24, %s6850_s20  ;;  %959 = vrot.lane.b32.xlu0 %v7353_v30, %s6849_s19  ;;  %v1098_v38 = vcombine.low %v1009_v11, %v1017_v26 }
 0x158   : > { %v1099_v57 = vcombine.high %v1009_v11, %v1017_v26 }
 0x159   : > { %v7363_v41 = vrot.slane %v1046_v33, %v7059_v28  ;;  %v1061_v43 = vrot.slane %v1047_v36, %v7059_v28  ;;  %v7375_v59 = vrot.slane %v1098_v38, %v7059_v28 }
 0x15a   : > { %v1021_v34 = vpop.permute.xlu1 %1020  ;;  %v1261_v42 = vpop.permute.xlu0 %1260  ;;  %v1113_v10 = vrot.slane %v1099_v57, %v7059_v28 }
 0x15b   : > { %v1114_v48 = vcombine.low %v1013_v20, %v1021_v34  ;;  %v1115_v50 = vcombine.high %v1013_v20, %v1021_v34  ;;  %v1063_v55 = vcombine.high %v7360_v37, %v7363_v41  ;;  %967 = vrot.lane.b32.xlu0 %v7367_v45, %s6850_s20  ;;  %v1078_v63 = vcombine.low %v1045_v47, %v1061_v43 }
 0x15c   : > { %v1079_v13 = vcombine.high %v1045_v47, %v1061_v43 }
 0x15d   : > { %v7378_v60 = vrot.slane %v1114_v48, %v7059_v28  ;;  %v7381_v62 = vrot.slane %v1063_v55, %v7133_v53  ;;  %v1129_v1 = vrot.slane %v1115_v50, %v7059_v28  ;;  %v7390_v11 = vrot.slane %v1078_v63, %v7133_v53 }
 0x15e   : > { %v1263_v3 = vpop.permute.xlu1 %1262  ;;  %v1265_v4 = vpop.permute.xlu0 %1264  ;;  %v7400_v22 = vrot.slane %v1079_v13, %v7133_v53 }
 0x15f   : > { %1171 = vrot.lane.b32.xlu1 %v7381_v62, %s6848_s17  ;;  %v1131_v9 = vcombine.high %v7375_v59, %v7378_v60  ;;  %v1146_v20 = vcombine.low %v1113_v10, %v1129_v1  ;;  %v1147_v32 = vcombine.high %v1113_v10, %v1129_v1 }
 0x161   : > { %v7393_v12 = vrot.slane %v1131_v9, %v7133_v53  ;;  %v7403_v31 = vrot.slane %v1146_v20, %v7133_v53  ;;  %v7420_v55 = vrot.slane %v1147_v32, %v7133_v53 }
 0x162   : > { %v1267_v15 = vpop.permute.xlu1 %1266  ;;  %v1269_v19 = vpop.permute.xlu0 %1268 }
 0x163   : > { %1179 = vrot.lane.b32.xlu1 %v7390_v11, %s6849_s19  ;;  %1199 = vrot.lane.b32.xlu0 %v7393_v12, %s6848_s17  ;;  %v1284_v21 = vcombine.low %v1261_v42, %v1269_v19  ;;  %v1285_v23 = vcombine.high %v1261_v42, %v1269_v19 }
 0x165   : > { %v7410_v43 = vrot.slane %v1284_v21, %v7059_v28  ;;  %v1299_v47 = vrot.slane %v1285_v23, %v7059_v28 }
 0x166   : > { %v1271_v26 = vpop.permute.xlu1 %1270  ;;  %v1273_v29 = vpop.permute.xlu0 %1272 }
 0x167   : > { %v1300_v33 = vcombine.low %v1265_v4, %v1273_v29  ;;  %v1301_v36 = vcombine.high %v1265_v4, %v1273_v29  ;;  %1187 = vrot.lane.b32.xlu1 %v7400_v22, %s6850_s20  ;;  %v1352_v38 = vcombine.low %v1263_v3, %v1271_v26  ;;  %1207 = vrot.lane.b32.xlu0 %v7403_v31, %s6849_s19 }
 0x168   : > { %v1353_v57 = vcombine.high %v1263_v3, %v1271_v26  ;;  %v628_v26 = vcombine.low %v7275_v5, %v7278_v25  ;;  %v560_v5 = vcombine.low %v7263_v14, %v7266_v16 }
 0x169   : > { %v7413_v34 = vrot.slane %v1300_v33, %v7059_v28  ;;  %v1315_v42 = vrot.slane %v1301_v36, %v7059_v28  ;;  %v7425_v9 = vrot.slane %v1352_v38, %v7059_v28 }
 0x16a   : > { %v1275_v48 = vpop.permute.xlu1 %1274  ;;  %v7417_v50 = vpop.permute.xlu0 %1730  ;;  %v1367_v21 = vrot.slane %v1353_v57, %v7059_v28 }
 0x16b   : > { %v1368_v63 = vcombine.low %v1267_v15, %v1275_v48  ;;  %v1369_v1 = vcombine.high %v1267_v15, %v1275_v48  ;;  %v1317_v4 = vcombine.high %v7410_v43, %v7413_v34  ;;  %1215 = vrot.lane.b32.xlu0 %v7420_v55, %s6850_s20  ;;  %v1332_v3 = vcombine.low %v1299_v47, %v1315_v42 }
 0x16c   : > { %v1333_v33 = vcombine.high %v1299_v47, %v1315_v42  ;;  %v7470_v42 = vrot.slane %v628_v26, %v7133_v53 }
 0x16d   : > { %v7430_v10 = vrot.slane %v1368_v63, %v7059_v28  ;;  %v1383_v13 = vrot.slane %v1369_v1, %v7059_v28  ;;  %v7434_v19 = vrot.slane %v1317_v4, %v7133_v53  ;;  %v7448_v29 = vrot.slane %v1332_v3, %v7133_v53 }
 0x16e   : > { %v7436_v20 = vpop.permute.xlu1 %1732  ;;  %v7438_v15 = vpop.permute.xlu0 %1734  ;;  %v7464_v25 = vrot.slane %v1333_v33, %v7133_v53  ;;  %v660_v14 = vcombine.high %v7470_v42, %v9973_v0  ;;  %v7484_v4 = vrot.slane %v560_v5, %v7133_v53  ;;  %v662_v5 = vcombine.high %v7300_v35, %v9973_v0 }
 0x16f   : > { %9996 = vst [vmem:[#allocation10_spill] sm:$0xff] %v7436_v20  ;;  %1425 = vrot.lane.b32.xlu1 %v7434_v19, %s6848_s17  ;;  %v1385_v23 = vcombine.high %v7425_v9, %v7430_v10  ;;  %v1400_v36 = vcombine.low %v1367_v21, %v1383_v13  ;;  %v1401_v47 = vcombine.high %v1367_v21, %v1383_v13 }
 0x170   : > { %v661_v21 = vcombine.high %v7290_v61, %v9973_v0  ;;  %v663_v35 = vcombine.high %v7310_v51, %v9973_v0 }
 0x171   : > { %v7451_v32 = vrot.slane %v1385_v23, %v7133_v53  ;;  %v7467_v57 = vrot.slane %v1400_v36, %v7133_v53  ;;  %v7481_v16 = vrot.slane %v1401_v47, %v7133_v53  ;;  %v592_v23 = vcombine.high %v7484_v4, %v9973_v0 }
 0x172   : > { %v7453_v38 = vpop.permute.xlu1 %1736  ;;  %v7455_v48 = vpop.permute.xlu0 %442  ;;  %v593_v36 = vcombine.high %v7282_v27, %v9973_v0  ;;  %v882_v47 = vcombine.low %v7325_v6, %v7328_v7  ;;  %v814_v27 = vcombine.low %v7313_v52, %v7316_v56 }
 0x173   : > { %1433 = vrot.lane.b32.xlu1 %v7448_v29, %s6849_s19  ;;  %1453 = vrot.lane.b32.xlu0 %v7451_v32, %s6848_s17 }
 0x174   : > { %v7531_v51 = vrot.slane %v814_v27, %v7133_v53 }
 0x176   : > { %v7472_v63 = vpop.permute.xlu0 %450  ;;  %v415_v1 = vpop.permute.xlu1 %414 }
 0x177   : > { %1441 = vrot.lane.b32.xlu1 %v7464_v25, %s6850_s20  ;;  %1461 = vrot.lane.b32.xlu0 %v7467_v57, %s6849_s19 }
 0x17a   : > { %v7486_v3 = vpop.permute.xlu0 %458  ;;  %v423_v13 = vpop.permute.xlu1 %422 }
 0x17b   : > { %693 = vrot.lane.b32.xlu1 %v660_v14, %s6851_s22  ;;  %1469 = vrot.lane.b32.xlu0 %v7481_v16, %s6850_s20 }
 0x17e   : > { %v7495_v26 = vpop.permute.xlu0 %1669  ;;  %v431_v33 = vpop.permute.xlu1 %430 }
 0x17f   : > { %701 = vrot.lane.b32.xlu1 %v661_v21, %s6852_s26  ;;  %665 = vrot.lane.b32.xlu0 %v592_v23, %s6851_s22  ;;  %v594_v21 = vcombine.high %v7293_v39, %v9973_v0  ;;  %v7518_v23 = vrot.slane %v882_v47, %v7133_v53  ;;  %v595_v39 = vcombine.high %v7303_v46, %v9973_v0 }
 0x180   : > { %v915_v46 = vcombine.high %v7343_v18, %v9973_v0  ;;  %v846_v47 = vcombine.high %v7531_v51, %v9973_v0  ;;  %v847_v18 = vcombine.high %v7331_v8, %v9973_v0  ;;  %v848_v8 = vcombine.high %v7340_v17, %v9973_v0 }
 0x181   : > { %v914_v52 = vcombine.high %v7518_v23, %v9973_v0 }
 0x182   : > { %v7505_v61 = vpop.permute.xlu0 %1677  ;;  %v7507_v14 = vpop.permute.xlu1 %1641 }
 0x183   : > { %709 = vrot.lane.b32.xlu1 %v662_v5, %s6853_s27  ;;  %673 = vrot.lane.b32.xlu0 %v593_v36, %s6852_s26 }
 0x186   : > { %v7520_v6 = vpop.permute.xlu0 %1685  ;;  %v7522_v7 = vpop.permute.xlu1 %1649 }
 0x187   : > { %717 = vrot.lane.b32.xlu1 %v663_v35, %s6854_s28  ;;  %681 = vrot.lane.b32.xlu0 %v594_v21, %s6853_s27 }
 0x18a   : > { %v7533_v56 = vpop.permute.xlu1 %1657  ;;  %v411_v36 = vpop.permute.xlu0 %410 }
 0x18b   : > { %v466_v5 = vsel %vm465_vm4, %v7207_v40, %v411_v36  ;;  %947 = vrot.lane.b32.xlu1 %v914_v52, %s6851_s22  ;;  %689 = vrot.lane.b32.xlu0 %v595_v39, %s6854_s28  ;;  %v916_v39 = vcombine.high %v7353_v30, %v9973_v0  ;;  %v1062_v30 = vcombine.low %v7360_v37, %v7363_v41 }
 0x18c   : > { %v468_v27 = vsel %vm467_vm5, %v466_v5, %v415_v1  ;;  %v1130_v1 = vcombine.low %v7375_v59, %v7378_v60  ;;  %v917_v59 = vcombine.high %v7367_v45, %v9973_v0  ;;  %v849_v37 = vcombine.high %v7350_v24, %v9973_v0 }
 0x18d   : > { %v7583_v45 = vrot.slane %v1062_v30, %v7133_v53  ;;  %v1163_v24 = vcombine.high %v7393_v12, %v9973_v0  ;;  %v1095_v12 = vcombine.high %v7381_v62, %v9973_v0  ;;  %v1096_v62 = vcombine.high %v7390_v11, %v9973_v0 }
 0x18e   : > { %v439_v21 = vpop.permute.xlu1 %438  ;;  %v419_v35 = vpop.permute.xlu0 %418  ;;  %v7569_v60 = vrot.slane %v1130_v1, %v7133_v53 }
 0x18f   : > { %v479_v20 = vsel %vm465_vm4, %v7215_v44, %v439_v21  ;;  %v470_v40 = vsel %vm469_vm6, %v468_v27, %v419_v35  ;;  %955 = vrot.lane.b32.xlu1 %v915_v46, %s6852_s26  ;;  %919 = vrot.lane.b32.xlu0 %v846_v47, %s6851_s22 }
 0x190   : > { %v480_v44 = vsel %vm467_vm5, %v479_v20, %v7455_v48  ;;  %v472_v36 = vsel %vm471_vm7, %v470_v40, %v423_v13  ;;  %v1162_v41 = vcombine.high %v7569_v60, %v9973_v0 }
 0x192   : > { %v447_v52 = vpop.permute.xlu1 %446  ;;  %v427_v5 = vpop.permute.xlu0 %426 }
 0x193   : > { %v481_v46 = vsel %vm469_vm6, %v480_v44, %v447_v52  ;;  %v474_v47 = vsel %vm473_vm8, %v472_v36, %v427_v5  ;;  %963 = vrot.lane.b32.xlu1 %v916_v39, %s6853_s27  ;;  %927 = vrot.lane.b32.xlu0 %v847_v18, %s6852_s26  ;;  %v1094_v39 = vcombine.high %v7583_v45, %v9973_v0 }
 0x194   : > { %v482_v20 = vsel %vm471_vm7, %v481_v46, %v7472_v63  ;;  %v476_v13 = vsel %vm475_vm9, %v474_v47, %v431_v33  ;;  %v1164_v36 = vcombine.high %v7403_v31, %v9973_v0  ;;  %v1384_v5 = vcombine.low %v7425_v9, %v7430_v10 }
 0x195   : > { %v1316_v31 = vcombine.low %v7410_v43, %v7413_v34  ;;  %v1165_v9 = vcombine.high %v7420_v55, %v9973_v0  ;;  %v1097_v34 = vcombine.high %v7400_v22, %v9973_v0  ;;  %v1417_v22 = vcombine.high %v7451_v32, %v9973_v0 }
 0x196   : > { %v455_v48 = vpop.permute.xlu1 %454  ;;  %v435_v21 = vpop.permute.xlu0 %434  ;;  %v7624_v10 = vrot.slane %v1384_v5, %v7133_v53  ;;  %v1350_v32 = vcombine.high %v7448_v29, %v9973_v0 }
 0x197   : > { %v483_v27 = vsel %vm473_vm8, %v482_v20, %v455_v48  ;;  %v478_v17 = vsel %vm477_vm10, %v476_v13, %v435_v21  ;;  %971 = vrot.lane.b32.xlu1 %v917_v59, %s6854_s28  ;;  %935 = vrot.lane.b32.xlu0 %v848_v8, %s6853_s27 }
 0x198   : > { %486 = vst [vmem:[#allocation3] sm:$0xf] %v478_v17  ;;  %v484_v63 = vsel %vm475_vm9, %v483_v27, %v7486_v3  ;;  %v1416_v55 = vcombine.high %v7624_v10, %v9973_v0 }
 0x19a   : > { %v463_v33 = vpop.permute.xlu1 %462  ;;  %v1638_v35 = vpop.permute.xlu0 %1637 }
 0x19b   : > { %v485_v40 = vsel %vm477_vm10, %v484_v63, %v463_v33  ;;  %v1692_v18 = vsel %vm465_vm4, %v7232_v49, %v1638_v35  ;;  %1195 = vrot.lane.b32.xlu1 %v1162_v41, %s6851_s22  ;;  %943 = vrot.lane.b32.xlu0 %v849_v37, %s6854_s28  ;;  %v1418_v41 = vcombine.high %v7467_v57, %v9973_v0 }
 0x19c   : > { %487 = vst [vmem:[#allocation3 + $0x8] sm:$0xf] %v485_v40  ;;  %v1693_v3 = vsel %vm467_vm5, %v1692_v18, %v7507_v14  ;;  %v1419_v35 = vcombine.high %v7481_v16, %v9973_v0 }
 0x19e   : > { %v1666_v1 = vpop.permute.xlu1 %1665  ;;  %v1646_v44 = vpop.permute.xlu0 %1645 }
 0x19f   : > { %v1699_v52 = vsel %vm465_vm4, %v7241_v54, %v1666_v1  ;;  %v1694_v49 = vsel %vm469_vm6, %v1693_v3, %v1646_v44  ;;  %1203 = vrot.lane.b32.xlu1 %v1163_v24, %s6852_s26  ;;  %1167 = vrot.lane.b32.xlu0 %v1094_v39, %s6851_s22 }
 0x1a0   : > { %v1700_v14 = vsel %vm467_vm5, %v1699_v52, %v7495_v26  ;;  %v1695_v54 = vsel %vm471_vm7, %v1694_v49, %v7522_v7 }
 0x1a2   : > { %v1674_v46 = vpop.permute.xlu1 %1673  ;;  %v1654_v47 = vpop.permute.xlu0 %1653 }
 0x1a3   : > { %v1701_v8 = vsel %vm469_vm6, %v1700_v14, %v1674_v46  ;;  %v1696_v30 = vsel %vm473_vm8, %v1695_v54, %v1654_v47  ;;  %1211 = vrot.lane.b32.xlu1 %v1164_v36, %s6853_s27  ;;  %1175 = vrot.lane.b32.xlu0 %v1095_v12, %s6852_s26 }
 0x1a4   : > { %v1702_v26 = vsel %vm471_vm7, %v1701_v8, %v7505_v61  ;;  %v1697_v59 = vsel %vm475_vm9, %v1696_v30, %v7533_v56  ;;  %v7639_v61 = vrot.slane %v1316_v31, %v7133_v53 }
 0x1a6   : > { %v1682_v7 = vpop.permute.xlu1 %1681  ;;  %v1662_v20 = vpop.permute.xlu0 %1661  ;;  %v1348_v17 = vcombine.high %v7639_v61, %v9973_v0 }
 0x1a7   : > { %v1703_v48 = vsel %vm473_vm8, %v1702_v26, %v1682_v7  ;;  %v1698_v11 = vsel %vm477_vm10, %v1697_v59, %v1662_v20  ;;  %1219 = vrot.lane.b32.xlu1 %v1165_v9, %s6854_s28  ;;  %1183 = vrot.lane.b32.xlu0 %v1096_v62, %s6853_s27 }
 0x1a8   : > { %v1708_v43 = vrot.slane %v1698_v11, 4  ;;  %v1704_v56 = vsel %vm475_vm9, %v1703_v48, %v7520_v6  ;;  %v1349_v6 = vcombine.high %v7434_v19, %v9973_v0  ;;  %v1351_v19 = vcombine.high %v7464_v25, %v9973_v0 }
 0x1aa   : > { %1712 = vst [vmem:[#allocation3 + $0x20] sm:$0xf0] %v1708_v43  ;;  %v1690_v13 = vpop.permute.xlu1 %1689  ;;  %v7658_v63 = vpop.permute.xlu0 %1738 }
 0x1ab   : > { %v1705_v21 = vsel %vm477_vm10, %v1704_v56, %v1690_v13  ;;  %1449 = vrot.lane.b32.xlu1 %v1416_v55, %s6851_s22  ;;  %1191 = vrot.lane.b32.xlu0 %v1097_v34, %s6854_s28 }
 0x1ac   : > { %v1709_v27 = vrot.slane %v1705_v21, 4 }
 0x1ae   : > { %1713 = vst [vmem:[#allocation3 + $0x28] sm:$0xf0] %v1709_v27  ;;  %v7650_v37 = vpop.permute.xlu1 %1740 }
 0x1af   : > { %1457 = vrot.lane.b32.xlu1 %v1417_v22, %s6852_s26  ;;  %1421 = vrot.lane.b32.xlu0 %v1348_v17, %s6851_s22 }
 0x1b2   : > { %v670_v33 = vpop.permute.xlu1 %669 }
 0x1b3   : > { %1465 = vrot.lane.b32.xlu1 %v1418_v41, %s6853_s27  ;;  %1429 = vrot.lane.b32.xlu0 %v1349_v6, %s6852_s26 }
 0x1b5   : > { %v698_v40 = vpop.permute.xlu0 %697 }
 0x1b6   : > { %v678_v18 = vpop.permute.xlu1 %677 }
 0x1b7   : > { %1473 = vrot.lane.b32.xlu1 %v1419_v35, %s6854_s28  ;;  %1437 = vrot.lane.b32.xlu0 %v1350_v32, %s6853_s27 }
 0x1b9   : > { %v706_v57 = vpop.permute.xlu0 %705 }
 0x1ba   : > { %v686_v24 = vpop.permute.xlu1 %685 }
 0x1bb   : > { %1744 = vrot.lane.b32.xlu1 %v7138_v58, %s6842_s4  ;;  %1445 = vrot.lane.b32.xlu0 %v1351_v19, %s6854_s28 }
 0x1bd   : > { %v714_v29 = vpop.permute.xlu0 %713 }
 0x1bf   : > { %1742 = vrot.lane.b32.xlu0 %v7149_v2, %s6842_s4 }
 0x1c1   : > { %v924_v16 = vpop.permute.xlu1 %923 }
 0x1c5   : > { %v952_v39 = vpop.permute.xlu0 %951  ;;  %v932_v1 = vpop.permute.xlu1 %931 }
 0x1c9   : > { %v960_v3 = vpop.permute.xlu0 %959  ;;  %v940_v44 = vpop.permute.xlu1 %939 }
 0x1cd   : > { %v968_v52 = vpop.permute.xlu0 %967 }
 0x1d1   : > { %v7675_v49 = vpop.permute.xlu1 %1171 }
 0x1d5   : > { %v7677_v25 = vpop.permute.xlu0 %1199  ;;  %v7679_v12 = vpop.permute.xlu1 %1179 }
 0x1d9   : > { %v7681_v58 = vpop.permute.xlu0 %1207  ;;  %v7683_v36 = vpop.permute.xlu1 %1187 }
 0x1dd   : > { %v7685_v5 = vpop.permute.xlu0 %1215 }
 0x1e1   : > { %v7687_v2 = vpop.permute.xlu1 %1425 }
 0x1e5   : > { %v7689_v14 = vpop.permute.xlu1 %1433  ;;  %v7691_v46 = vpop.permute.xlu0 %1453 }
 0x1e9   : > { %v7693_v54 = vpop.permute.xlu1 %1441  ;;  %v7695_v47 = vpop.permute.xlu0 %1461 }
 0x1ed   : > { %v694_v8 = vpop.permute.xlu1 %693  ;;  %v7697_v30 = vpop.permute.xlu0 %1469 }
 0x1ee   : > { %v727_v62 = vsel %vm465_vm4, %v7470_v42, %v694_v8 }
 0x1ef   : > { %v728_v9 = vsel %vm467_vm5, %v727_v62, %v698_v40 }
 0x1f1   : > { %v702_v31 = vpop.permute.xlu1 %701  ;;  %v666_v26 = vpop.permute.xlu0 %665 }
 0x1f2   : > { %v729_v7 = vsel %vm469_vm6, %v728_v9, %v702_v31  ;;  %v720_v59 = vsel %vm465_vm4, %v7484_v4, %v666_v26 }
 0x1f3   : > { %v730_v48 = vsel %vm471_vm7, %v729_v7, %v706_v57  ;;  %v721_v11 = vsel %vm467_vm5, %v720_v59, %v670_v33 }
 0x1f5   : > { %v710_v20 = vpop.permute.xlu1 %709  ;;  %v674_v43 = vpop.permute.xlu0 %673 }
 0x1f6   : > { %v731_v34 = vsel %vm473_vm8, %v730_v48, %v710_v20  ;;  %v722_v55 = vsel %vm469_vm6, %v721_v11, %v674_v43 }
 0x1f7   : > { %v732_v56 = vsel %vm475_vm9, %v731_v34, %v714_v29  ;;  %v723_v13 = vsel %vm471_vm7, %v722_v55, %v678_v18 }
 0x1f9   : > { %v718_v42 = vpop.permute.xlu1 %717  ;;  %v682_v21 = vpop.permute.xlu0 %681 }
 0x1fa   : > { %v733_v27 = vsel %vm477_vm10, %v732_v56, %v718_v42  ;;  %v724_v4 = vsel %vm473_vm8, %v723_v13, %v682_v21 }
 0x1fb   : > { %v737_v22 = vrot.slane %v733_v27, 4  ;;  %v725_v6 = vsel %vm475_vm9, %v724_v4, %v686_v24 }
 0x1fd   : > { %741 = vst [vmem:[#allocation3 + $0x8] sm:$0xf0] %v737_v22  ;;  %v948_v17 = vpop.permute.xlu1 %947  ;;  %v690_v41 = vpop.permute.xlu0 %689 }
 0x1fe   : > { %v981_v33 = vsel %vm465_vm4, %v7518_v23, %v948_v17  ;;  %v726_v32 = vsel %vm477_vm10, %v725_v6, %v690_v41 }
 0x1ff   : > { %v736_v35 = vrot.slane %v726_v32, 4  ;;  %v982_v18 = vsel %vm467_vm5, %v981_v33, %v952_v39 }
 0x201   : > { %740 = vst [vmem:[#allocation3] sm:$0xf0] %v736_v35  ;;  %v956_v40 = vpop.permute.xlu1 %955  ;;  %v920_v19 = vpop.permute.xlu0 %919 }
 0x202   : > { %v983_v57 = vsel %vm469_vm6, %v982_v18, %v956_v40  ;;  %v974_v29 = vsel %vm465_vm4, %v7531_v51, %v920_v19 }
 0x203   : > { %v984_v24 = vsel %vm471_vm7, %v983_v57, %v960_v3  ;;  %v975_v62 = vsel %vm467_vm5, %v974_v29, %v924_v16 }
 0x204   : > { %v6386_v29 = vld [vmem:[#allocation3 + $0x8] sm:$0xff] }
 0x205   : > { %v964_v8 = vpop.permute.xlu1 %963  ;;  %v928_v31 = vpop.permute.xlu0 %927 }
 0x206   : > { %v985_v23 = vsel %vm473_vm8, %v984_v24, %v964_v8  ;;  %v976_v9 = vsel %vm469_vm6, %v975_v62, %v928_v31 }
 0x207   : > { %v986_v7 = vsel %vm475_vm9, %v985_v23, %v968_v52  ;;  %v977_v39 = vsel %vm471_vm7, %v976_v9, %v932_v1 }
 0x208   : > { %v6385_v9 = vld [vmem:[#allocation3] sm:$0xff] }
 0x209   : > { %v972_v26 = vpop.permute.xlu1 %971  ;;  %v936_v59 = vpop.permute.xlu0 %935 }
 0x20a   : > { %v987_v20 = vsel %vm477_vm10, %v986_v7, %v972_v26  ;;  %v978_v51 = vsel %vm473_vm8, %v977_v39, %v936_v59 }
 0x20b   : > { %989 = vst [vmem:[#allocation3 + $0x18] sm:$0xf] %v987_v20  ;;  %v979_v3 = vsel %vm475_vm9, %v978_v51, %v940_v44 }
 0x20d   : > { %v1196_v48 = vpop.permute.xlu1 %1195  ;;  %v944_v16 = vpop.permute.xlu0 %943 }
 0x20e   : > { %v1229_v11 = vsel %vm465_vm4, %v7569_v60, %v1196_v48  ;;  %v980_v43 = vsel %vm477_vm10, %v979_v3, %v944_v16 }
 0x20f   : > { %988 = vst [vmem:[#allocation3 + $0x10] sm:$0xf] %v980_v43  ;;  %v1230_v1 = vsel %vm467_vm5, %v1229_v11, %v7677_v25  ;;  %v1755_v11 = vcombine.high %v7417_v50, %v7658_v63 }
 0x211   : > { %v1204_v34 = vpop.permute.xlu1 %1203  ;;  %v1168_v52 = vpop.permute.xlu0 %1167 }
 0x212   : > { %v1231_v55 = vsel %vm469_vm6, %v1230_v1, %v1204_v34  ;;  %v1222_v42 = vsel %vm465_vm4, %v7583_v45, %v1168_v52 }
 0x213   : > { %v1232_v44 = vsel %vm471_vm7, %v1231_v55, %v7681_v58  ;;  %v1223_v60 = vsel %vm467_vm5, %v1222_v42, %v7675_v49  ;;  %v1769_v42 = vrot.slane %v1755_v11, %v7059_v28 }
 0x215   : > { %v1212_v56 = vpop.permute.xlu1 %1211  ;;  %v1176_v13 = vpop.permute.xlu0 %1175 }
 0x216   : > { %v1233_v21 = vsel %vm473_vm8, %v1232_v44, %v1212_v56  ;;  %v1224_v27 = vsel %vm469_vm6, %v1223_v60, %v1176_v13  ;;  %v9997_v56 = vld [vmem:[#allocation10_spill] sm:$0xff] }
 0x217   : > { %v1234_v25 = vsel %vm475_vm9, %v1233_v21, %v7685_v5  ;;  %v1225_v22 = vsel %vm471_vm7, %v1224_v27, %v7679_v12  ;;  %v1822_v44 = vcombine.low %v9997_v56, %v7650_v37 }
 0x219   : > { %v1220_v4 = vpop.permute.xlu1 %1219  ;;  %v1184_v45 = vpop.permute.xlu0 %1183  ;;  %v1830_v27 = vrot.slane %v1822_v44, %v7059_v28 }
 0x21a   : > { %v1235_v17 = vsel %vm477_vm10, %v1234_v25, %v1220_v4  ;;  %v1226_v58 = vsel %vm473_vm8, %v1225_v22, %v1184_v45 }
 0x21b   : > { %v1239_v6 = vrot.slane %v1235_v17, 4  ;;  %v1227_v41 = vsel %vm475_vm9, %v1226_v58, %v7683_v36  ;;  %v1823_v58 = vcombine.high %v9997_v56, %v7650_v37 }
 0x21d   : > { %1243 = vst [vmem:[#allocation3 + $0x18] sm:$0xf0] %v1239_v6  ;;  %v1450_v49 = vpop.permute.xlu1 %1449  ;;  %v1192_v33 = vpop.permute.xlu0 %1191 }
 0x21e   : > { %v1483_v32 = vsel %vm465_vm4, %v7624_v10, %v1450_v49  ;;  %v1228_v5 = vsel %vm477_vm10, %v1227_v41, %v1192_v33 }
 0x21f   : > { %v1238_v35 = vrot.slane %v1228_v5, 4  ;;  %v1484_v40 = vsel %vm467_vm5, %v1483_v32, %v7691_v46  ;;  %v1837_v32 = vrot.slane %v1823_v58, %v7059_v28 }
 0x221   : > { %1242 = vst [vmem:[#allocation3 + $0x10] sm:$0xf0] %v1238_v35  ;;  %v1458_v12 = vpop.permute.xlu1 %1457  ;;  %v1422_v18 = vpop.permute.xlu0 %1421 }
 0x222   : > { %v1485_v19 = vsel %vm469_vm6, %v1484_v40, %v1458_v12  ;;  %v1476_v57 = vsel %vm465_vm4, %v7639_v61, %v1422_v18 }
 0x223   : > { %v1486_v10 = vsel %vm471_vm7, %v1485_v19, %v7695_v47  ;;  %v1477_v24 = vsel %vm467_vm5, %v1476_v57, %v7687_v2 }
 0x224   : > { %v6388_v36 = vld [vmem:[#allocation3 + $0x18] sm:$0xff] }
 0x225   : > { %v1466_v8 = vpop.permute.xlu1 %1465  ;;  %v1430_v62 = vpop.permute.xlu0 %1429  ;;  %v6605_v31 = vpack.c.bf16 %v6388_v36, %v6386_v29 }
 0x226   : > { %v1487_v23 = vsel %vm473_vm8, %v1486_v10, %v1466_v8  ;;  %v1478_v46 = vsel %vm469_vm6, %v1477_v24, %v1430_v62  ;;  %v7825_v10 = vld [vmem:[#allocation2 + $0x9] sm:$0xff]  ;;  %v7829_v24 = vld [vmem:[#allocation2 + $0x1] sm:$0xff] }
 0x227   : > { %6606 = vmatprep.subr.bf16.mxu0 %v6605_v31  ;;  %v1488_v61 = vsel %vm475_vm9, %v1487_v23, %v7697_v30  ;;  %v1479_v39 = vsel %vm471_vm7, %v1478_v46, %v7689_v14  ;;  %v1754_v30 = vcombine.low %v7417_v50, %v7658_v63  ;;  %v7833_v62 = vld [vmem:[#allocation2 + $0x21] sm:$0xff]  ;;  %v7837_v31 = vld [vmem:[#allocation2 + $0x19] sm:$0xff]  ;;  %v7845_v46 = vld [vmem:[#allocation2 + $0x31] sm:$0xff] }
 0x228   : > { %v6387_v26 = vld [vmem:[#allocation3 + $0x10] sm:$0xff]  ;;  %v7841_v23 = vld [vmem:[#allocation2 + $0x39] sm:$0xff] }
 0x229   : > { %v1474_v7 = vpop.permute.xlu1 %1473  ;;  %v1438_v47 = vpop.permute.xlu0 %1437  ;;  %v6607_v59 = vpack.c.bf16 %v6387_v26, %v6385_v9  ;;  %v1762_v1 = vrot.slane %v1754_v30, %v7059_v28  ;;  %v7849_v9 = vld [vmem:[#allocation2 + $0x51] sm:$0xff]  ;;  %v7853_v26 = vld [vmem:[#allocation2 + $0x49] sm:$0xff] }
 0x22a   : > { %v1489_v2 = vsel %vm477_vm10, %v1488_v61, %v1474_v7  ;;  %v1480_v20 = vsel %vm473_vm8, %v1479_v39, %v1438_v47 }
 0x22b   : > { %1491 = vst [vmem:[#allocation3 + $0x28] sm:$0xf] %v1489_v2  ;;  %6608 = vmatpush1.bf16.msra.mxu0 %v6607_v59  ;;  %v1481_v51 = vsel %vm475_vm9, %v1480_v20, %v7693_v54 }
 0x22d   : > { %v1446_v48 = vpop.permute.xlu0 %1445  ;;  %v1745_v14 = vpop.permute.xlu1 %1744 }
 0x22e   : > { %v1482_v3 = vsel %vm477_vm10, %v1481_v51, %v1446_v48  ;;  %v1838_v54 = vcombine.low %v7453_v38, %v1745_v14  ;;  %v1839_v25 = vcombine.high %v7453_v38, %v1745_v14 }
 0x22f   : > { %1490 = vst [vmem:[#allocation3 + $0x20] sm:$0xf] %v1482_v3 }
 0x230   : > { %v1846_v50 = vrot.slane %v1838_v54, %v7059_v28  ;;  %v1853_v49 = vrot.slane %v1839_v25, %v7059_v28 }
 0x231   : > { %v1743_v16 = vpop.permute.xlu0 %1742 }
 0x232   : > { %v1770_v43 = vcombine.low %v7438_v15, %v1743_v16  ;;  %v1771_v34 = vcombine.high %v7438_v15, %v1743_v16  ;;  %v1854_v22 = vcombine.low %v1830_v27, %v1846_v50  ;;  %v1855_v41 = vcombine.high %v1830_v27, %v1846_v50 }
 0x233   : > { %v1870_v37 = vcombine.low %v1837_v32, %v1853_v49  ;;  %v1871_v18 = vcombine.high %v1837_v32, %v1853_v49 }
 0x234   : > { %v1778_v52 = vrot.slane %v1770_v43, %v7059_v28  ;;  %v1785_v55 = vrot.slane %v1771_v34, %v7059_v28  ;;  %v1862_v33 = vrot.slane %v1854_v22, %v7133_v53  ;;  %v1869_v12 = vrot.slane %v1855_v41, %v7133_v53 }
 0x235   : > { %v1878_v57 = vrot.slane %v1870_v37, %v7133_v53  ;;  %v1885_v36 = vrot.slane %v1871_v18, %v7133_v53 }
 0x236   : > { %v1786_v60 = vcombine.low %v1762_v1, %v1778_v52  ;;  %v1787_v13 = vcombine.high %v1762_v1, %v1778_v52  ;;  %v1802_v63 = vcombine.low %v1769_v42, %v1785_v55  ;;  %v1803_v45 = vcombine.high %v1769_v42, %v1785_v55 }
 0x237   : > { %v1886_v35 = vcombine.high %v1862_v33, %v9973_v0  ;;  %v1887_v19 = vcombine.high %v1869_v12, %v9973_v0  ;;  %v1888_v29 = vcombine.high %v1878_v57, %v9973_v0  ;;  %v1889_v8 = vcombine.high %v1885_v36, %v9973_v0 }
 0x238   : > { %v1801_v15 = vrot.slane %v1787_v13, %v7133_v53  ;;  %v1794_v21 = vrot.slane %v1786_v60, %v7133_v53  ;;  %v1810_v17 = vrot.slane %v1802_v63, %v7133_v53  ;;  %v1817_v38 = vrot.slane %v1803_v45, %v7133_v53 }
 0x23a   : > { %1895 = vrot.lane.b32.xlu1 %v1801_v15, %s6848_s17  ;;  %v1818_v4 = vcombine.high %v1794_v21, %v9973_v0  ;;  %v1819_v6 = vcombine.high %v1801_v15, %v9973_v0  ;;  %v1820_v5 = vcombine.high %v1810_v17, %v9973_v0  ;;  %v1821_v40 = vcombine.high %v1817_v38, %v9973_v0 }
 0x23c   : > { %1891 = vrot.lane.b32.xlu0 %v1818_v4, %s6851_s22 }
 0x23e   : > { %1903 = vrot.lane.b32.xlu1 %v1810_v17, %s6849_s19 }
 0x240   : > { %1899 = vrot.lane.b32.xlu0 %v1819_v6, %s6852_s26 }
 0x242   : > { %1911 = vrot.lane.b32.xlu1 %v1817_v38, %s6850_s20 }
 0x244   : > { %1907 = vrot.lane.b32.xlu0 %v1820_v5, %s6853_s27 }
 0x246   : > { %1919 = vrot.lane.b32.xlu1 %v1886_v35, %s6851_s22 }
 0x248   : > { %1915 = vrot.lane.b32.xlu0 %v1821_v40, %s6854_s28 }
 0x24a   : > { %1927 = vrot.lane.b32.xlu1 %v1887_v19, %s6852_s26 }
 0x24c   : > { %1923 = vrot.lane.b32.xlu0 %v1869_v12, %s6848_s17 }
 0x24e   : > { %1935 = vrot.lane.b32.xlu1 %v1888_v29, %s6853_s27 }
 0x250   : > { %1931 = vrot.lane.b32.xlu0 %v1878_v57, %s6849_s19 }
 0x252   : > { %1943 = vrot.lane.b32.xlu1 %v1889_v8, %s6854_s28 }
 0x254   : > { %1939 = vrot.lane.b32.xlu0 %v1885_v36, %s6850_s20 }
 0x256   : > { %1980 = vrot.lane.b32.xlu1 %v7825_v10, %s6844_s6 }
 0x258   : > { %1978 = vrot.lane.b32.xlu0 %v7829_v24, %s6844_s6 }
 0x25a   : > { %1984 = vrot.lane.b32.xlu1 %v7833_v62, %s6844_s6 }
 0x25c   : > { %1982 = vrot.lane.b32.xlu0 %v7837_v31, %s6844_s6 }
 0x25e   : > { %1988 = vrot.lane.b32.xlu1 %v7841_v23, %s6844_s6 }
 0x260   : > { %1986 = vrot.lane.b32.xlu0 %v7845_v46, %s6844_s6 }
 0x262   : > { %1992 = vrot.lane.b32.xlu1 %v7849_v9, %s6844_s6 }
 0x264   : > { %1990 = vrot.lane.b32.xlu0 %v7853_v26, %s6844_s6 }
 0x2ac   : > { %v1896_v7 = vpop.permute.xlu1 %1895 }
 0x2ae   : > { %v1892_v61 = vpop.permute.xlu0 %1891 }
 0x2af   : > { %v1946_v39 = vsel %vm465_vm4, %v1794_v21, %v1892_v61 }
 0x2b0   : > { %v1904_v47 = vpop.permute.xlu1 %1903  ;;  %v1947_v59 = vsel %vm467_vm5, %v1946_v39, %v1896_v7 }
 0x2b2   : > { %v1900_v2 = vpop.permute.xlu0 %1899 }
 0x2b3   : > { %v1948_v20 = vsel %vm469_vm6, %v1947_v59, %v1900_v2 }
 0x2b4   : > { %v1912_v51 = vpop.permute.xlu1 %1911  ;;  %v1949_v48 = vsel %vm471_vm7, %v1948_v20, %v1904_v47 }
 0x2b6   : > { %v1908_v3 = vpop.permute.xlu0 %1907 }
 0x2b7   : > { %v1950_v30 = vsel %vm473_vm8, %v1949_v48, %v1908_v3 }
 0x2b8   : > { %v1920_v16 = vpop.permute.xlu1 %1919  ;;  %v1951_v14 = vsel %vm475_vm9, %v1950_v30, %v1912_v51 }
 0x2b9   : > { %v1953_v1 = vsel %vm465_vm4, %v1862_v33, %v1920_v16 }
 0x2ba   : > { %v1916_v11 = vpop.permute.xlu0 %1915 }
 0x2bb   : > { %v1952_v43 = vsel %vm477_vm10, %v1951_v14, %v1916_v11 }
 0x2bc   : > { %1960 = vst [vmem:[#allocation3 + $0x30] sm:$0xf] %v1952_v43  ;;  %v1928_v34 = vpop.permute.xlu1 %1927 }
 0x2be   : > { %v1924_v54 = vpop.permute.xlu0 %1923 }
 0x2bf   : > { %v1954_v52 = vsel %vm467_vm5, %v1953_v1, %v1924_v54 }
 0x2c0   : > { %v1936_v55 = vpop.permute.xlu1 %1935  ;;  %v1955_v42 = vsel %vm469_vm6, %v1954_v52, %v1928_v34 }
 0x2c2   : > { %v1932_v56 = vpop.permute.xlu0 %1931 }
 0x2c3   : > { %v1956_v44 = vsel %vm471_vm7, %v1955_v42, %v1932_v56 }
 0x2c4   : > { %v1944_v60 = vpop.permute.xlu1 %1943  ;;  %v1957_v13 = vsel %vm473_vm8, %v1956_v44, %v1936_v55 }
 0x2c6   : > { %v1940_v50 = vpop.permute.xlu0 %1939 }
 0x2c7   : > { %v1958_v63 = vsel %vm475_vm9, %v1957_v13, %v1940_v50 }
 0x2c8   : > { %v1959_v15 = vsel %vm477_vm10, %v1958_v63, %v1944_v60  ;;  %v1981_v21 = vpop.permute.xlu1 %1980 }
 0x2c9   : > { %1961 = vst [vmem:[#allocation3 + $0x38] sm:$0xf] %v1959_v15 }
 0x2ca   : > { %v1979_v27 = vpop.permute.xlu0 %1978 }
 0x2cc   : > { %v1985_v4 = vpop.permute.xlu1 %1984 }
 0x2ce   : > { %v1983_v25 = vpop.permute.xlu0 %1982 }
 0x2d0   : > { %v1989_v22 = vpop.permute.xlu1 %1988 }
 0x2d1   : > { %v2070_v35 = vcombine.low %v1981_v21, %v1989_v22  ;;  %v2071_v2 = vcombine.high %v1981_v21, %v1989_v22 }
 0x2d2   : > { %v1987_v45 = vpop.permute.xlu0 %1986 }
 0x2d3   : > { %v2002_v17 = vcombine.low %v1979_v27, %v1987_v45  ;;  %v2003_v38 = vcombine.high %v1979_v27, %v1987_v45  ;;  %v2078_v8 = vrot.slane %v2070_v35, %v7059_v28  ;;  %v2085_v16 = vrot.slane %v2071_v2, %v7059_v28 }
 0x2d4   : > { %v1993_v6 = vpop.permute.xlu1 %1992 }
 0x2d5   : > { %v2010_v33 = vrot.slane %v2002_v17, %v7059_v28  ;;  %v2086_v32 = vcombine.low %v1985_v4, %v1993_v6  ;;  %v2017_v12 = vrot.slane %v2003_v38, %v7059_v28  ;;  %v2087_v61 = vcombine.high %v1985_v4, %v1993_v6 }
 0x2d6   : > { %v1991_v58 = vpop.permute.xlu0 %1990 }
 0x2d7   : > { %v2018_v49 = vcombine.low %v1983_v25, %v1991_v58  ;;  %v2019_v41 = vcombine.high %v1983_v25, %v1991_v58  ;;  %v2094_v19 = vrot.slane %v2086_v32, %v7059_v28  ;;  %v2101_v51 = vrot.slane %v2087_v61, %v7059_v28 }
 0x2d9   : > { %v2026_v5 = vrot.slane %v2018_v49, %v7059_v28  ;;  %v2033_v37 = vrot.slane %v2019_v41, %v7059_v28  ;;  %v2102_v39 = vcombine.low %v2078_v8, %v2094_v19  ;;  %v2103_v48 = vcombine.high %v2078_v8, %v2094_v19 }
 0x2da   : > { %v2118_v11 = vcombine.low %v2085_v16, %v2101_v51  ;;  %v2119_v54 = vcombine.high %v2085_v16, %v2101_v51 }
 0x2db   : > { %v2034_v40 = vcombine.low %v2010_v33, %v2026_v5  ;;  %v2035_v18 = vcombine.high %v2010_v33, %v2026_v5  ;;  %v2050_v57 = vcombine.low %v2017_v12, %v2033_v37  ;;  %v2051_v47 = vcombine.high %v2017_v12, %v2033_v37 }
 0x2dc   : > { %v2110_v30 = vrot.slane %v2102_v39, %v7133_v53  ;;  %v2117_v34 = vrot.slane %v2103_v48, %v7133_v53  ;;  %v2126_v55 = vrot.slane %v2118_v11, %v7133_v53  ;;  %v2133_v56 = vrot.slane %v2119_v54, %v7133_v53  ;;  %v6390_v48 = vld [vmem:[#allocation3 + $0x28] sm:$0xff] }
 0x2dd   : > { %v2049_v29 = vrot.slane %v2035_v18, %v7133_v53  ;;  %v2042_v36 = vrot.slane %v2034_v40, %v7133_v53  ;;  %v2058_v59 = vrot.slane %v2050_v57, %v7133_v53  ;;  %v2065_v3 = vrot.slane %v2051_v47, %v7133_v53 }
 0x2de   : > { %v2134_v43 = vcombine.high %v2110_v30, %v9973_v0  ;;  %v2135_v52 = vcombine.high %v2117_v34, %v9973_v0  ;;  %v2136_v42 = vcombine.high %v2126_v55, %v9973_v0  ;;  %v2137_v44 = vcombine.high %v2133_v56, %v9973_v0 }
 0x2df   : > { %2143 = vrot.lane.b32.xlu1 %v2049_v29, %s6848_s17  ;;  %v2066_v7 = vcombine.high %v2042_v36, %v9973_v0  ;;  %v2067_v20 = vcombine.high %v2049_v29, %v9973_v0  ;;  %v2068_v14 = vcombine.high %v2058_v59, %v9973_v0  ;;  %v2069_v1 = vcombine.high %v2065_v3, %v9973_v0 }
 0x2e1   : > { %2139 = vrot.lane.b32.xlu0 %v2066_v7, %s6851_s22 }
 0x2e3   : > { %2151 = vrot.lane.b32.xlu1 %v2058_v59, %s6849_s19 }
 0x2e5   : > { %2147 = vrot.lane.b32.xlu0 %v2067_v20, %s6852_s26 }
 0x2e7   : > { %2159 = vrot.lane.b32.xlu1 %v2065_v3, %s6850_s20 }
 0x2e9   : > { %2155 = vrot.lane.b32.xlu0 %v2068_v14, %s6853_s27 }
 0x2eb   : > { %2167 = vrot.lane.b32.xlu1 %v2134_v43, %s6851_s22 }
 0x2ed   : > { %2163 = vrot.lane.b32.xlu0 %v2069_v1, %s6854_s28 }
 0x2ef   : > { %2175 = vrot.lane.b32.xlu1 %v2135_v52, %s6852_s26 }
 0x2f1   : > { %2171 = vrot.lane.b32.xlu0 %v2117_v34, %s6848_s17 }
 0x2f3   : > { %2183 = vrot.lane.b32.xlu1 %v2136_v42, %s6853_s27 }
 0x2f5   : > { %2179 = vrot.lane.b32.xlu0 %v2126_v55, %s6849_s19 }
 0x2f7   : > { %2191 = vrot.lane.b32.xlu1 %v2137_v44, %s6854_s28 }
 0x2f9   : > { %2187 = vrot.lane.b32.xlu0 %v2133_v56, %s6850_s20 }
 0x2fb   : > { %2234 = vrot.lane.b32.xlu1 %v7825_v10, %s6845_s7 }
 0x2fd   : > { %2232 = vrot.lane.b32.xlu0 %v7829_v24, %s6845_s7 }
 0x2ff   : > { %2238 = vrot.lane.b32.xlu1 %v7833_v62, %s6845_s7 }
 0x301   : > { %2236 = vrot.lane.b32.xlu0 %v7837_v31, %s6845_s7 }
 0x303   : > { %2242 = vrot.lane.b32.xlu1 %v7841_v23, %s6845_s7 }
 0x305   : > { %2240 = vrot.lane.b32.xlu0 %v7845_v46, %s6845_s7 }
 0x307   : > { %2246 = vrot.lane.b32.xlu1 %v7849_v9, %s6845_s7 }
 0x309   : > { %2244 = vrot.lane.b32.xlu0 %v7853_v26, %s6845_s7 }
 0x351   : > { %v2144_v60 = vpop.permute.xlu1 %2143 }
 0x353   : > { %v2140_v13 = vpop.permute.xlu0 %2139 }
 0x354   : > { %v2194_v50 = vsel %vm465_vm4, %v2042_v36, %v2140_v13 }
 0x355   : > { %v2152_v63 = vpop.permute.xlu1 %2151  ;;  %v2195_v15 = vsel %vm467_vm5, %v2194_v50, %v2144_v60 }
 0x357   : > { %v2148_v21 = vpop.permute.xlu0 %2147 }
 0x358   : > { %v2196_v27 = vsel %vm469_vm6, %v2195_v15, %v2148_v21 }
 0x359   : > { %v2160_v4 = vpop.permute.xlu1 %2159  ;;  %v2197_v25 = vsel %vm471_vm7, %v2196_v27, %v2152_v63 }
 0x35b   : > { %v2156_v22 = vpop.permute.xlu0 %2155 }
 0x35c   : > { %v2198_v45 = vsel %vm473_vm8, %v2197_v25, %v2156_v22 }
 0x35d   : > { %v2168_v17 = vpop.permute.xlu1 %2167  ;;  %v2199_v58 = vsel %vm475_vm9, %v2198_v45, %v2160_v4 }
 0x35e   : > { %v2201_v33 = vsel %vm465_vm4, %v2110_v30, %v2168_v17  ;;  %v6389_v30 = vld [vmem:[#allocation3 + $0x20] sm:$0xff] }
 0x35f   : > { %v2164_v6 = vpop.permute.xlu0 %2163 }
 0x360   : > { %v2200_v49 = vsel %vm477_vm10, %v2199_v58, %v2164_v6 }
 0x361   : > { %v2210_v41 = vrot.slane %v2200_v49, 4  ;;  %v2176_v38 = vpop.permute.xlu1 %2175 }
 0x363   : > { %2214 = vst [vmem:[#allocation3 + $0x30] sm:$0xf0] %v2210_v41  ;;  %v2172_v32 = vpop.permute.xlu0 %2171 }
 0x364   : > { %v2202_v5 = vsel %vm467_vm5, %v2201_v33, %v2172_v32 }
 0x365   : > { %v2184_v37 = vpop.permute.xlu1 %2183  ;;  %v2203_v35 = vsel %vm469_vm6, %v2202_v5, %v2176_v38 }
 0x367   : > { %v2180_v12 = vpop.permute.xlu0 %2179 }
 0x368   : > { %v2204_v40 = vsel %vm471_vm7, %v2203_v35, %v2180_v12 }
 0x369   : > { %v2192_v18 = vpop.permute.xlu1 %2191  ;;  %v2205_v19 = vsel %vm473_vm8, %v2204_v40, %v2184_v37 }
 0x36a   : > { %v6391_v51 = vld [vmem:[#allocation3 + $0x30] sm:$0xff] }
 0x36b   : > { %v2188_v57 = vpop.permute.xlu0 %2187  ;;  %v6611_v16 = vpack.c.bf16 %v6391_v51, %v6389_v30 }
 0x36c   : > { %v2206_v29 = vsel %vm475_vm9, %v2205_v19, %v2188_v57 }
 0x36d   : > { %v2207_v36 = vsel %vm477_vm10, %v2206_v29, %v2192_v18  ;;  %v2235_v8 = vpop.permute.xlu1 %2234 }
 0x36e   : > { %v2211_v7 = vrot.slane %v2207_v36, 4 }
 0x36f   : > { %v2233_v61 = vpop.permute.xlu0 %2232 }
 0x370   : > { %2215 = vst [vmem:[#allocation3 + $0x38] sm:$0xf0] %v2211_v7 }
 0x371   : > { %v2239_v39 = vpop.permute.xlu1 %2238 }
 0x373   : > { %v2237_v47 = vpop.permute.xlu0 %2236 }
 0x375   : > { %v2243_v59 = vpop.permute.xlu1 %2242 }
 0x376   : > { %v2324_v44 = vcombine.low %v2235_v8, %v2243_v59  ;;  %v2325_v6 = vcombine.high %v2235_v8, %v2243_v59 }
 0x377   : > { %v2241_v2 = vpop.permute.xlu0 %2240  ;;  %v6392_v20 = vld [vmem:[#allocation3 + $0x38] sm:$0xff] }
 0x378   : > { %v6609_v3 = vpack.c.bf16 %v6392_v20, %v6390_v48  ;;  %v2256_v14 = vcombine.low %v2233_v61, %v2241_v2  ;;  %v2257_v54 = vcombine.high %v2233_v61, %v2241_v2  ;;  %v2332_v4 = vrot.slane %v2324_v44, %v7059_v28 }
 0x379   : > { %v2247_v43 = vpop.permute.xlu1 %2246  ;;  %v2339_v5 = vrot.slane %v2325_v6, %v7059_v28 }
 0x37a   : > { %6610 = vmatprep.subr.bf16.mxu0 %v6609_v3  ;;  %v2264_v52 = vrot.slane %v2256_v14, %v7059_v28  ;;  %v2340_v55 = vcombine.low %v2239_v39, %v2247_v43  ;;  %v2271_v60 = vrot.slane %v2257_v54, %v7059_v28  ;;  %v2341_v22 = vcombine.high %v2239_v39, %v2247_v43 }
 0x37b   : > { %v2245_v11 = vpop.permute.xlu0 %2244  ;;  %6612 = vmatpush1.bf16.msra.mxu0 %v6611_v16 }
 0x37c   : > { %v2272_v34 = vcombine.low %v2237_v47, %v2245_v11  ;;  %v2273_v1 = vcombine.high %v2237_v47, %v2245_v11  ;;  %v2348_v63 = vrot.slane %v2340_v55, %v7059_v28  ;;  %v2355_v41 = vrot.slane %v2341_v22, %v7059_v28 }
 0x37e   : > { %v2280_v42 = vrot.slane %v2272_v34, %v7059_v28  ;;  %v2287_v56 = vrot.slane %v2273_v1, %v7059_v28  ;;  %v2356_v45 = vcombine.low %v2332_v4, %v2348_v63  ;;  %v2357_v38 = vcombine.high %v2332_v4, %v2348_v63 }
 0x37f   : > { %v2372_v35 = vcombine.low %v2339_v5, %v2355_v41  ;;  %v2373_v19 = vcombine.high %v2339_v5, %v2355_v41 }
 0x380   : > { %v2288_v13 = vcombine.low %v2264_v52, %v2280_v42  ;;  %v2289_v50 = vcombine.high %v2264_v52, %v2280_v42  ;;  %v2304_v15 = vcombine.low %v2271_v60, %v2287_v56  ;;  %v2305_v17 = vcombine.high %v2271_v60, %v2287_v56 }
 0x381   : > { %v2364_v32 = vrot.slane %v2356_v45, %v7133_v53  ;;  %v2371_v40 = vrot.slane %v2357_v38, %v7133_v53  ;;  %v2380_v29 = vrot.slane %v2372_v35, %v7133_v53  ;;  %v2387_v8 = vrot.slane %v2373_v19, %v7133_v53 }
 0x382   : > { %v2303_v21 = vrot.slane %v2289_v50, %v7133_v53  ;;  %v2296_v27 = vrot.slane %v2288_v13, %v7133_v53  ;;  %v2312_v58 = vrot.slane %v2304_v15, %v7133_v53  ;;  %v2319_v33 = vrot.slane %v2305_v17, %v7133_v53 }
 0x383   : > { %v2388_v12 = vcombine.high %v2364_v32, %v9973_v0  ;;  %v2389_v57 = vcombine.high %v2371_v40, %v9973_v0  ;;  %v2390_v36 = vcombine.high %v2380_v29, %v9973_v0  ;;  %v2391_v7 = vcombine.high %v2387_v8, %v9973_v0 }
 0x384   : > { %2397 = vrot.lane.b32.xlu1 %v2303_v21, %s6848_s17  ;;  %v2320_v25 = vcombine.high %v2296_v27, %v9973_v0  ;;  %v2321_v49 = vcombine.high %v2303_v21, %v9973_v0  ;;  %v2322_v37 = vcombine.high %v2312_v58, %v9973_v0  ;;  %v2323_v18 = vcombine.high %v2319_v33, %v9973_v0 }
 0x386   : > { %2393 = vrot.lane.b32.xlu0 %v2320_v25, %s6851_s22 }
 0x388   : > { %2405 = vrot.lane.b32.xlu1 %v2312_v58, %s6849_s19 }
 0x38a   : > { %2401 = vrot.lane.b32.xlu0 %v2321_v49, %s6852_s26 }
 0x38c   : > { %2413 = vrot.lane.b32.xlu1 %v2319_v33, %s6850_s20 }
 0x38e   : > { %2409 = vrot.lane.b32.xlu0 %v2322_v37, %s6853_s27 }
 0x390   : > { %2421 = vrot.lane.b32.xlu1 %v2388_v12, %s6851_s22 }
 0x392   : > { %2417 = vrot.lane.b32.xlu0 %v2323_v18, %s6854_s28 }
 0x394   : > { %2429 = vrot.lane.b32.xlu1 %v2389_v57, %s6852_s26 }
 0x396   : > { %2425 = vrot.lane.b32.xlu0 %v2371_v40, %s6848_s17 }
 0x398   : > { %2437 = vrot.lane.b32.xlu1 %v2390_v36, %s6853_s27 }
 0x39a   : > { %2433 = vrot.lane.b32.xlu0 %v2380_v29, %s6849_s19 }
 0x39c   : > { %2445 = vrot.lane.b32.xlu1 %v2391_v7, %s6854_s28 }
 0x39e   : > { %2441 = vrot.lane.b32.xlu0 %v2387_v8, %s6850_s20 }
 0x3a0   : > { %2482 = vrot.lane.b32.xlu1 %v7825_v10, %s6846_s8 }
 0x3a2   : > { %2480 = vrot.lane.b32.xlu0 %v7829_v24, %s6846_s8 }
 0x3a4   : > { %2486 = vrot.lane.b32.xlu1 %v7833_v62, %s6846_s8 }
 0x3a6   : > { %2484 = vrot.lane.b32.xlu0 %v7837_v31, %s6846_s8 }
 0x3a8   : > { %2490 = vrot.lane.b32.xlu1 %v7841_v23, %s6846_s8 }
 0x3aa   : > { %2488 = vrot.lane.b32.xlu0 %v7845_v46, %s6846_s8 }
 0x3ac   : > { %2494 = vrot.lane.b32.xlu1 %v7849_v9, %s6846_s8 }
 0x3ae   : > { %2492 = vrot.lane.b32.xlu0 %v7853_v26, %s6846_s8 }
 0x3f6   : > { %v2398_v10 = vpop.permute.xlu1 %2397 }
 0x3f8   : > { %v2394_v24 = vpop.permute.xlu0 %2393 }
 0x3f9   : > { %v2448_v61 = vsel %vm465_vm4, %v2296_v27, %v2394_v24 }
 0x3fa   : > { %v2406_v62 = vpop.permute.xlu1 %2405  ;;  %v2449_v39 = vsel %vm467_vm5, %v2448_v61, %v2398_v10 }
 0x3fc   : > { %v2402_v31 = vpop.permute.xlu0 %2401 }
 0x3fd   : > { %v2450_v47 = vsel %vm469_vm6, %v2449_v39, %v2402_v31  ;;  %v8033_v31 = vld [vmem:[#allocation2 + $0x4a] sm:$0xff] }
 0x3fe   : > { %v2414_v23 = vpop.permute.xlu1 %2413  ;;  %v2451_v59 = vsel %vm471_vm7, %v2450_v47, %v2406_v62 }
 0x400   : > { %v2410_v46 = vpop.permute.xlu0 %2409 }
 0x401   : > { %v2452_v2 = vsel %vm473_vm8, %v2451_v59, %v2410_v46  ;;  %v8039_v46 = vld [vmem:[#allocation2 + $0x1a] sm:$0xff] }
 0x402   : > { %v2422_v9 = vpop.permute.xlu1 %2421  ;;  %v2453_v20 = vsel %vm475_vm9, %v2452_v2, %v2414_v23  ;;  %v8041_v2 = vld [vmem:[#allocation2 + $0x32] sm:$0xff] }
 0x403   : > { %v2455_v3 = vsel %vm465_vm4, %v2364_v32, %v2422_v9 }
 0x404   : > { %v2418_v26 = vpop.permute.xlu0 %2417 }
 0x405   : > { %v2454_v51 = vsel %vm477_vm10, %v2453_v20, %v2418_v26  ;;  %v2742_v20 = vcombine.low %v8039_v46, %v8033_v31  ;;  %v8047_v26 = vld [vmem:[#allocation2 + $0x2] sm:$0xff] }
 0x406   : > { %2462 = vst [vmem:[#allocation3 + $0x40] sm:$0xf] %v2454_v51  ;;  %v2430_v48 = vpop.permute.xlu1 %2429 }
 0x408   : > { %v2426_v30 = vpop.permute.xlu0 %2425 }
 0x409   : > { %v2456_v16 = vsel %vm467_vm5, %v2455_v3, %v2426_v30  ;;  %v2726_v30 = vcombine.low %v8047_v26, %v8041_v2 }
 0x40a   : > { %v2438_v14 = vpop.permute.xlu1 %2437  ;;  %v2457_v11 = vsel %vm469_vm6, %v2456_v16, %v2430_v48  ;;  %v2750_v16 = vrot.slane %v2742_v20, %v7059_v28 }
 0x40c   : > { %v2434_v43 = vpop.permute.xlu0 %2433 }
 0x40d   : > { %v2458_v34 = vsel %vm471_vm7, %v2457_v11, %v2434_v43  ;;  %v2734_v43 = vrot.slane %v2726_v30, %v7059_v28 }
 0x40e   : > { %v2446_v1 = vpop.permute.xlu1 %2445  ;;  %v2459_v54 = vsel %vm473_vm8, %v2458_v34, %v2438_v14  ;;  %v2743_v34 = vcombine.high %v8039_v46, %v8033_v31 }
 0x410   : > { %v2442_v52 = vpop.permute.xlu0 %2441 }
 0x411   : > { %v2460_v55 = vsel %vm475_vm9, %v2459_v54, %v2442_v52  ;;  %v2758_v54 = vcombine.low %v2734_v43, %v2750_v16  ;;  %v2727_v52 = vcombine.high %v8047_v26, %v8041_v2 }
 0x412   : > { %v2461_v42 = vsel %vm477_vm10, %v2460_v55, %v2446_v1  ;;  %v2483_v56 = vpop.permute.xlu1 %2482  ;;  %v8062_v1 = vld [vmem:[#allocation2 + $0x52] sm:$0xff]  ;;  %v8067_v55 = vld [vmem:[#allocation2 + $0x22] sm:$0xff] }
 0x413   : > { %2463 = vst [vmem:[#allocation3 + $0x48] sm:$0xf] %v2461_v42  ;;  %v8069_v42 = vld [vmem:[#allocation2 + $0x3a] sm:$0xff] }
 0x414   : > { %v2481_v44 = vpop.permute.xlu0 %2480 }
 0x416   : > { %v2487_v60 = vpop.permute.xlu1 %2486 }
 0x418   : > { %v2485_v13 = vpop.permute.xlu0 %2484 }
 0x41a   : > { %v2491_v50 = vpop.permute.xlu1 %2490 }
 0x41b   : > { %v2572_v49 = vcombine.low %v2483_v56, %v2491_v50  ;;  %v2573_v36 = vcombine.high %v2483_v56, %v2491_v50  ;;  %v8076_v50 = vld [vmem:[#allocation2 + $0xa] sm:$0xff] }
 0x41c   : > { %v2489_v63 = vpop.permute.xlu0 %2488 }
 0x41d   : > { %v2504_v15 = vcombine.low %v2481_v44, %v2489_v63  ;;  %v2505_v22 = vcombine.high %v2481_v44, %v2489_v63  ;;  %v2580_v12 = vrot.slane %v2572_v49, %v7059_v28  ;;  %v2587_v62 = vrot.slane %v2573_v36, %v7059_v28 }
 0x41e   : > { %v2495_v27 = vpop.permute.xlu1 %2494  ;;  %v2759_v44 = vcombine.high %v2734_v43, %v2750_v16  ;;  %v8080_v63 = vrot.slane %v2758_v54, %v7133_v53  ;;  %v2811_v49 = vcombine.high %v8067_v55, %v8062_v1 }
 0x41f   : > { %v2512_v45 = vrot.slane %v2504_v15, %v7059_v28  ;;  %v2588_v17 = vcombine.low %v2487_v60, %v2495_v27  ;;  %v2519_v41 = vrot.slane %v2505_v22, %v7059_v28  ;;  %v2589_v18 = vcombine.high %v2487_v60, %v2495_v27 }
 0x420   : > { %v2493_v21 = vpop.permute.xlu0 %2492  ;;  %v2757_v60 = vrot.slane %v2743_v34, %v7059_v28  ;;  %v2741_v15 = vrot.slane %v2727_v52, %v7059_v28  ;;  %v2773_v27 = vrot.slane %v2759_v44, %v7133_v53  ;;  %v2790_v22 = vcombine.high %v8080_v63, %v9973_v0 }
 0x421   : > { %v2520_v4 = vcombine.low %v2485_v13, %v2493_v21  ;;  %v2521_v25 = vcombine.high %v2485_v13, %v2493_v21  ;;  %v2596_v32 = vrot.slane %v2588_v17, %v7059_v28  ;;  %v2603_v7 = vrot.slane %v2589_v18, %v7059_v28 }
 0x422   : > { %v2810_v13 = vcombine.low %v8067_v55, %v8062_v1  ;;  %v2794_v21 = vcombine.low %v8076_v50, %v8069_v42 }
 0x423   : > { %v2528_v58 = vrot.slane %v2520_v4, %v7059_v28  ;;  %v2535_v6 = vrot.slane %v2521_v25, %v7059_v28  ;;  %v2604_v19 = vcombine.low %v2580_v12, %v2596_v32  ;;  %v2605_v10 = vcombine.high %v2580_v12, %v2596_v32 }
 0x424   : > { %v2620_v47 = vcombine.low %v2587_v62, %v2603_v7  ;;  %v2621_v51 = vcombine.high %v2587_v62, %v2603_v7  ;;  %v2774_v4 = vcombine.low %v2741_v15, %v2757_v60  ;;  %v2818_v25 = vrot.slane %v2810_v13, %v7059_v28 }
 0x425   : > { %v2536_v38 = vcombine.low %v2512_v45, %v2528_v58  ;;  %v2537_v33 = vcombine.high %v2512_v45, %v2528_v58  ;;  %v2552_v5 = vcombine.low %v2519_v41, %v2535_v6  ;;  %v2553_v57 = vcombine.high %v2519_v41, %v2535_v6 }
 0x426   : > { %v8028_v61 = vrot.slane %v2604_v19, %v7133_v53  ;;  %v2619_v59 = vrot.slane %v2605_v10, %v7133_v53  ;;  %v2628_v3 = vrot.slane %v2620_v47, %v7133_v53  ;;  %v2635_v11 = vrot.slane %v2621_v51, %v7133_v53 }
 0x427   : > { %v2551_v37 = vrot.slane %v2537_v33, %v7133_v53  ;;  %v8014_v35 = vrot.slane %v2536_v38, %v7133_v53  ;;  %v2560_v29 = vrot.slane %v2552_v5, %v7133_v53  ;;  %v2567_v24 = vrot.slane %v2553_v57, %v7133_v53 }
 0x428   : > { %v2636_v23 = vcombine.high %v8028_v61, %v9973_v0  ;;  %v2637_v48 = vcombine.high %v2619_v59, %v9973_v0  ;;  %v2638_v14 = vcombine.high %v2628_v3, %v9973_v0  ;;  %v2639_v56 = vcombine.high %v2635_v11, %v9973_v0 }
 0x429   : > { %2645 = vrot.lane.b32.xlu1 %v2551_v37, %s6848_s17  ;;  %v2568_v40 = vcombine.high %v8014_v35, %v9973_v0  ;;  %v2569_v8 = vcombine.high %v2551_v37, %v9973_v0  ;;  %v2570_v39 = vcombine.high %v2560_v29, %v9973_v0  ;;  %v2571_v9 = vcombine.high %v2567_v24, %v9973_v0 }
 0x42a   : > { %v2802_v45 = vrot.slane %v2794_v21, %v7059_v28  ;;  %v2782_v17 = vrot.slane %v2774_v4, %v7133_v53  ;;  %v2775_v58 = vcombine.high %v2741_v15, %v2757_v60  ;;  %v2791_v41 = vcombine.high %v2773_v27, %v9973_v0 }
 0x42b   : > { %2641 = vrot.lane.b32.xlu0 %v2568_v40, %s6851_s22  ;;  %v2795_v38 = vcombine.high %v8076_v50, %v8069_v42  ;;  %v2825_v37 = vrot.slane %v2811_v49, %v7059_v28 }
 0x42c   : > { %v2826_v6 = vcombine.low %v2802_v45, %v2818_v25  ;;  %v2789_v33 = vrot.slane %v2775_v58, %v7133_v53  ;;  %v2827_v5 = vcombine.high %v2802_v45, %v2818_v25  ;;  %v2792_v12 = vcombine.high %v2782_v17, %v9973_v0 }
 0x42d   : > { %2653 = vrot.lane.b32.xlu1 %v2560_v29, %s6849_s19  ;;  %v2809_v40 = vrot.slane %v2795_v38, %v7059_v28 }
 0x42e   : > { %v8103_v32 = vrot.slane %v2826_v6, %v7133_v53  ;;  %v2841_v19 = vrot.slane %v2827_v5, %v7133_v53  ;;  %v2793_v29 = vcombine.high %v2789_v33, %v9973_v0 }
 0x42f   : > { %2649 = vrot.lane.b32.xlu0 %v2569_v8, %s6852_s26  ;;  %v2842_v57 = vcombine.low %v2809_v40, %v2825_v37  ;;  %v2843_v7 = vcombine.high %v2809_v40, %v2825_v37 }
 0x430   : > { %v2858_v18 = vcombine.high %v8103_v32, %v9973_v0  ;;  %v2859_v36 = vcombine.high %v2841_v19, %v9973_v0 }
 0x431   : > { %2661 = vrot.lane.b32.xlu1 %v2567_v24, %s6850_s20  ;;  %v2850_v8 = vrot.slane %v2842_v57, %v7133_v53  ;;  %v2857_v24 = vrot.slane %v2843_v7, %v7133_v53 }
 0x433   : > { %2657 = vrot.lane.b32.xlu0 %v2570_v39, %s6853_s27  ;;  %v2860_v10 = vcombine.high %v2850_v8, %v9973_v0  ;;  %v2861_v62 = vcombine.high %v2857_v24, %v9973_v0 }
 0x435   : > { %2669 = vrot.lane.b32.xlu1 %v2636_v23, %s6851_s22 }
 0x437   : > { %2665 = vrot.lane.b32.xlu0 %v2571_v9, %s6854_s28 }
 0x439   : > { %2677 = vrot.lane.b32.xlu1 %v2637_v48, %s6852_s26 }
 0x43b   : > { %2673 = vrot.lane.b32.xlu0 %v2619_v59, %s6848_s17 }
 0x43d   : > { %2685 = vrot.lane.b32.xlu1 %v2638_v14, %s6853_s27 }
 0x43f   : > { %2681 = vrot.lane.b32.xlu0 %v2628_v3, %s6849_s19 }
 0x441   : > { %2693 = vrot.lane.b32.xlu1 %v2639_v56, %s6854_s28 }
 0x443   : > { %2689 = vrot.lane.b32.xlu0 %v2635_v11, %s6850_s20 }
 0x445   : > { %2867 = vrot.lane.b32.xlu1 %v2773_v27, %s6848_s17 }
 0x447   : > { %2863 = vrot.lane.b32.xlu0 %v2790_v22, %s6851_s22 }
 0x449   : > { %2875 = vrot.lane.b32.xlu1 %v2782_v17, %s6849_s19 }
 0x44b   : > { %2871 = vrot.lane.b32.xlu0 %v2791_v41, %s6852_s26 }
 0x44d   : > { %2883 = vrot.lane.b32.xlu1 %v2789_v33, %s6850_s20 }
 0x44f   : > { %2879 = vrot.lane.b32.xlu0 %v2792_v12, %s6853_s27 }
 0x451   : > { %2891 = vrot.lane.b32.xlu1 %v2858_v18, %s6851_s22 }
 0x453   : > { %2887 = vrot.lane.b32.xlu0 %v2793_v29, %s6854_s28 }
 0x455   : > { %2899 = vrot.lane.b32.xlu1 %v2859_v36, %s6852_s26 }
 0x457   : > { %2895 = vrot.lane.b32.xlu0 %v2841_v19, %s6848_s17 }
 0x459   : > { %2907 = vrot.lane.b32.xlu1 %v2860_v10, %s6853_s27 }
 0x45b   : > { %2903 = vrot.lane.b32.xlu0 %v2850_v8, %s6849_s19 }
 0x45d   : > { %2915 = vrot.lane.b32.xlu1 %v2861_v62, %s6854_s28 }
 0x45f   : > { %2911 = vrot.lane.b32.xlu0 %v2857_v24, %s6850_s20 }
 0x461   : > { %2952 = vrot.lane.b32.xlu1 %v8076_v50, %s6842_s4 }
 0x463   : > { %2950 = vrot.lane.b32.xlu0 %v8047_v26, %s6842_s4 }
 0x465   : > { %2956 = vrot.lane.b32.xlu1 %v8067_v55, %s6842_s4 }
 0x467   : > { %2954 = vrot.lane.b32.xlu0 %v8039_v46, %s6842_s4 }
 0x469   : > { %2960 = vrot.lane.b32.xlu1 %v8069_v42, %s6842_s4 }
 0x46b   : > { %2958 = vrot.lane.b32.xlu0 %v8041_v2, %s6842_s4 }
 0x46d   : > { %2964 = vrot.lane.b32.xlu1 %v8062_v1, %s6842_s4 }
 0x46f   : > { %2962 = vrot.lane.b32.xlu0 %v8033_v31, %s6842_s4 }
 0x49b   : > { %v2646_v39 = vpop.permute.xlu1 %2645 }
 0x49d   : > { %v2642_v47 = vpop.permute.xlu0 %2641 }
 0x49e   : > { %v2696_v23 = vsel %vm465_vm4, %v8014_v35, %v2642_v47 }
 0x49f   : > { %v2654_v59 = vpop.permute.xlu1 %2653  ;;  %v2697_v9 = vsel %vm467_vm5, %v2696_v23, %v2646_v39 }
 0x4a1   : > { %v2650_v20 = vpop.permute.xlu0 %2649 }
 0x4a2   : > { %v2698_v51 = vsel %vm469_vm6, %v2697_v9, %v2650_v20 }
 0x4a3   : > { %v2662_v48 = vpop.permute.xlu1 %2661  ;;  %v2699_v3 = vsel %vm471_vm7, %v2698_v51, %v2654_v59 }
 0x4a5   : > { %v2658_v30 = vpop.permute.xlu0 %2657 }
 0x4a6   : > { %v2700_v16 = vsel %vm473_vm8, %v2699_v3, %v2658_v30 }
 0x4a7   : > { %v2670_v14 = vpop.permute.xlu1 %2669  ;;  %v2701_v11 = vsel %vm475_vm9, %v2700_v16, %v2662_v48 }
 0x4a8   : > { %v2703_v52 = vsel %vm465_vm4, %v8028_v61, %v2670_v14 }
 0x4a9   : > { %v2666_v43 = vpop.permute.xlu0 %2665 }
 0x4aa   : > { %v2702_v34 = vsel %vm477_vm10, %v2701_v11, %v2666_v43 }
 0x4ab   : > { %v2712_v54 = vrot.slane %v2702_v34, 4  ;;  %v2678_v35 = vpop.permute.xlu1 %2677 }
 0x4ad   : > { %2716 = vst [vmem:[#allocation3 + $0x40] sm:$0xf0] %v2712_v54  ;;  %v2674_v56 = vpop.permute.xlu0 %2673 }
 0x4ae   : > { %v2704_v44 = vsel %vm467_vm5, %v2703_v52, %v2674_v56 }
 0x4af   : > { %v2686_v60 = vpop.permute.xlu1 %2685  ;;  %v2705_v13 = vsel %vm469_vm6, %v2704_v44, %v2678_v35 }
 0x4b1   : > { %v2682_v15 = vpop.permute.xlu0 %2681 }
 0x4b2   : > { %v2706_v21 = vsel %vm471_vm7, %v2705_v13, %v2682_v15 }
 0x4b3   : > { %v2694_v27 = vpop.permute.xlu1 %2693  ;;  %v2707_v4 = vsel %vm473_vm8, %v2706_v21, %v2686_v60 }
 0x4b5   : > { %v2690_v25 = vpop.permute.xlu0 %2689 }
 0x4b6   : > { %v2708_v22 = vsel %vm475_vm9, %v2707_v4, %v2690_v25 }
 0x4b7   : > { %v2709_v45 = vsel %vm477_vm10, %v2708_v22, %v2694_v27  ;;  %v2868_v17 = vpop.permute.xlu1 %2867 }
 0x4b8   : > { %v2713_v61 = vrot.slane %v2709_v45, 4 }
 0x4b9   : > { %v2864_v58 = vpop.permute.xlu0 %2863 }
 0x4ba   : > { %2717 = vst [vmem:[#allocation3 + $0x48] sm:$0xf0] %v2713_v61  ;;  %v2918_v6 = vsel %vm465_vm4, %v8080_v63, %v2864_v58 }
 0x4bb   : > { %v2876_v49 = vpop.permute.xlu1 %2875  ;;  %v2919_v41 = vsel %vm467_vm5, %v2918_v6, %v2868_v17 }
 0x4bd   : > { %v2872_v38 = vpop.permute.xlu0 %2871 }
 0x4be   : > { %v2920_v33 = vsel %vm469_vm6, %v2919_v41, %v2872_v38 }
 0x4bf   : > { %v2884_v5 = vpop.permute.xlu1 %2883  ;;  %v2921_v37 = vsel %vm471_vm7, %v2920_v33, %v2876_v49 }
 0x4c1   : > { %v2880_v12 = vpop.permute.xlu0 %2879 }
 0x4c2   : > { %v2922_v40 = vsel %vm473_vm8, %v2921_v37, %v2880_v12 }
 0x4c3   : > { %v2892_v18 = vpop.permute.xlu1 %2891  ;;  %v2923_v19 = vsel %vm475_vm9, %v2922_v40, %v2884_v5 }
 0x4c4   : > { %v2925_v36 = vsel %vm465_vm4, %v8103_v32, %v2892_v18 }
 0x4c5   : > { %v2888_v57 = vpop.permute.xlu0 %2887 }
 0x4c6   : > { %v2924_v29 = vsel %vm477_vm10, %v2923_v19, %v2888_v57 }
 0x4c7   : > { %2932 = vst [vmem:[#allocation3 + $0x50] sm:$0xf] %v2924_v29  ;;  %v2900_v63 = vpop.permute.xlu1 %2899 }
 0x4c9   : > { %v2896_v8 = vpop.permute.xlu0 %2895 }
 0x4ca   : > { %v2926_v7 = vsel %vm467_vm5, %v2925_v36, %v2896_v8 }
 0x4cb   : > { %v2908_v10 = vpop.permute.xlu1 %2907  ;;  %v2927_v24 = vsel %vm469_vm6, %v2926_v7, %v2900_v63 }
 0x4cd   : > { %v2904_v62 = vpop.permute.xlu0 %2903 }
 0x4ce   : > { %v2928_v39 = vsel %vm471_vm7, %v2927_v24, %v2904_v62 }
 0x4cf   : > { %v2916_v47 = vpop.permute.xlu1 %2915  ;;  %v2929_v23 = vsel %vm473_vm8, %v2928_v39, %v2908_v10 }
 0x4d1   : > { %v2912_v59 = vpop.permute.xlu0 %2911 }
 0x4d2   : > { %v2930_v9 = vsel %vm475_vm9, %v2929_v23, %v2912_v59 }
 0x4d3   : > { %v2931_v20 = vsel %vm477_vm10, %v2930_v9, %v2916_v47  ;;  %v2953_v51 = vpop.permute.xlu1 %2952 }
 0x4d4   : > { %2933 = vst [vmem:[#allocation3 + $0x58] sm:$0xf] %v2931_v20 }
 0x4d5   : > { %v2951_v32 = vpop.permute.xlu0 %2950 }
 0x4d7   : > { %v2957_v48 = vpop.permute.xlu1 %2956 }
 0x4d9   : > { %v2955_v3 = vpop.permute.xlu0 %2954 }
 0x4db   : > { %v2961_v30 = vpop.permute.xlu1 %2960 }
 0x4dc   : > { %v3042_v13 = vcombine.low %v2953_v51, %v2961_v30  ;;  %v3043_v38 = vcombine.high %v2953_v51, %v2961_v30 }
 0x4dd   : > { %v2959_v16 = vpop.permute.xlu0 %2958 }
 0x4de   : > { %v2974_v14 = vcombine.low %v2951_v32, %v2959_v16  ;;  %v2975_v35 = vcombine.high %v2951_v32, %v2959_v16  ;;  %v3050_v17 = vrot.slane %v3042_v13, %v7059_v28  ;;  %v3057_v18 = vrot.slane %v3043_v38, %v7059_v28 }
 0x4df   : > { %v2965_v43 = vpop.permute.xlu1 %2964 }
 0x4e0   : > { %v2982_v52 = vrot.slane %v2974_v14, %v7059_v28  ;;  %v3058_v56 = vcombine.low %v2957_v48, %v2965_v43  ;;  %v2989_v15 = vrot.slane %v2975_v35, %v7059_v28  ;;  %v3059_v58 = vcombine.high %v2957_v48, %v2965_v43 }
 0x4e1   : > { %v2963_v11 = vpop.permute.xlu0 %2962 }
 0x4e2   : > { %v2990_v34 = vcombine.low %v2955_v3, %v2963_v11  ;;  %v2991_v54 = vcombine.high %v2955_v3, %v2963_v11  ;;  %v3066_v4 = vrot.slane %v3058_v56, %v7059_v28  ;;  %v3073_v5 = vrot.slane %v3059_v58, %v7059_v28 }
 0x4e4   : > { %v2998_v44 = vrot.slane %v2990_v34, %v7059_v28  ;;  %v3005_v60 = vrot.slane %v2991_v54, %v7059_v28  ;;  %v3074_v6 = vcombine.low %v3050_v17, %v3066_v4  ;;  %v3075_v37 = vcombine.high %v3050_v17, %v3066_v4 }
 0x4e5   : > { %v3090_v57 = vcombine.low %v3057_v18, %v3073_v5  ;;  %v3091_v8 = vcombine.high %v3057_v18, %v3073_v5 }
 0x4e6   : > { %v3006_v21 = vcombine.low %v2982_v52, %v2998_v44  ;;  %v3007_v27 = vcombine.high %v2982_v52, %v2998_v44  ;;  %v3022_v25 = vcombine.low %v2989_v15, %v3005_v60  ;;  %v3023_v49 = vcombine.high %v2989_v15, %v3005_v60 }
 0x4e7   : > { %v3082_v40 = vrot.slane %v3074_v6, %v7133_v53  ;;  %v3089_v63 = vrot.slane %v3075_v37, %v7133_v53  ;;  %v3098_v10 = vrot.slane %v3090_v57, %v7133_v53  ;;  %v3105_v62 = vrot.slane %v3091_v8, %v7133_v53  ;;  %v6394_v37 = vld [vmem:[#allocation3 + $0x48] sm:$0xff] }
 0x4e8   : > { %v3021_v22 = vrot.slane %v3007_v27, %v7133_v53  ;;  %v3014_v45 = vrot.slane %v3006_v21, %v7133_v53  ;;  %v3030_v41 = vrot.slane %v3022_v25, %v7133_v53  ;;  %v3037_v12 = vrot.slane %v3023_v49, %v7133_v53 }
 0x4e9   : > { %v3106_v29 = vcombine.high %v3082_v40, %v9973_v0  ;;  %v3107_v7 = vcombine.high %v3089_v63, %v9973_v0  ;;  %v3108_v24 = vcombine.high %v3098_v10, %v9973_v0  ;;  %v3109_v39 = vcombine.high %v3105_v62, %v9973_v0 }
 0x4ea   : > { %3115 = vrot.lane.b32.xlu1 %v3021_v22, %s6848_s17  ;;  %v3038_v61 = vcombine.high %v3014_v45, %v9973_v0  ;;  %v3039_v33 = vcombine.high %v3021_v22, %v9973_v0  ;;  %v3040_v19 = vcombine.high %v3030_v41, %v9973_v0  ;;  %v3041_v36 = vcombine.high %v3037_v12, %v9973_v0 }
 0x4ec   : > { %3111 = vrot.lane.b32.xlu0 %v3038_v61, %s6851_s22 }
 0x4ee   : > { %3123 = vrot.lane.b32.xlu1 %v3030_v41, %s6849_s19 }
 0x4f0   : > { %3119 = vrot.lane.b32.xlu0 %v3039_v33, %s6852_s26 }
 0x4f2   : > { %3131 = vrot.lane.b32.xlu1 %v3037_v12, %s6850_s20 }
 0x4f4   : > { %3127 = vrot.lane.b32.xlu0 %v3040_v19, %s6853_s27 }
 0x4f6   : > { %3139 = vrot.lane.b32.xlu1 %v3106_v29, %s6851_s22 }
 0x4f8   : > { %3135 = vrot.lane.b32.xlu0 %v3041_v36, %s6854_s28 }
 0x4fa   : > { %3147 = vrot.lane.b32.xlu1 %v3107_v7, %s6852_s26 }
 0x4fc   : > { %3143 = vrot.lane.b32.xlu0 %v3089_v63, %s6848_s17 }
 0x4fe   : > { %3155 = vrot.lane.b32.xlu1 %v3108_v24, %s6853_s27 }
 0x500   : > { %3151 = vrot.lane.b32.xlu0 %v3098_v10, %s6849_s19 }
 0x502   : > { %3163 = vrot.lane.b32.xlu1 %v3109_v39, %s6854_s28 }
 0x504   : > { %3159 = vrot.lane.b32.xlu0 %v3105_v62, %s6850_s20 }
 0x506   : > { %3206 = vrot.lane.b32.xlu1 %v8076_v50, %s6844_s6 }
 0x508   : > { %3204 = vrot.lane.b32.xlu0 %v8047_v26, %s6844_s6 }
 0x50a   : > { %3210 = vrot.lane.b32.xlu1 %v8067_v55, %s6844_s6 }
 0x50c   : > { %3208 = vrot.lane.b32.xlu0 %v8039_v46, %s6844_s6 }
 0x50e   : > { %3214 = vrot.lane.b32.xlu1 %v8069_v42, %s6844_s6 }
 0x510   : > { %3212 = vrot.lane.b32.xlu0 %v8041_v2, %s6844_s6 }
 0x512   : > { %3218 = vrot.lane.b32.xlu1 %v8062_v1, %s6844_s6 }
 0x514   : > { %3216 = vrot.lane.b32.xlu0 %v8033_v31, %s6844_s6 }
 0x55c   : > { %v3116_v47 = vpop.permute.xlu1 %3115 }
 0x55e   : > { %v3112_v23 = vpop.permute.xlu0 %3111 }
 0x55f   : > { %v3166_v59 = vsel %vm465_vm4, %v3014_v45, %v3112_v23 }
 0x560   : > { %v3124_v9 = vpop.permute.xlu1 %3123  ;;  %v3167_v20 = vsel %vm467_vm5, %v3166_v59, %v3116_v47 }
 0x562   : > { %v3120_v51 = vpop.permute.xlu0 %3119 }
 0x563   : > { %v3168_v32 = vsel %vm469_vm6, %v3167_v20, %v3120_v51 }
 0x564   : > { %v3132_v48 = vpop.permute.xlu1 %3131  ;;  %v3169_v3 = vsel %vm471_vm7, %v3168_v32, %v3124_v9 }
 0x566   : > { %v3128_v30 = vpop.permute.xlu0 %3127 }
 0x567   : > { %v3170_v16 = vsel %vm473_vm8, %v3169_v3, %v3128_v30 }
 0x568   : > { %v3140_v14 = vpop.permute.xlu1 %3139  ;;  %v3171_v11 = vsel %vm475_vm9, %v3170_v16, %v3132_v48 }
 0x569   : > { %v3173_v52 = vsel %vm465_vm4, %v3082_v40, %v3140_v14  ;;  %v6393_v40 = vld [vmem:[#allocation3 + $0x40] sm:$0xff] }
 0x56a   : > { %v3136_v43 = vpop.permute.xlu0 %3135 }
 0x56b   : > { %v3172_v34 = vsel %vm477_vm10, %v3171_v11, %v3136_v43 }
 0x56c   : > { %v3182_v54 = vrot.slane %v3172_v34, 4  ;;  %v3148_v35 = vpop.permute.xlu1 %3147 }
 0x56e   : > { %3186 = vst [vmem:[#allocation3 + $0x50] sm:$0xf0] %v3182_v54  ;;  %v3144_v56 = vpop.permute.xlu0 %3143 }
 0x56f   : > { %v3174_v44 = vsel %vm467_vm5, %v3173_v52, %v3144_v56 }
 0x570   : > { %v3156_v60 = vpop.permute.xlu1 %3155  ;;  %v3175_v13 = vsel %vm469_vm6, %v3174_v44, %v3148_v35 }
 0x572   : > { %v3152_v15 = vpop.permute.xlu0 %3151 }
 0x573   : > { %v3176_v21 = vsel %vm471_vm7, %v3175_v13, %v3152_v15 }
 0x574   : > { %v3164_v27 = vpop.permute.xlu1 %3163  ;;  %v3177_v4 = vsel %vm473_vm8, %v3176_v21, %v3156_v60 }
 0x575   : > { %v6395_v5 = vld [vmem:[#allocation3 + $0x50] sm:$0xff] }
 0x576   : > { %v3160_v25 = vpop.permute.xlu0 %3159  ;;  %v6615_v18 = vpack.c.bf16 %v6395_v5, %v6393_v40 }
 0x577   : > { %v3178_v22 = vsel %vm475_vm9, %v3177_v4, %v3160_v25 }
 0x578   : > { %v3179_v45 = vsel %vm477_vm10, %v3178_v22, %v3164_v27  ;;  %v3207_v17 = vpop.permute.xlu1 %3206 }
 0x579   : > { %v3183_v61 = vrot.slane %v3179_v45, 4 }
 0x57a   : > { %v3205_v58 = vpop.permute.xlu0 %3204 }
 0x57b   : > { %3187 = vst [vmem:[#allocation3 + $0x58] sm:$0xf0] %v3183_v61 }
 0x57c   : > { %v3211_v6 = vpop.permute.xlu1 %3210 }
 0x57e   : > { %v3209_v49 = vpop.permute.xlu0 %3208 }
 0x580   : > { %v3215_v41 = vpop.permute.xlu1 %3214 }
 0x581   : > { %v3296_v39 = vcombine.low %v3207_v17, %v3215_v41  ;;  %v3297_v43 = vcombine.high %v3207_v17, %v3215_v41 }
 0x582   : > { %v3213_v38 = vpop.permute.xlu0 %3212  ;;  %v6396_v33 = vld [vmem:[#allocation3 + $0x58] sm:$0xff] }
 0x583   : > { %v6613_v12 = vpack.c.bf16 %v6396_v33, %v6394_v37  ;;  %v3228_v19 = vcombine.low %v3205_v58, %v3213_v38  ;;  %v3229_v8 = vcombine.high %v3205_v58, %v3213_v38  ;;  %v3304_v48 = vrot.slane %v3296_v39, %v7059_v28 }
 0x584   : > { %v3219_v29 = vpop.permute.xlu1 %3218  ;;  %v3311_v44 = vrot.slane %v3297_v43, %v7059_v28 }
 0x585   : > { %6614 = vmatprep.subr.bf16.mxu0 %v6613_v12  ;;  %v3236_v7 = vrot.slane %v3228_v19, %v7059_v28  ;;  %v3312_v10 = vcombine.low %v3211_v6, %v3219_v29  ;;  %v3243_v47 = vrot.slane %v3229_v8, %v7059_v28  ;;  %v3313_v30 = vcombine.high %v3211_v6, %v3219_v29 }
 0x586   : > { %v3217_v57 = vpop.permute.xlu0 %3216  ;;  %6616 = vmatpush1.bf16.msra.mxu0 %v6615_v18 }
 0x587   : > { %v3244_v63 = vcombine.low %v3209_v49, %v3217_v57  ;;  %v3245_v36 = vcombine.high %v3209_v49, %v3217_v57  ;;  %v3320_v9 = vrot.slane %v3312_v10, %v7059_v28  ;;  %v3327_v54 = vrot.slane %v3313_v30, %v7059_v28 }
 0x589   : > { %v3252_v24 = vrot.slane %v3244_v63, %v7059_v28  ;;  %v3259_v62 = vrot.slane %v3245_v36, %v7059_v28  ;;  %v3328_v16 = vcombine.low %v3304_v48, %v3320_v9  ;;  %v3329_v35 = vcombine.high %v3304_v48, %v3320_v9 }
 0x58a   : > { %v3344_v13 = vcombine.low %v3311_v44, %v3327_v54  ;;  %v3345_v4 = vcombine.high %v3311_v44, %v3327_v54 }
 0x58b   : > { %v3260_v23 = vcombine.low %v3236_v7, %v3252_v24  ;;  %v3261_v59 = vcombine.high %v3236_v7, %v3252_v24  ;;  %v3276_v20 = vcombine.low %v3243_v47, %v3259_v62  ;;  %v3277_v14 = vcombine.high %v3243_v47, %v3259_v62 }
 0x58c   : > { %v3336_v56 = vrot.slane %v3328_v16, %v7133_v53  ;;  %v3343_v21 = vrot.slane %v3329_v35, %v7133_v53  ;;  %v3352_v22 = vrot.slane %v3344_v13, %v7133_v53  ;;  %v3359_v17 = vrot.slane %v3345_v4, %v7133_v53 }
 0x58d   : > { %v3275_v51 = vrot.slane %v3261_v59, %v7133_v53  ;;  %v3268_v32 = vrot.slane %v3260_v23, %v7133_v53  ;;  %v3284_v11 = vrot.slane %v3276_v20, %v7133_v53  ;;  %v3291_v52 = vrot.slane %v3277_v14, %v7133_v53 }
 0x58e   : > { %v3360_v15 = vcombine.high %v3336_v56, %v9973_v0  ;;  %v3361_v25 = vcombine.high %v3343_v21, %v9973_v0  ;;  %v3362_v45 = vcombine.high %v3352_v22, %v9973_v0  ;;  %v3363_v61 = vcombine.high %v3359_v17, %v9973_v0 }
 0x58f   : > { %3369 = vrot.lane.b32.xlu1 %v3275_v51, %s6848_s17  ;;  %v3292_v3 = vcombine.high %v3268_v32, %v9973_v0  ;;  %v3293_v34 = vcombine.high %v3275_v51, %v9973_v0  ;;  %v3294_v60 = vcombine.high %v3284_v11, %v9973_v0  ;;  %v3295_v27 = vcombine.high %v3291_v52, %v9973_v0 }
 0x591   : > { %3365 = vrot.lane.b32.xlu0 %v3292_v3, %s6851_s22 }
 0x593   : > { %3377 = vrot.lane.b32.xlu1 %v3284_v11, %s6849_s19 }
 0x595   : > { %3373 = vrot.lane.b32.xlu0 %v3293_v34, %s6852_s26 }
 0x597   : > { %3385 = vrot.lane.b32.xlu1 %v3291_v52, %s6850_s20 }
 0x599   : > { %3381 = vrot.lane.b32.xlu0 %v3294_v60, %s6853_s27 }
 0x59b   : > { %3393 = vrot.lane.b32.xlu1 %v3360_v15, %s6851_s22 }
 0x59d   : > { %3389 = vrot.lane.b32.xlu0 %v3295_v27, %s6854_s28 }
 0x59f   : > { %3401 = vrot.lane.b32.xlu1 %v3361_v25, %s6852_s26 }
 0x5a1   : > { %3397 = vrot.lane.b32.xlu0 %v3343_v21, %s6848_s17 }
 0x5a3   : > { %3409 = vrot.lane.b32.xlu1 %v3362_v45, %s6853_s27 }
 0x5a5   : > { %3405 = vrot.lane.b32.xlu0 %v3352_v22, %s6849_s19 }
 0x5a7   : > { %3417 = vrot.lane.b32.xlu1 %v3363_v61, %s6854_s28 }
 0x5a9   : > { %3413 = vrot.lane.b32.xlu0 %v3359_v17, %s6850_s20 }
 0x5ab   : > { %3454 = vrot.lane.b32.xlu1 %v8076_v50, %s6845_s7 }
 0x5ad   : > { %3452 = vrot.lane.b32.xlu0 %v8047_v26, %s6845_s7 }
 0x5af   : > { %3458 = vrot.lane.b32.xlu1 %v8067_v55, %s6845_s7 }
 0x5b1   : > { %3456 = vrot.lane.b32.xlu0 %v8039_v46, %s6845_s7 }
 0x5b3   : > { %3462 = vrot.lane.b32.xlu1 %v8069_v42, %s6845_s7 }
 0x5b5   : > { %3460 = vrot.lane.b32.xlu0 %v8041_v2, %s6845_s7 }
 0x5b7   : > { %3466 = vrot.lane.b32.xlu1 %v8062_v1, %s6845_s7 }
 0x5b9   : > { %3464 = vrot.lane.b32.xlu0 %v8033_v31, %s6845_s7 }
 0x601   : > { %v3370_v58 = vpop.permute.xlu1 %3369 }
 0x603   : > { %v3366_v6 = vpop.permute.xlu0 %3365 }
 0x604   : > { %v3420_v49 = vsel %vm465_vm4, %v3268_v32, %v3366_v6 }
 0x605   : > { %v3378_v41 = vpop.permute.xlu1 %3377  ;;  %v3421_v38 = vsel %vm467_vm5, %v3420_v49, %v3370_v58 }
 0x607   : > { %v3374_v33 = vpop.permute.xlu0 %3373 }
 0x608   : > { %v3422_v5 = vsel %vm469_vm6, %v3421_v38, %v3374_v33 }
 0x609   : > { %v3386_v37 = vpop.permute.xlu1 %3385  ;;  %v3423_v12 = vsel %vm471_vm7, %v3422_v5, %v3378_v41 }
 0x60b   : > { %v3382_v40 = vpop.permute.xlu0 %3381 }
 0x60c   : > { %v3424_v18 = vsel %vm473_vm8, %v3423_v12, %v3382_v40 }
 0x60d   : > { %v3394_v19 = vpop.permute.xlu1 %3393  ;;  %v3425_v57 = vsel %vm475_vm9, %v3424_v18, %v3386_v37 }
 0x60e   : > { %v3427_v8 = vsel %vm465_vm4, %v3336_v56, %v3394_v19 }
 0x60f   : > { %v3390_v29 = vpop.permute.xlu0 %3389 }
 0x610   : > { %v3426_v63 = vsel %vm477_vm10, %v3425_v57, %v3390_v29 }
 0x611   : > { %3434 = vst [vmem:[#allocation3 + $0x60] sm:$0xf] %v3426_v63  ;;  %v3402_v36 = vpop.permute.xlu1 %3401 }
 0x613   : > { %v3398_v7 = vpop.permute.xlu0 %3397 }
 0x614   : > { %v3428_v10 = vsel %vm467_vm5, %v3427_v8, %v3398_v7 }
 0x615   : > { %v3410_v24 = vpop.permute.xlu1 %3409  ;;  %v3429_v62 = vsel %vm469_vm6, %v3428_v10, %v3402_v36 }
 0x617   : > { %v3406_v39 = vpop.permute.xlu0 %3405 }
 0x618   : > { %v3430_v47 = vsel %vm471_vm7, %v3429_v62, %v3406_v39 }
 0x619   : > { %v3418_v23 = vpop.permute.xlu1 %3417  ;;  %v3431_v59 = vsel %vm473_vm8, %v3430_v47, %v3410_v24 }
 0x61b   : > { %v3414_v9 = vpop.permute.xlu0 %3413 }
 0x61c   : > { %v3432_v20 = vsel %vm475_vm9, %v3431_v59, %v3414_v9 }
 0x61d   : > { %v3433_v51 = vsel %vm477_vm10, %v3432_v20, %v3418_v23  ;;  %v3455_v32 = vpop.permute.xlu1 %3454 }
 0x61e   : > { %3435 = vst [vmem:[#allocation3 + $0x68] sm:$0xf] %v3433_v51 }
 0x61f   : > { %v3453_v48 = vpop.permute.xlu0 %3452 }
 0x621   : > { %v3459_v3 = vpop.permute.xlu1 %3458 }
 0x623   : > { %v3457_v30 = vpop.permute.xlu0 %3456 }
 0x625   : > { %v3463_v16 = vpop.permute.xlu1 %3462 }
 0x626   : > { %v3544_v15 = vcombine.low %v3455_v32, %v3463_v16  ;;  %v3545_v33 = vcombine.high %v3455_v32, %v3463_v16 }
 0x627   : > { %v3461_v14 = vpop.permute.xlu0 %3460 }
 0x628   : > { %v3476_v11 = vcombine.low %v3453_v48, %v3461_v14  ;;  %v3477_v52 = vcombine.high %v3453_v48, %v3461_v14  ;;  %v3552_v61 = vrot.slane %v3544_v15, %v7059_v28  ;;  %v3559_v19 = vrot.slane %v3545_v33, %v7059_v28 }
 0x629   : > { %v3467_v34 = vpop.permute.xlu1 %3466 }
 0x62a   : > { %v3484_v56 = vrot.slane %v3476_v11, %v7059_v28  ;;  %v3560_v44 = vcombine.low %v3459_v3, %v3467_v34  ;;  %v3491_v21 = vrot.slane %v3477_v52, %v7059_v28  ;;  %v3561_v6 = vcombine.high %v3459_v3, %v3467_v34 }
 0x62b   : > { %v3465_v43 = vpop.permute.xlu0 %3464 }
 0x62c   : > { %v3492_v54 = vcombine.low %v3457_v30, %v3465_v43  ;;  %v3493_v35 = vcombine.high %v3457_v30, %v3465_v43  ;;  %v3568_v25 = vrot.slane %v3560_v44, %v7059_v28  ;;  %v3575_v37 = vrot.slane %v3561_v6, %v7059_v28 }
 0x62e   : > { %v3500_v60 = vrot.slane %v3492_v54, %v7059_v28  ;;  %v3507_v13 = vrot.slane %v3493_v35, %v7059_v28  ;;  %v3576_v49 = vcombine.low %v3552_v61, %v3568_v25  ;;  %v3577_v12 = vcombine.high %v3552_v61, %v3568_v25 }
 0x62f   : > { %v3592_v29 = vcombine.low %v3559_v19, %v3575_v37  ;;  %v3593_v7 = vcombine.high %v3559_v19, %v3575_v37 }
 0x630   : > { %v3508_v27 = vcombine.low %v3484_v56, %v3500_v60  ;;  %v3509_v4 = vcombine.high %v3484_v56, %v3500_v60  ;;  %v3524_v22 = vcombine.low %v3491_v21, %v3507_v13  ;;  %v3525_v41 = vcombine.high %v3491_v21, %v3507_v13 }
 0x631   : > { %v3584_v18 = vrot.slane %v3576_v49, %v7133_v53  ;;  %v3591_v36 = vrot.slane %v3577_v12, %v7133_v53  ;;  %v3600_v24 = vrot.slane %v3592_v29, %v7133_v53  ;;  %v3607_v39 = vrot.slane %v3593_v7, %v7133_v53 }
 0x632   : > { %v3523_v45 = vrot.slane %v3509_v4, %v7133_v53  ;;  %v3516_v17 = vrot.slane %v3508_v27, %v7133_v53  ;;  %v3532_v38 = vrot.slane %v3524_v22, %v7133_v53  ;;  %v3539_v40 = vrot.slane %v3525_v41, %v7133_v53 }
 0x633   : > { %v3608_v63 = vcombine.high %v3584_v18, %v9973_v0  ;;  %v3609_v10 = vcombine.high %v3591_v36, %v9973_v0  ;;  %v3610_v62 = vcombine.high %v3600_v24, %v9973_v0  ;;  %v3611_v47 = vcombine.high %v3607_v39, %v9973_v0 }
 0x634   : > { %3617 = vrot.lane.b32.xlu1 %v3523_v45, %s6848_s17  ;;  %v3540_v58 = vcombine.high %v3516_v17, %v9973_v0  ;;  %v3541_v5 = vcombine.high %v3523_v45, %v9973_v0  ;;  %v3542_v57 = vcombine.high %v3532_v38, %v9973_v0  ;;  %v3543_v8 = vcombine.high %v3539_v40, %v9973_v0 }
 0x636   : > { %3613 = vrot.lane.b32.xlu0 %v3540_v58, %s6851_s22 }
 0x638   : > { %3625 = vrot.lane.b32.xlu1 %v3532_v38, %s6849_s19 }
 0x63a   : > { %3621 = vrot.lane.b32.xlu0 %v3541_v5, %s6852_s26 }
 0x63c   : > { %3633 = vrot.lane.b32.xlu1 %v3539_v40, %s6850_s20 }
 0x63e   : > { %3629 = vrot.lane.b32.xlu0 %v3542_v57, %s6853_s27 }
 0x640   : > { %3641 = vrot.lane.b32.xlu1 %v3608_v63, %s6851_s22 }
 0x642   : > { %3637 = vrot.lane.b32.xlu0 %v3543_v8, %s6854_s28 }
 0x644   : > { %3649 = vrot.lane.b32.xlu1 %v3609_v10, %s6852_s26 }
 0x646   : > { %3645 = vrot.lane.b32.xlu0 %v3591_v36, %s6848_s17 }
 0x648   : > { %3657 = vrot.lane.b32.xlu1 %v3610_v62, %s6853_s27 }
 0x64a   : > { %3653 = vrot.lane.b32.xlu0 %v3600_v24, %s6849_s19 }
 0x64c   : > { %3665 = vrot.lane.b32.xlu1 %v3611_v47, %s6854_s28 }
 0x64e   : > { %3661 = vrot.lane.b32.xlu0 %v3607_v39, %s6850_s20 }
 0x650   : > { %3708 = vrot.lane.b32.xlu1 %v8076_v50, %s6846_s8 }
 0x652   : > { %3706 = vrot.lane.b32.xlu0 %v8047_v26, %s6846_s8 }
 0x654   : > { %3712 = vrot.lane.b32.xlu1 %v8067_v55, %s6846_s8 }
 0x656   : > { %3710 = vrot.lane.b32.xlu0 %v8039_v46, %s6846_s8 }
 0x658   : > { %3716 = vrot.lane.b32.xlu1 %v8069_v42, %s6846_s8 }
 0x65a   : > { %3714 = vrot.lane.b32.xlu0 %v8041_v2, %s6846_s8 }
 0x65c   : > { %3720 = vrot.lane.b32.xlu1 %v8062_v1, %s6846_s8 }
 0x65e   : > { %3718 = vrot.lane.b32.xlu0 %v8033_v31, %s6846_s8 }
 0x6a6   : > { %v3618_v50 = vpop.permute.xlu1 %3617 }
 0x6a8   : > { %v3614_v26 = vpop.permute.xlu0 %3613 }
 0x6a9   : > { %v3668_v23 = vsel %vm465_vm4, %v3516_v17, %v3614_v26 }
 0x6aa   : > { %v3626_v55 = vpop.permute.xlu1 %3625  ;;  %v3669_v59 = vsel %vm467_vm5, %v3668_v23, %v3618_v50 }
 0x6ac   : > { %v3622_v46 = vpop.permute.xlu0 %3621 }
 0x6ad   : > { %v3670_v9 = vsel %vm469_vm6, %v3669_v59, %v3622_v46 }
 0x6ae   : > { %v3634_v42 = vpop.permute.xlu1 %3633  ;;  %v3671_v20 = vsel %vm471_vm7, %v3670_v9, %v3626_v55 }
 0x6b0   : > { %v3630_v2 = vpop.permute.xlu0 %3629 }
 0x6b1   : > { %v3672_v51 = vsel %vm473_vm8, %v3671_v20, %v3630_v2 }
 0x6b2   : > { %v3642_v1 = vpop.permute.xlu1 %3641  ;;  %v3673_v32 = vsel %vm475_vm9, %v3672_v51, %v3634_v42  ;;  %v8405_v42 = vld [vmem:[#allocation2 + $0x4b] sm:$0xff] }
 0x6b3   : > { %v3675_v16 = vsel %vm465_vm4, %v3584_v18, %v3642_v1  ;;  %v8411_v1 = vld [vmem:[#allocation2 + $0x1b] sm:$0xff] }
 0x6b4   : > { %v3638_v31 = vpop.permute.xlu0 %3637 }
 0x6b5   : > { %v3674_v48 = vsel %vm477_vm10, %v3673_v32, %v3638_v31  ;;  %v8413_v32 = vld [vmem:[#allocation2 + $0x33] sm:$0xff] }
 0x6b6   : > { %v3684_v3 = vrot.slane %v3674_v48, 4  ;;  %v3650_v30 = vpop.permute.xlu1 %3649  ;;  %v3962_v48 = vcombine.low %v8411_v1, %v8405_v42 }
 0x6b8   : > { %3688 = vst [vmem:[#allocation3 + $0x60] sm:$0xf0] %v3684_v3  ;;  %v3646_v14 = vpop.permute.xlu0 %3645  ;;  %v8419_v3 = vld [vmem:[#allocation2 + $0x3] sm:$0xff] }
 0x6b9   : > { %v3676_v11 = vsel %vm467_vm5, %v3675_v16, %v3646_v14 }
 0x6ba   : > { %v3658_v43 = vpop.permute.xlu1 %3657  ;;  %v3677_v34 = vsel %vm469_vm6, %v3676_v11, %v3650_v30  ;;  %v3946_v11 = vcombine.low %v8419_v3, %v8413_v32 }
 0x6bc   : > { %v3654_v54 = vpop.permute.xlu0 %3653 }
 0x6bd   : > { %v3678_v35 = vsel %vm471_vm7, %v3677_v34, %v3654_v54 }
 0x6be   : > { %v3666_v52 = vpop.permute.xlu1 %3665  ;;  %v3679_v56 = vsel %vm473_vm8, %v3678_v35, %v3658_v43  ;;  %v3970_v43 = vrot.slane %v3962_v48, %v7059_v28  ;;  %v3954_v35 = vrot.slane %v3946_v11, %v7059_v28  ;;  %v8581_v11 = vld [vmem:[#allocation2 + $0x3c] sm:$0xff] }
 0x6c0   : > { %v3662_v44 = vpop.permute.xlu0 %3661 }
 0x6c1   : > { %v3680_v60 = vsel %vm475_vm9, %v3679_v56, %v3662_v44  ;;  %v8434_v56 = vld [vmem:[#allocation2 + $0x53] sm:$0xff]  ;;  %v3978_v44 = vcombine.low %v3954_v35, %v3970_v43 }
 0x6c2   : > { %v3681_v13 = vsel %vm477_vm10, %v3680_v60, %v3666_v52  ;;  %v3709_v15 = vpop.permute.xlu1 %3708  ;;  %v3963_v52 = vcombine.high %v8411_v1, %v8405_v42  ;;  %v3947_v60 = vcombine.high %v8419_v3, %v8413_v32 }
 0x6c3   : > { %v3685_v21 = vrot.slane %v3681_v13, 4  ;;  %v8439_v13 = vld [vmem:[#allocation2 + $0x23] sm:$0xff] }
 0x6c4   : > { %v3707_v27 = vpop.permute.xlu0 %3706 }
 0x6c5   : > { %3689 = vst [vmem:[#allocation3 + $0x68] sm:$0xf0] %v3685_v21 }
 0x6c6   : > { %v3713_v4 = vpop.permute.xlu1 %3712 }
 0x6c8   : > { %v3711_v25 = vpop.permute.xlu0 %3710 }
 0x6ca   : > { %v3717_v22 = vpop.permute.xlu1 %3716 }
 0x6cb   : > { %v3798_v12 = vcombine.low %v3709_v15, %v3717_v22  ;;  %v3799_v47 = vcombine.high %v3709_v15, %v3717_v22  ;;  %v8441_v15 = vld [vmem:[#allocation2 + $0x3b] sm:$0xff]  ;;  %v8448_v22 = vld [vmem:[#allocation2 + $0xb] sm:$0xff] }
 0x6cc   : > { %v3715_v45 = vpop.permute.xlu0 %3714 }
 0x6cd   : > { %v3730_v17 = vcombine.low %v3707_v27, %v3715_v45  ;;  %v3731_v41 = vcombine.high %v3707_v27, %v3715_v45  ;;  %v3806_v8 = vrot.slane %v3798_v12, %v7059_v28  ;;  %v3813_v46 = vrot.slane %v3799_v47, %v7059_v28 }
 0x6ce   : > { %v3721_v58 = vpop.permute.xlu1 %3720  ;;  %v3979_v27 = vcombine.high %v3954_v35, %v3970_v43  ;;  %v8452_v45 = vrot.slane %v3978_v44, %v7133_v53  ;;  %v4031_v12 = vcombine.high %v8439_v13, %v8434_v56 }
 0x6cf   : > { %v3738_v38 = vrot.slane %v3730_v17, %v7059_v28  ;;  %v3814_v33 = vcombine.low %v3713_v4, %v3721_v58  ;;  %v3745_v40 = vrot.slane %v3731_v41, %v7059_v28  ;;  %v3815_v10 = vcombine.high %v3713_v4, %v3721_v58 }
 0x6d0   : > { %v3719_v61 = vpop.permute.xlu0 %3718  ;;  %v3977_v4 = vrot.slane %v3963_v52, %v7059_v28  ;;  %v3961_v17 = vrot.slane %v3947_v60, %v7059_v28  ;;  %v3993_v58 = vrot.slane %v3979_v27, %v7133_v53  ;;  %v4010_v41 = vcombine.high %v8452_v45, %v9973_v0 }
 0x6d1   : > { %v3746_v6 = vcombine.low %v3711_v25, %v3719_v61  ;;  %v3747_v49 = vcombine.high %v3711_v25, %v3719_v61  ;;  %v3822_v57 = vrot.slane %v3814_v33, %v7059_v28  ;;  %v3829_v26 = vrot.slane %v3815_v10, %v7059_v28 }
 0x6d2   : > { %v4030_v25 = vcombine.low %v8439_v13, %v8434_v56  ;;  %v4014_v61 = vcombine.low %v8448_v22, %v8441_v15 }
 0x6d3   : > { %v3754_v5 = vrot.slane %v3746_v6, %v7059_v28  ;;  %v3761_v37 = vrot.slane %v3747_v49, %v7059_v28  ;;  %v3830_v24 = vcombine.low %v3806_v8, %v3822_v57  ;;  %v3831_v23 = vcombine.high %v3806_v8, %v3822_v57 }
 0x6d4   : > { %v3846_v20 = vcombine.low %v3813_v46, %v3829_v26  ;;  %v3847_v30 = vcombine.high %v3813_v46, %v3829_v26  ;;  %v3994_v6 = vcombine.low %v3961_v17, %v3977_v4  ;;  %v4038_v49 = vrot.slane %v4030_v25, %v7059_v28 }
 0x6d5   : > { %v3762_v18 = vcombine.low %v3738_v38, %v3754_v5  ;;  %v3763_v19 = vcombine.high %v3738_v38, %v3754_v5  ;;  %v3778_v29 = vcombine.low %v3745_v40, %v3761_v37  ;;  %v3779_v62 = vcombine.high %v3745_v40, %v3761_v37 }
 0x6d6   : > { %v8400_v59 = vrot.slane %v3830_v24, %v7133_v53  ;;  %v3845_v51 = vrot.slane %v3831_v23, %v7133_v53  ;;  %v3854_v14 = vrot.slane %v3846_v20, %v7133_v53  ;;  %v3861_v54 = vrot.slane %v3847_v30, %v7133_v53  ;;  %v8571_v30 = vld [vmem:[#allocation2 + $0xc] sm:$0xff] }
 0x6d7   : > { %v3777_v63 = vrot.slane %v3763_v19, %v7133_v53  ;;  %v8386_v36 = vrot.slane %v3762_v18, %v7133_v53  ;;  %v3786_v39 = vrot.slane %v3778_v29, %v7133_v53  ;;  %v3793_v55 = vrot.slane %v3779_v62, %v7133_v53 }
 0x6d8   : > { %v3862_v2 = vcombine.high %v8400_v59, %v9973_v0  ;;  %v3863_v16 = vcombine.high %v3845_v51, %v9973_v0  ;;  %v3864_v34 = vcombine.high %v3854_v14, %v9973_v0  ;;  %v3865_v21 = vcombine.high %v3861_v54, %v9973_v0 }
 0x6d9   : > { %3871 = vrot.lane.b32.xlu1 %v3777_v63, %s6848_s17  ;;  %v3794_v7 = vcombine.high %v8386_v36, %v9973_v0  ;;  %v3795_v50 = vcombine.high %v3777_v63, %v9973_v0  ;;  %v3796_v9 = vcombine.high %v3786_v39, %v9973_v0  ;;  %v3797_v31 = vcombine.high %v3793_v55, %v9973_v0 }
 0x6da   : > { %v4022_v38 = vrot.slane %v4014_v61, %v7059_v28  ;;  %v4002_v33 = vrot.slane %v3994_v6, %v7133_v53  ;;  %v3995_v5 = vcombine.high %v3961_v17, %v3977_v4  ;;  %v4011_v40 = vcombine.high %v3993_v58, %v9973_v0  ;;  %v8604_v4 = vld [vmem:[#allocation2 + $0x4] sm:$0xff]  ;;  %v8614_v6 = vld [vmem:[#allocation2 + $0x34] sm:$0xff] }
 0x6db   : > { %3867 = vrot.lane.b32.xlu0 %v3794_v7, %s6851_s22  ;;  %v4015_v18 = vcombine.high %v8448_v22, %v8441_v15  ;;  %v4045_v63 = vrot.slane %v4031_v12, %v7059_v28 }
 0x6dc   : > { %v4046_v37 = vcombine.low %v4022_v38, %v4038_v49  ;;  %v4009_v19 = vrot.slane %v3995_v5, %v7133_v53  ;;  %v4047_v29 = vcombine.high %v4022_v38, %v4038_v49  ;;  %v4012_v8 = vcombine.high %v4002_v33, %v9973_v0 }
 0x6dd   : > { %3879 = vrot.lane.b32.xlu1 %v3786_v39, %s6849_s19  ;;  %v4029_v7 = vrot.slane %v4015_v18, %v7059_v28 }
 0x6de   : > { %v8475_v57 = vrot.slane %v4046_v37, %v7133_v53  ;;  %v4061_v24 = vrot.slane %v4047_v29, %v7133_v53  ;;  %v4013_v39 = vcombine.high %v4009_v19, %v9973_v0 }
 0x6df   : > { %3875 = vrot.lane.b32.xlu0 %v3795_v50, %s6852_s26  ;;  %v4062_v62 = vcombine.low %v4029_v7, %v4045_v63  ;;  %v4063_v26 = vcombine.high %v4029_v7, %v4045_v63 }
 0x6e0   : > { %v4078_v10 = vcombine.high %v8475_v57, %v9973_v0  ;;  %v4079_v47 = vcombine.high %v4061_v24, %v9973_v0 }
 0x6e1   : > { %3887 = vrot.lane.b32.xlu1 %v3793_v55, %s6850_s20  ;;  %v4070_v50 = vrot.slane %v4062_v62, %v7133_v53  ;;  %v4077_v55 = vrot.slane %v4063_v26, %v7133_v53 }
 0x6e3   : > { %3883 = vrot.lane.b32.xlu0 %v3796_v9, %s6853_s27  ;;  %v4080_v23 = vcombine.high %v4070_v50, %v9973_v0  ;;  %v4081_v46 = vcombine.high %v4077_v55, %v9973_v0 }
 0x6e5   : > { %3895 = vrot.lane.b32.xlu1 %v3862_v2, %s6851_s22 }
 0x6e7   : > { %3891 = vrot.lane.b32.xlu0 %v3797_v31, %s6854_s28  ;;  %v8565_v31 = vld [vmem:[#allocation2 + $0x24] sm:$0xff] }
 0x6e9   : > { %3903 = vrot.lane.b32.xlu1 %v3863_v16, %s6852_s26 }
 0x6eb   : > { %3899 = vrot.lane.b32.xlu0 %v3845_v51, %s6848_s17 }
 0x6ed   : > { %3911 = vrot.lane.b32.xlu1 %v3864_v34, %s6853_s27 }
 0x6ef   : > { %3907 = vrot.lane.b32.xlu0 %v3854_v14, %s6849_s19 }
 0x6f1   : > { %3919 = vrot.lane.b32.xlu1 %v3865_v21, %s6854_s28 }
 0x6f3   : > { %3915 = vrot.lane.b32.xlu0 %v3861_v54, %s6850_s20 }
 0x6f5   : > { %4087 = vrot.lane.b32.xlu1 %v3993_v58, %s6848_s17 }
 0x6f7   : > { %4083 = vrot.lane.b32.xlu0 %v4010_v41, %s6851_s22 }
 0x6f9   : > { %4095 = vrot.lane.b32.xlu1 %v4002_v33, %s6849_s19 }
 0x6fb   : > { %4091 = vrot.lane.b32.xlu0 %v4011_v40, %s6852_s26 }
 0x6fd   : > { %4103 = vrot.lane.b32.xlu1 %v4009_v19, %s6850_s20 }
 0x6ff   : > { %4099 = vrot.lane.b32.xlu0 %v4012_v8, %s6853_s27 }
 0x701   : > { %4111 = vrot.lane.b32.xlu1 %v4078_v10, %s6851_s22 }
 0x703   : > { %4107 = vrot.lane.b32.xlu0 %v4013_v39, %s6854_s28 }
 0x705   : > { %4119 = vrot.lane.b32.xlu1 %v4079_v47, %s6852_s26 }
 0x707   : > { %4115 = vrot.lane.b32.xlu0 %v4061_v24, %s6848_s17 }
 0x709   : > { %4127 = vrot.lane.b32.xlu1 %v4080_v23, %s6853_s27 }
 0x70b   : > { %4123 = vrot.lane.b32.xlu0 %v4070_v50, %s6849_s19 }
 0x70d   : > { %4135 = vrot.lane.b32.xlu1 %v4081_v46, %s6854_s28 }
 0x70f   : > { %4131 = vrot.lane.b32.xlu0 %v4077_v55, %s6850_s20 }
 0x711   : > { %4178 = vrot.lane.b32.xlu1 %v8448_v22, %s6842_s4 }
 0x713   : > { %4176 = vrot.lane.b32.xlu0 %v8419_v3, %s6842_s4 }
 0x715   : > { %4182 = vrot.lane.b32.xlu1 %v8439_v13, %s6842_s4 }
 0x717   : > { %4180 = vrot.lane.b32.xlu0 %v8411_v1, %s6842_s4 }
 0x719   : > { %4186 = vrot.lane.b32.xlu1 %v8441_v15, %s6842_s4 }
 0x71b   : > { %4184 = vrot.lane.b32.xlu0 %v8413_v32, %s6842_s4 }
 0x71d   : > { %4426 = vrot.lane.b32.xlu1 %v8448_v22, %s6844_s6 }
 0x71f   : > { %4188 = vrot.lane.b32.xlu0 %v8405_v42, %s6842_s4 }
 0x721   : > { %4434 = vrot.lane.b32.xlu1 %v8441_v15, %s6844_s6 }
 0x723   : > { %4430 = vrot.lane.b32.xlu0 %v8439_v13, %s6844_s6 }
 0x725   : > { %4928 = vrot.lane.b32.xlu1 %v8448_v22, %s6846_s8 }
 0x727   : > { %4438 = vrot.lane.b32.xlu0 %v8434_v56, %s6844_s6 }
 0x729   : > { %4936 = vrot.lane.b32.xlu1 %v8441_v15, %s6846_s8 }
 0x72b   : > { %4932 = vrot.lane.b32.xlu0 %v8439_v13, %s6846_s8 }
 0x72d   : > { %4424 = vrot.lane.b32.xlu1 %v8419_v3, %s6844_s6 }
 0x72f   : > { %4940 = vrot.lane.b32.xlu0 %v8434_v56, %s6846_s8 }
 0x731   : > { %4432 = vrot.lane.b32.xlu1 %v8413_v32, %s6844_s6 }
 0x733   : > { %4428 = vrot.lane.b32.xlu0 %v8411_v1, %s6844_s6 }
 0x735   : > { %4926 = vrot.lane.b32.xlu1 %v8419_v3, %s6846_s8 }
 0x737   : > { %4436 = vrot.lane.b32.xlu0 %v8405_v42, %s6844_s6 }
 0x739   : > { %4934 = vrot.lane.b32.xlu1 %v8413_v32, %s6846_s8 }
 0x73b   : > { %4930 = vrot.lane.b32.xlu0 %v8411_v1, %s6846_s8 }
 0x73d   : > { %4190 = vrot.lane.b32.xlu1 %v8434_v56, %s6842_s4 }
 0x73f   : > { %4938 = vrot.lane.b32.xlu0 %v8405_v42, %s6846_s8 }
 0x741   : > { %4684 = vrot.lane.b32.xlu1 %v8439_v13, %s6845_s7 }
 0x743   : > { %4680 = vrot.lane.b32.xlu0 %v8448_v22, %s6845_s7  ;;  %v8608_v22 = vld [vmem:[#allocation2 + $0x4c] sm:$0xff] }
 0x745   : > { %4692 = vrot.lane.b32.xlu1 %v8434_v56, %s6845_s7 }
 0x747   : > { %4688 = vrot.lane.b32.xlu0 %v8441_v15, %s6845_s7  ;;  %v8598_v15 = vld [vmem:[#allocation2 + $0x1c] sm:$0xff] }
 0x749   : > { %4682 = vrot.lane.b32.xlu1 %v8411_v1, %s6845_s7 }
 0x74b   : > { %v3872_v9 = vpop.permute.xlu1 %3871  ;;  %4678 = vrot.lane.b32.xlu0 %v8419_v3, %s6845_s7 }
 0x74d   : > { %4690 = vrot.lane.b32.xlu1 %v8405_v42, %s6845_s7  ;;  %v3868_v20 = vpop.permute.xlu0 %3867 }
 0x74e   : > { %v3922_v2 = vsel %vm465_vm4, %v8386_v36, %v3868_v20  ;;  %v8575_v36 = vld [vmem:[#allocation2 + $0x54] sm:$0xff] }
 0x74f   : > { %v3880_v51 = vpop.permute.xlu1 %3879  ;;  %4686 = vrot.lane.b32.xlu0 %v8413_v32, %s6845_s7  ;;  %v3923_v1 = vsel %vm467_vm5, %v3922_v2, %v3872_v9 }
 0x751   : > { %5402 = vrot.lane.b32.xlu1 %v8565_v31, %s6842_s4  ;;  %v3876_v48 = vpop.permute.xlu0 %3875 }
 0x752   : > { %v3924_v3 = vsel %vm469_vm6, %v3923_v1, %v3876_v48 }
 0x753   : > { %v3888_v42 = vpop.permute.xlu1 %3887  ;;  %5398 = vrot.lane.b32.xlu0 %v8571_v30, %s6842_s4  ;;  %v3925_v32 = vsel %vm471_vm7, %v3924_v3, %v3880_v51 }
 0x755   : > { %5410 = vrot.lane.b32.xlu1 %v8575_v36, %s6842_s4  ;;  %v3884_v16 = vpop.permute.xlu0 %3883 }
 0x756   : > { %v3926_v14 = vsel %vm473_vm8, %v3925_v32, %v3884_v16 }
 0x757   : > { %v3896_v43 = vpop.permute.xlu1 %3895  ;;  %5406 = vrot.lane.b32.xlu0 %v8581_v11, %s6842_s4  ;;  %v3927_v34 = vsel %vm475_vm9, %v3926_v14, %v3888_v42 }
 0x758   : > { %v3929_v56 = vsel %vm465_vm4, %v8400_v59, %v3896_v43 }
 0x759   : > { %5904 = vrot.lane.b32.xlu1 %v8565_v31, %s6845_s7  ;;  %v3892_v54 = vpop.permute.xlu0 %3891 }
 0x75a   : > { %v3928_v35 = vsel %vm477_vm10, %v3927_v34, %v3892_v54  ;;  %v6398_v54 = vld [vmem:[#allocation3 + $0x68] sm:$0xff] }
 0x75b   : > { %3936 = vst [vmem:[#allocation3 + $0x70] sm:$0xf] %v3928_v35  ;;  %v3904_v52 = vpop.permute.xlu1 %3903  ;;  %5900 = vrot.lane.b32.xlu0 %v8571_v30, %s6845_s7 }
 0x75d   : > { %5912 = vrot.lane.b32.xlu1 %v8575_v36, %s6845_s7  ;;  %v3900_v44 = vpop.permute.xlu0 %3899 }
 0x75e   : > { %v3930_v60 = vsel %vm467_vm5, %v3929_v56, %v3900_v44  ;;  %v6397_v56 = vld [vmem:[#allocation3 + $0x60] sm:$0xff] }
 0x75f   : > { %v3912_v13 = vpop.permute.xlu1 %3911  ;;  %5908 = vrot.lane.b32.xlu0 %v8581_v11, %s6845_s7  ;;  %v3931_v21 = vsel %vm469_vm6, %v3930_v60, %v3904_v52 }
 0x761   : > { %5400 = vrot.lane.b32.xlu1 %v8598_v15, %s6842_s4  ;;  %v3908_v27 = vpop.permute.xlu0 %3907 }
 0x762   : > { %v3932_v59 = vsel %vm471_vm7, %v3931_v21, %v3908_v27 }
 0x763   : > { %v3920_v25 = vpop.permute.xlu1 %3919  ;;  %5396 = vrot.lane.b32.xlu0 %v8604_v4, %s6842_s4  ;;  %v3933_v17 = vsel %vm473_vm8, %v3932_v59, %v3912_v13 }
 0x765   : > { %5408 = vrot.lane.b32.xlu1 %v8608_v22, %s6842_s4  ;;  %v3916_v61 = vpop.permute.xlu0 %3915 }
 0x766   : > { %v3934_v58 = vsel %vm475_vm9, %v3933_v17, %v3916_v61 }
 0x767   : > { %v3935_v49 = vsel %vm477_vm10, %v3934_v58, %v3920_v25  ;;  %v4088_v41 = vpop.permute.xlu1 %4087  ;;  %5404 = vrot.lane.b32.xlu0 %v8614_v6, %s6842_s4  ;;  %s188_s4 = scalar_lea.vmem [#allocation7], %s6594_s11 }
 0x768   : > { %3937 = vst [vmem:[#allocation3 + $0x78] sm:$0xf] %v3935_v49 }
 0x769   : > { %5902 = vrot.lane.b32.xlu1 %v8598_v15, %s6845_s7  ;;  %v4084_v38 = vpop.permute.xlu0 %4083 }
 0x76a   : > { %v4138_v33 = vsel %vm465_vm4, %v8452_v45, %v4084_v38 }
 0x76b   : > { %v4096_v5 = vpop.permute.xlu1 %4095  ;;  %5898 = vrot.lane.b32.xlu0 %v8604_v4, %s6845_s7  ;;  %v4139_v37 = vsel %vm467_vm5, %v4138_v33, %v4088_v41 }
 0x76d   : > { %5910 = vrot.lane.b32.xlu1 %v8608_v22, %s6845_s7  ;;  %v4092_v12 = vpop.permute.xlu0 %4091 }
 0x76e   : > { %v4140_v40 = vsel %vm469_vm6, %v4139_v37, %v4092_v12 }
 0x76f   : > { %v4104_v18 = vpop.permute.xlu1 %4103  ;;  %5906 = vrot.lane.b32.xlu0 %v8614_v6, %s6845_s7  ;;  %v4141_v45 = vsel %vm471_vm7, %v4140_v40, %v4096_v5 }
 0x771   : > { %5656 = vrot.lane.b32.xlu1 %v8565_v31, %s6844_s6  ;;  %v4100_v19 = vpop.permute.xlu0 %4099 }
 0x772   : > { %v4142_v29 = vsel %vm473_vm8, %v4141_v45, %v4100_v19 }
 0x773   : > { %v4112_v63 = vpop.permute.xlu1 %4111  ;;  %5652 = vrot.lane.b32.xlu0 %v8571_v30, %s6844_s6  ;;  %v4143_v8 = vsel %vm475_vm9, %v4142_v29, %v4104_v18 }
 0x774   : > { %v4145_v39 = vsel %vm465_vm4, %v8475_v57, %v4112_v63 }
 0x775   : > { %5664 = vrot.lane.b32.xlu1 %v8575_v36, %s6844_s6  ;;  %v4108_v7 = vpop.permute.xlu0 %4107 }
 0x776   : > { %v4144_v10 = vsel %vm477_vm10, %v4143_v8, %v4108_v7 }
 0x777   : > { %v4154_v24 = vrot.slane %v4144_v10, 4  ;;  %v4120_v62 = vpop.permute.xlu1 %4119  ;;  %5660 = vrot.lane.b32.xlu0 %v8581_v11, %s6844_s6 }
 0x779   : > { %4158 = vst [vmem:[#allocation3 + $0x70] sm:$0xf0] %v4154_v24  ;;  %5654 = vrot.lane.b32.xlu1 %v8598_v15, %s6844_s6  ;;  %v4116_v47 = vpop.permute.xlu0 %4115 }
 0x77a   : > { %v4146_v50 = vsel %vm467_vm5, %v4145_v39, %v4116_v47 }
 0x77b   : > { %v4128_v26 = vpop.permute.xlu1 %4127  ;;  %5650 = vrot.lane.b32.xlu0 %v8604_v4, %s6844_s6  ;;  %v4147_v23 = vsel %vm469_vm6, %v4146_v50, %v4120_v62 }
 0x77d   : > { %5662 = vrot.lane.b32.xlu1 %v8608_v22, %s6844_s6  ;;  %v4124_v55 = vpop.permute.xlu0 %4123 }
 0x77e   : > { %v4148_v46 = vsel %vm471_vm7, %v4147_v23, %v4124_v55 }
 0x77f   : > { %v4136_v57 = vpop.permute.xlu1 %4135  ;;  %5658 = vrot.lane.b32.xlu0 %v8614_v6, %s6844_s6  ;;  %v4149_v9 = vsel %vm473_vm8, %v4148_v46, %v4128_v26  ;;  %s6516_s6 = sshll.u32 %s188_s4, 4  ;;  %s9924_s6 = int_to_ptr.vmem [resolvable:$true] %s6516_s6 }
 0x780   : > { %v6399_v34 = vld [vmem:[#allocation3 + $0x70] sm:$0xff]  ;;  %s6769_s16 = scalar_lea.vmem %s9924_s6, 256 }
 0x781   : > { %6158 = vrot.lane.b32.xlu1 %v8565_v31, %s6846_s8  ;;  %v4132_v20 = vpop.permute.xlu0 %4131  ;;  %v6619_v44 = vpack.c.bf16 %v6399_v34, %v6397_v56  ;;  %p6770_p6 = scmp.ne.s32.totalorder %s9924_s6, %s6769_s16 }
 0x782   : > { %v4150_v2 = vsel %vm475_vm9, %v4149_v9, %v4132_v20 }
 0x783   : > { %v4151_v51 = vsel %vm477_vm10, %v4150_v2, %v4136_v57  ;;  %v8661_v1 = vpop.permute.xlu1 %4178  ;;  %6154 = vrot.lane.b32.xlu0 %v8571_v30, %s6846_s8  ;;  %p6771_p12 = pnand %p6770_p6, %p10055_p11 }
 0x784   : > { %v4155_v48 = vrot.slane %v4151_v51, 4 }
 0x785   : > { %6166 = vrot.lane.b32.xlu1 %v8575_v36, %s6846_s8  ;;  %v8667_v3 = vpop.permute.xlu0 %4176  ;;  %p6772_p13 = pneg %p6771_p12 }
 0x786   : > { %4159 = vst [vmem:[#allocation3 + $0x78] sm:$0xf0] %v4155_v48 }
 0x787   : > { %v8669_v42 = vpop.permute.xlu1 %4182  ;;  %6162 = vrot.lane.b32.xlu0 %v8581_v11, %s6846_s8 }
 0x789   : > { %6156 = vrot.lane.b32.xlu1 %v8598_v15, %s6846_s8  ;;  %v8675_v32 = vpop.permute.xlu0 %4180 }
 0x78b   : > { %v8677_v16 = vpop.permute.xlu1 %4186  ;;  %6152 = vrot.lane.b32.xlu0 %v8604_v4, %s6846_s8 }
 0x78c   : > { %v4268_v48 = vcombine.low %v8661_v1, %v8677_v16 }
 0x78d   : > { %6164 = vrot.lane.b32.xlu1 %v8608_v22, %s6846_s8  ;;  %v8683_v14 = vpop.permute.xlu0 %4184  ;;  %v6400_v43 = vld [vmem:[#allocation3 + $0x78] sm:$0xff] }
 0x78e   : > { %v6617_v52 = vpack.c.bf16 %v6400_v43, %v6398_v54 }
 0x78f   : > { %v8685_v35 = vpop.permute.xlu1 %4426  ;;  %6160 = vrot.lane.b32.xlu0 %v8614_v6, %s6846_s8 }
 0x790   : > { %6618 = vmatprep.subr.bf16.mxu0 %v6617_v52 }
 0x791   : > { %v8689_v60 = vpop.permute.xlu0 %4188  ;;  %6620 = vmatpush1.bf16.msra.mxu0 %v6619_v44 }
 0x793   : > { %v8691_v13 = vpop.permute.xlu1 %4434 }
 0x794   : > { %v4516_v27 = vcombine.low %v8685_v35, %v8691_v13 }
 0x795   : > { %v8693_v15 = vpop.permute.xlu0 %4430 }
 0x796   : > { %v4524_v61 = vrot.slane %v4516_v27, %v7059_v28 }
 0x797   : > { %v8695_v21 = vpop.permute.xlu1 %4928 }
 0x799   : > { %v8699_v59 = vpop.permute.xlu0 %4438 }
 0x79a   : > { %v4532_v25 = vcombine.low %v8693_v15, %v8699_v59 }
 0x79b   : > { %v8703_v17 = vpop.permute.xlu1 %4936 }
 0x79c   : > { %v4540_v58 = vrot.slane %v4532_v25, %v7059_v28  ;;  %v5018_v33 = vcombine.low %v8695_v21, %v8703_v17 }
 0x79d   : > { %v8707_v49 = vpop.permute.xlu0 %4932 }
 0x79e   : > { %v4548_v41 = vcombine.low %v4524_v61, %v4540_v58  ;;  %v5026_v45 = vrot.slane %v5018_v33, %v7059_v28  ;;  %v4549_v62 = vcombine.high %v4524_v61, %v4540_v58  ;;  %v4276_v61 = vrot.slane %v4268_v48, %v7059_v28 }
 0x79f   : > { %v8709_v38 = vpop.permute.xlu1 %4424 }
 0x7a0   : > { %v8714_v5 = vrot.slane %v4548_v41, %v7133_v53  ;;  %v4563_v9 = vrot.slane %v4549_v62, %v7133_v53 }
 0x7a1   : > { %v8716_v37 = vpop.permute.xlu0 %4940 }
 0x7a2   : > { %9998 = vst [vmem:[#allocation10_spill] sm:$0xff] %v8714_v5  ;;  %v5034_v12 = vcombine.low %v8707_v49, %v8716_v37  ;;  %v4580_v40 = vcombine.high %v8714_v5, %v9973_v0 }
 0x7a3   : > { %v8722_v18 = vpop.permute.xlu1 %4432 }
 0x7a4   : > { %v5042_v19 = vrot.slane %v5034_v12, %v7059_v28  ;;  %4613 = vrot.lane.b32.xlu0 %v4580_v40, %s6851_s22  ;;  %v4448_v7 = vcombine.low %v8709_v38, %v8722_v18 }
 0x7a5   : > { %v8727_v29 = vpop.permute.xlu0 %4428 }
 0x7a6   : > { %v5050_v63 = vcombine.low %v5026_v45, %v5042_v19  ;;  %v4456_v26 = vrot.slane %v4448_v7, %v7059_v28  ;;  %v5051_v46 = vcombine.high %v5026_v45, %v5042_v19 }
 0x7a7   : > { %v8729_v8 = vpop.permute.xlu1 %4926 }
 0x7a8   : > { %v8734_v10 = vrot.slane %v5050_v63, %v7133_v53  ;;  %v5065_v56 = vrot.slane %v5051_v46, %v7133_v53 }
 0x7a9   : > { %v8736_v24 = vpop.permute.xlu0 %4436 }
 0x7aa   : > { %9999 = vst [vmem:[#allocation11_spill] sm:$0xff] %v8734_v10  ;;  %v4464_v39 = vcombine.low %v8727_v29, %v8736_v24  ;;  %v5082_v47 = vcombine.high %v8734_v10, %v9973_v0 }
 0x7ab   : > { %v8742_v50 = vpop.permute.xlu1 %4934 }
 0x7ac   : > { %v4472_v23 = vrot.slane %v4464_v39, %v7059_v28  ;;  %5115 = vrot.lane.b32.xlu1 %v5082_v47, %s6851_s22  ;;  %v4950_v43 = vcombine.low %v8729_v8, %v8742_v50  ;;  %v4216_v39 = vcombine.low %v8675_v32, %v8689_v60 }
 0x7ad   : > { %v8747_v55 = vpop.permute.xlu0 %4930 }
 0x7ae   : > { %v4480_v57 = vcombine.low %v4456_v26, %v4472_v23  ;;  %v4481_v54 = vcombine.high %v4456_v26, %v4472_v23  ;;  %v4958_v58 = vrot.slane %v4950_v43, %v7059_v28 }
 0x7af   : > { %v8750_v20 = vpop.permute.xlu1 %4190 }
 0x7b0   : > { %v4284_v2 = vcombine.low %v8669_v42, %v8750_v20  ;;  %4617 = vrot.lane.b32.xlu1 %v4563_v9, %s6848_s17  ;;  %v8756_v51 = vrot.slane %v4480_v57, %v7133_v53  ;;  %v4495_v12 = vrot.slane %v4481_v54, %v7133_v53  ;;  %v4200_v57 = vcombine.low %v8667_v3, %v8683_v14 }
 0x7b1   : > { %v8762_v34 = vpop.permute.xlu0 %4938  ;;  %v8812_v54 = vrot.slane %v4216_v39, %v7059_v28 }
 0x7b2   : > { %10000 = vst [vmem:[#allocation12_spill] sm:$0xff] %v8756_v51  ;;  %v4966_v52 = vcombine.low %v8747_v55, %v8762_v34  ;;  %v8768_v44 = vrot.slane %v4284_v2, %v7059_v28  ;;  %v4512_v25 = vcombine.high %v8756_v51, %v9973_v0 }
 0x7b3   : > { %v8770_v27 = vpop.permute.xlu1 %4684 }
 0x7b4   : > { %5119 = vrot.lane.b32.xlu1 %v5065_v56, %s6848_s17  ;;  %v4974_v41 = vrot.slane %v4966_v52, %v7059_v28  ;;  %4585 = vrot.lane.b32.xlu0 %v4512_v25, %s6851_s22  ;;  %v4300_v40 = vcombine.low %v4276_v61, %v8768_v44 }
 0x7b5   : > { %v8779_v33 = vpop.permute.xlu0 %4680 }
 0x7b6   : > { %v4982_v45 = vcombine.low %v4958_v58, %v4974_v41  ;;  %v8802_v46 = vrot.slane %v4300_v40, %v7133_v53 }
 0x7b7   : > { %v8783_v19 = vpop.permute.xlu1 %4692 }
 0x7b8   : > { %v4786_v63 = vcombine.low %v8770_v27, %v8783_v19  ;;  %4589 = vrot.lane.b32.xlu1 %v4495_v12, %s6848_s17  ;;  %v8791_v62 = vrot.slane %v4982_v45, %v7133_v53  ;;  %10002 = vst [vmem:[#allocation14_spill] sm:$0xff] %v8802_v46  ;;  %v4332_v40 = vcombine.high %v8802_v46, %v9973_v0 }
 0x7b9   : > { %v8788_v7 = vpop.permute.xlu0 %4688  ;;  %v8819_v45 = vrot.slane %v4200_v57, %v7059_v28  ;;  %v10004_v57 = vmov 0.0  }
 0x7ba   : > { %10001 = vst [vmem:[#allocation13_spill] sm:$0xff] %v8791_v62  ;;  %v4770_v47 = vcombine.low %v8779_v33, %v8788_v7  ;;  %v5014_v23 = vcombine.high %v8791_v62, %v9973_v0  ;;  %v4794_v2 = vrot.slane %v4786_v63, %v7059_v28  ;;  %v4983_v62 = vcombine.high %v4958_v58, %v4974_v41 }
 0x7bb   : > { %v8797_v26 = vpop.permute.xlu1 %4682  ;;  %v4232_v39 = vcombine.low %v8819_v45, %v8812_v54  ;;  %v4581_v51 = vcombine.high %v4563_v9, %v10004_v57  ;;  %v4301_v58 = vcombine.high %v4276_v61, %v8768_v44  ;;  %v5035_v44 = vcombine.high %v8707_v49, %v8716_v37 }
 0x7bc   : > { %v4778_v48 = vrot.slane %v4770_v47, %v7059_v28  ;;  %5087 = vrot.lane.b32.xlu0 %v5014_v23, %s6851_s22  ;;  %v4533_v23 = vcombine.high %v8693_v15, %v8699_v59 }
 0x7bd   : > { %v8809_v43 = vpop.permute.xlu0 %4678  ;;  %v8850_v9 = vrot.slane %v4232_v39, %v7133_v53  ;;  %v5019_v39 = vcombine.high %v8695_v21, %v8703_v17  ;;  %v8885_v49 = vrot.slane %v5035_v44, %v7059_v28 }
 0x7be   : > { %v4802_v52 = vcombine.low %v4778_v48, %v4794_v2  ;;  %v8845_v15 = vrot.slane %v4533_v23, %v7059_v28  ;;  %v4803_v37 = vcombine.high %v4778_v48, %v4794_v2  ;;  %v4465_v2 = vcombine.high %v8727_v29, %v8736_v24 }
 0x7bf   : > { %v8814_v25 = vpop.permute.xlu1 %4690  ;;  %10005 = vst [vmem:[#allocation16_spill] sm:$0xff] %v8850_v9  ;;  %v4264_v61 = vcombine.high %v8850_v9, %v10004_v57  ;;  %v8894_v5 = vrot.slane %v5019_v39, %v7059_v28 }
 0x7c0   : > { %v8822_v63 = vrot.slane %v4802_v52, %v7133_v53  ;;  %4365 = vrot.lane.b32.xlu0 %v4332_v40, %s6851_s22  ;;  %v4517_v40 = vcombine.high %v8685_v35, %v8691_v13  ;;  %v4718_v10 = vcombine.low %v8797_v26, %v8814_v25  ;;  %v4997_v35 = vrot.slane %v4983_v62, %v7133_v53 }
 0x7c1   : > { %v8825_v47 = vpop.permute.xlu0 %4686  ;;  %v5083_v13 = vcombine.high %v5065_v56, %v10004_v57  ;;  %v5066_v17 = vcombine.low %v8894_v5, %v8885_v49 }
 0x7c2   : > { %10003 = vst [vmem:[#allocation15_spill] sm:$0xff] %v8822_v63  ;;  %v4702_v0 = vcombine.low %v8809_v43, %v8825_v47  ;;  %v4834_v52 = vcombine.high %v8822_v63, %v10004_v57  ;;  %v8862_v23 = vrot.slane %v4718_v10, %v7059_v28  ;;  %v4315_v10 = vrot.slane %v4301_v58, %v7133_v53 }
 0x7c3   : > { %v8833_v46 = vpop.permute.xlu1 %5402  ;;  %v4513_v63 = vcombine.high %v4495_v12, %v10004_v57  ;;  %v4817_v12 = vrot.slane %v4803_v37, %v7133_v53  ;;  %v5074_v29 = vrot.slane %v5066_v17, %v7133_v53  ;;  %v5015_v24 = vcombine.high %v4997_v35, %v10004_v57 }
 0x7c4   : > { %4621 = vrot.lane.b32.xlu0 %v4581_v51, %s6852_s26  ;;  %4867 = vrot.lane.b32.xlu1 %v4834_v52, %s6851_s22  ;;  %v8854_v41 = vrot.slane %v4702_v0, %v7059_v28  ;;  %v8859_v51 = vrot.slane %v4517_v40, %v7059_v28  ;;  %v4333_v17 = vcombine.high %v4315_v10, %v10004_v57 }
 0x7c5   : > { %v8847_v59 = vpop.permute.xlu0 %5398 }
 0x7c6   : > { %v4564_v0 = vcombine.low %v8859_v51, %v8845_v15  ;;  %v4734_v56 = vcombine.low %v8854_v41, %v8862_v23 }
 0x7c7   : > { %v8864_v52 = vpop.permute.xlu1 %5410 }
 0x7c8   : > { %5091 = vrot.lane.b32.xlu0 %v4997_v35, %s6848_s17  ;;  %5123 = vrot.lane.b32.xlu1 %v5083_v13, %s6852_s26  ;;  %v4572_v40 = vrot.slane %v4564_v0, %v7133_v53  ;;  %v8891_v58 = vrot.slane %v4734_v56, %v7133_v53  ;;  %v4449_v0 = vcombine.high %v8709_v38, %v8722_v18 }
 0x7c9   : > { %v8877_v62 = vpop.permute.xlu0 %5406  ;;  %v8916_v56 = vrot.slane %v4465_v2, %v7059_v28  ;;  %v4967_v18 = vcombine.high %v8747_v55, %v8762_v34  ;;  %v4951_v2 = vcombine.high %v8729_v8, %v8742_v50  ;;  %v5504_v55 = vcombine.low %v8833_v46, %v8864_v52 }
 0x7ca   : > { %10006 = vst [vmem:[#allocation17_spill] sm:$0xff] %v8891_v58  ;;  %v4766_v48 = vcombine.high %v8891_v58, %v10004_v57  ;;  %v8923_v38 = vrot.slane %v4449_v0, %v7059_v28  ;;  %v5488_v35 = vcombine.low %v8847_v59, %v8877_v62  ;;  %v4735_v8 = vcombine.high %v8854_v41, %v8862_v23 }
 0x7cb   : > { %v8887_v13 = vpop.permute.xlu1 %5904  ;;  %v4285_v41 = vcombine.high %v8669_v42, %v8750_v20  ;;  %v5084_v42 = vcombine.high %v5074_v29, %v10004_v57 }
 0x7cc   : > { %4337 = vrot.lane.b32.xlu0 %v4264_v61, %s6851_s22  ;;  %4369 = vrot.lane.b32.xlu1 %v4315_v10, %s6848_s17  ;;  %v4582_v10 = vcombine.high %v4572_v40, %v10004_v57  ;;  %v8956_v50 = vrot.slane %v5488_v35, %v7059_v28 }
 0x7cd   : > { %v8898_v21 = vpop.permute.xlu0 %5900  ;;  %v8993_v20 = vrot.slane %v4285_v41, %v7059_v28  ;;  %v4771_v41 = vcombine.high %v8779_v33, %v8788_v7 }
 0x7cf   : > { %v8909_v44 = vpop.permute.xlu1 %5912  ;;  %v9028_v33 = vrot.slane %v4771_v41, %v7059_v28 }
 0x7d0   : > { %4593 = vrot.lane.b32.xlu0 %v4513_v63, %s6852_s26  ;;  %4625 = vrot.lane.b32.xlu1 %v4572_v40, %s6849_s19  ;;  %v4233_v63 = vcombine.high %v8819_v45, %v8812_v54  ;;  %v4496_v45 = vcombine.low %v8923_v38, %v8916_v56  ;;  %v6006_v34 = vcombine.low %v8887_v13, %v8909_v44 }
 0x7d1   : > { %v8920_v61 = vpop.permute.xlu0 %5908 }
 0x7d2   : > { %v4247_v54 = vrot.slane %v4233_v63, %v7133_v53  ;;  %v5990_v39 = vcombine.low %v8898_v21, %v8920_v61  ;;  %v8969_v58 = vrot.slane %v6006_v34, %v7059_v28  ;;  %v4269_v34 = vcombine.high %v8661_v1, %v8677_v16 }
 0x7d3   : > { %v8936_v37 = vpop.permute.xlu1 %5400 }
 0x7d4   : > { %4871 = vrot.lane.b32.xlu1 %v4817_v12, %s6848_s17  ;;  %4839 = vrot.lane.b32.xlu0 %v4766_v48, %s6851_s22  ;;  %v8948_v48 = vrot.slane %v4967_v18, %v7059_v28  ;;  %v8959_v63 = vrot.slane %v5990_v39, %v7059_v28  ;;  %v8966_v18 = vrot.slane %v5504_v55, %v7059_v28 }
 0x7d5   : > { %v8950_v0 = vpop.permute.xlu0 %5396  ;;  %v4835_v39 = vcombine.high %v4817_v12, %v10004_v57  ;;  %v9005_v1 = vrot.slane %v4269_v34, %v7059_v28  ;;  %v4565_v34 = vcombine.high %v8859_v51, %v8845_v15 }
 0x7d6   : > { %v6022_v35 = vcombine.low %v8959_v63, %v8969_v58 }
 0x7d7   : > { %v8971_v40 = vpop.permute.xlu1 %5408  ;;  %v4579_v15 = vrot.slane %v4565_v34, %v7133_v53  ;;  %v5067_v34 = vcombine.high %v8894_v5, %v8885_v49  ;;  %v4217_v5 = vcombine.high %v8675_v32, %v8689_v60  ;;  %v6023_v60 = vcombine.high %v8959_v63, %v8969_v58 }
 0x7d8   : > { %5127 = vrot.lane.b32.xlu1 %v5074_v29, %s6849_s19  ;;  %5095 = vrot.lane.b32.xlu0 %v5015_v24, %s6852_s26  ;;  %v4504_v24 = vrot.slane %v4496_v45, %v7133_v53  ;;  %v5520_v45 = vcombine.low %v8956_v50, %v8966_v18  ;;  %v9002_v9 = vrot.slane %v6022_v35, %v7133_v53 }
 0x7d9   : > { %v8985_v55 = vpop.permute.xlu0 %5404  ;;  %v4316_v29 = vcombine.low %v9005_v1, %v8993_v20  ;;  %v4787_v35 = vcombine.high %v8770_v27, %v8783_v19  ;;  %v5081_v49 = vrot.slane %v5067_v34, %v7133_v53  ;;  %v9095_v32 = vrot.slane %v4217_v5, %v7059_v28 }
 0x7da   : > { %10009 = vst [vmem:[#allocation20_spill] sm:$0xff] %v9002_v9  ;;  %v5420_v7 = vcombine.low %v8950_v0, %v8985_v55  ;;  %v4703_v63 = vcombine.high %v8809_v43, %v8825_v47  ;;  %v4497_v43 = vcombine.high %v8923_v38, %v8916_v56 }
 0x7db   : > { %v9037_v19 = vrot.slane %v4787_v35, %v7059_v28 }
 0x7dc   : > { %4373 = vrot.lane.b32.xlu1 %v4333_v17, %s6852_s26  ;;  %4341 = vrot.lane.b32.xlu0 %v4247_v54, %s6848_s17  ;;  %v8963_v17 = vrot.slane %v4951_v2, %v7059_v28  ;;  %v4749_v2 = vrot.slane %v4735_v8, %v7133_v53  ;;  %v8999_v8 = vrot.slane %v5520_v45, %v7133_v53 }
 0x7dd   : > { %v9009_v16 = vpop.permute.xlu0 %5898  ;;  %v6054_v45 = vcombine.high %v9002_v9, %v10004_v57  ;;  %v4818_v51 = vcombine.low %v9028_v33, %v9037_v19  ;;  %v9134_v47 = vrot.slane %v4703_v63, %v7059_v28 }
 0x7de   : > { %v4998_v23 = vcombine.low %v8963_v17, %v8948_v48  ;;  %10008 = vst [vmem:[#allocation19_spill] sm:$0xff] %v8999_v8  ;;  %10010 = vst [vmem:[#allocation21_spill] sm:$0xff] %v9009_v16 }
 0x7e0   : > { %4629 = vrot.lane.b32.xlu1 %v4582_v10, %s6853_s27  ;;  %4597 = vrot.lane.b32.xlu0 %v4504_v24, %s6849_s19  ;;  %v8995_v10 = vpop.permute.xlu1 %5902  ;;  %v5006_v12 = vrot.slane %v4998_v23, %v7133_v53  ;;  %v5552_v23 = vcombine.high %v8999_v8, %v10004_v57  ;;  %v4324_v8 = vrot.slane %v4316_v29, %v7133_v53 }
 0x7e1   : > { %10007 = vst [vmem:[#allocation18_spill] sm:$0xff] %v8995_v10  ;;  %v9034_v27 = vpop.permute.xlu0 %5906 }
 0x7e2   : > { %v5922_v29 = vcombine.low %v9009_v16, %v9034_v27 }
 0x7e4   : > { %4875 = vrot.lane.b32.xlu1 %v4835_v39, %s6852_s26  ;;  %4843 = vrot.lane.b32.xlu0 %v4749_v2, %s6848_s17  ;;  %v9021_v39 = vpop.permute.xlu1 %5910  ;;  %v9066_v9 = vrot.slane %v5922_v29, %v7059_v28  ;;  %v5016_v29 = vcombine.high %v5006_v12, %v10004_v57 }
 0x7e8   : > { %5131 = vrot.lane.b32.xlu1 %v5084_v42, %s6853_s27  ;;  %5099 = vrot.lane.b32.xlu0 %v5006_v12, %s6849_s19  ;;  %v4265_v42 = vcombine.high %v4247_v54, %v10004_v57  ;;  %v9047_v54 = vrot.slane %v5420_v7, %v7059_v28  ;;  %v9051_v41 = vpop.permute.xlu1 %5656 }
 0x7ec   : > { %5585 = vrot.lane.b32.xlu0 %v5552_v23, %s6851_s22  ;;  %6087 = vrot.lane.b32.xlu1 %v6054_v45, %s6851_s22  ;;  %v5436_v23 = vcombine.low %v8936_v37, %v8971_v40  ;;  %v4514_v45 = vcombine.high %v4504_v24, %v10004_v57  ;;  %v4767_v24 = vcombine.high %v4749_v2, %v10004_v57 }
 0x7ed   : > { %v5521_v2 = vcombine.high %v8956_v50, %v8966_v18 }
 0x7ee   : > { %v9055_v35 = vrot.slane %v5436_v23, %v7059_v28  ;;  %v4826_v23 = vrot.slane %v4818_v51, %v7133_v53 }
 0x7ef   : > { %v5535_v12 = vrot.slane %v5521_v2, %v7133_v53  ;;  %v4719_v2 = vcombine.high %v8797_v26, %v8814_v25  ;;  %v5240_v25 = vcombine.low %v8571_v30, %v8581_v11  ;;  %v4583_v30 = vcombine.high %v4579_v15, %v10004_v57 }
 0x7f0   : > { %4345 = vrot.lane.b32.xlu0 %v4265_v42, %s6852_s26  ;;  %4377 = vrot.lane.b32.xlu1 %v4324_v8, %s6849_s19  ;;  %v5938_v42 = vcombine.low %v8995_v10, %v9021_v39  ;;  %v5452_v7 = vcombine.low %v9047_v54, %v9055_v35  ;;  %v9073_v10 = vpop.permute.xlu0 %5652  ;;  %v4511_v11 = vrot.slane %v4497_v43, %v7133_v53 }
 0x7f2   : > { %v9071_v16 = vrot.slane %v5938_v42, %v7059_v28  ;;  %v9088_v42 = vrot.slane %v5452_v7, %v7133_v53  ;;  %v6037_v7 = vrot.slane %v6023_v60, %v7133_v53  ;;  %v4334_v60 = vcombine.high %v4324_v8, %v10004_v57 }
 0x7f4   : > { %4601 = vrot.lane.b32.xlu0 %v4514_v45, %s6853_s27  ;;  %4633 = vrot.lane.b32.xlu1 %v4579_v15, %s6850_s20  ;;  %v9075_v45 = vpop.permute.xlu1 %5664  ;;  %v5954_v51 = vcombine.low %v9066_v9, %v9071_v16  ;;  %v9099_v50 = vpop.permute.xlu0 %5660  ;;  %v5484_v34 = vcombine.high %v9088_v42, %v10004_v57 }
 0x7f5   : > { %v5742_v56 = vcombine.low %v9073_v10, %v9099_v50  ;;  %v5758_v63 = vcombine.low %v9051_v41, %v9075_v45 }
 0x7f7   : > { %v9170_v15 = vrot.slane %v5742_v56, %v7059_v28 }
 0x7f8   : > { %4847 = vrot.lane.b32.xlu0 %v4767_v24, %s6852_s26  ;;  %4879 = vrot.lane.b32.xlu1 %v4826_v23, %s6849_s19  ;;  %v4201_v24 = vcombine.high %v8667_v3, %v8683_v14  ;;  %v9101_v18 = vpop.permute.xlu1 %5654  ;;  %v9107_v3 = vrot.slane %v5954_v51, %v7133_v53  ;;  %v9123_v51 = vpop.permute.xlu0 %5650 }
 0x7fa   : > { %10011 = vst [vmem:[#allocation22_spill] sm:$0xff] %v9107_v3  ;;  %v9110_v14 = vrot.slane %v4201_v24, %v7059_v28  ;;  %v5986_v5 = vcombine.high %v9107_v3, %v10004_v57  ;;  %v5256_v24 = vcombine.low %v8565_v31, %v8575_v36 }
 0x7fc   : > { %5103 = vrot.lane.b32.xlu0 %v5016_v29, %s6853_s27  ;;  %5135 = vrot.lane.b32.xlu1 %v5081_v49, %s6850_s20  ;;  %v4248_v58 = vcombine.low %v9110_v14, %v9095_v32  ;;  %v9125_v29 = vpop.permute.xlu1 %5662  ;;  %v9146_v31 = vrot.slane %v5256_v24, %v7059_v28  ;;  %v9152_v38 = vpop.permute.xlu0 %5658  ;;  %v4836_v24 = vcombine.high %v4826_v23, %v10004_v57 }
 0x7fe   : > { %v4256_v26 = vrot.slane %v4248_v58, %v7133_v53  ;;  %v9159_v58 = vrot.slane %v5240_v25, %v7059_v28 }
 0x800   : > { %5589 = vrot.lane.b32.xlu1 %v5535_v12, %s6848_s17  ;;  %5557 = vrot.lane.b32.xlu0 %v5484_v34, %s6851_s22  ;;  %v9141_v34 = vrot.slane %v4719_v2, %v7059_v28  ;;  %v9154_v8 = vpop.permute.xlu1 %6158  ;;  %v4999_v2 = vcombine.high %v8963_v17, %v8948_v48  ;;  %v9177_v25 = vpop.permute.xlu0 %6154  ;;  %v5453_v17 = vcombine.high %v9047_v54, %v9055_v35 }
 0x802   : > { %v4750_v36 = vcombine.low %v9134_v47, %v9141_v34  ;;  %v5013_v56 = vrot.slane %v4999_v2, %v7133_v53  ;;  %v5553_v2 = vcombine.high %v5535_v12, %v10004_v57  ;;  %v6055_v12 = vcombine.high %v6037_v7, %v10004_v57 }
 0x804   : > { %6091 = vrot.lane.b32.xlu1 %v6037_v7, %s6848_s17  ;;  %6059 = vrot.lane.b32.xlu0 %v5986_v5, %s6851_s22  ;;  %v5272_v5 = vcombine.low %v9159_v58, %v9146_v31  ;;  %v4758_v43 = vrot.slane %v4750_v36, %v7133_v53  ;;  %v5085_v36 = vcombine.high %v5081_v49, %v10004_v57 }
 0x805   : > { %v5955_v49 = vcombine.high %v9066_v9, %v9071_v16  ;;  %v4317_v9 = vcombine.high %v9005_v1, %v8993_v20  ;;  %v4266_v20 = vcombine.high %v4256_v26, %v10004_v57 }
 0x806   : > { %v9184_v48 = vrot.slane %v5272_v5, %v7133_v53  ;;  %v9199_v5 = vrot.slane %v5453_v17, %v7133_v53 }
 0x807   : > { %v9227_v16 = vrot.slane %v5955_v49, %v7133_v53  ;;  %v9244_v1 = vrot.slane %v4317_v9, %v7133_v53  ;;  %v5674_v49 = vcombine.low %v9123_v51, %v9152_v38  ;;  %v4768_v9 = vcombine.high %v4758_v43, %v10004_v57 }
 0x808   : > { %4381 = vrot.lane.b32.xlu1 %v4334_v60, %s6853_s27  ;;  %4349 = vrot.lane.b32.xlu0 %v4256_v26, %s6849_s19  ;;  %v9175_v60 = vrot.slane %v5758_v63, %v7059_v28  ;;  %10012 = vst [vmem:[#allocation23_spill] sm:$0xff] %v9184_v48  ;;  %v9194_v63 = vpop.permute.xlu0 %6162  ;;  %v5304_v54 = vcombine.high %v9184_v48, %v10004_v57 }
 0x809   : > { %v4819_v26 = vcombine.high %v9028_v33, %v9037_v19  ;;  %v5273_v19 = vcombine.high %v9159_v58, %v9146_v31  ;;  %v5991_v58 = vcombine.high %v8898_v21, %v8920_v61 }
 0x80a   : > { %v5774_v23 = vcombine.low %v9170_v15, %v9175_v60  ;;  %v5775_v61 = vcombine.high %v9170_v15, %v9175_v60 }
 0x80b   : > { %v9314_v21 = vrot.slane %v5991_v58, %v7059_v28 }
 0x80c   : > { %4637 = vrot.lane.b32.xlu1 %v4583_v30, %s6854_s28  ;;  %4605 = vrot.lane.b32.xlu0 %v4511_v11, %s6850_s20  ;;  %v9179_v30 = vpop.permute.xlu1 %6166  ;;  %v9204_v35 = vrot.slane %v5774_v23, %v7133_v53  ;;  %v9220_v23 = vld [vmem:[#allocation2 + $0x1c] sm:$0xff]  ;;  %v5789_v58 = vrot.slane %v5775_v61, %v7133_v53  ;;  %v4751_v61 = vcombine.high %v9134_v47, %v9141_v34 }
 0x80e   : > { %10013 = vst [vmem:[#allocation24_spill] sm:$0xff] %v9204_v35  ;;  %v5806_v17 = vcombine.high %v9204_v35, %v10004_v57  ;;  %v5172_v35 = vcombine.low %v8604_v4, %v8614_v6  ;;  %v5489_v4 = vcombine.high %v8847_v59, %v8877_v62  ;;  %v5505_v59 = vcombine.high %v8833_v46, %v8864_v52 }
 0x80f   : > { %v5690_v62 = vcombine.low %v9101_v18, %v9125_v29  ;;  %v4833_v46 = vrot.slane %v4819_v26, %v7133_v53  ;;  %v5017_v52 = vcombine.high %v5013_v56, %v10004_v57 }
 0x810   : > { %4883 = vrot.lane.b32.xlu1 %v4836_v24, %s6853_s27  ;;  %4851 = vrot.lane.b32.xlu0 %v4758_v43, %s6849_s19  ;;  %v9196_v24 = vpop.permute.xlu1 %6156  ;;  %v9247_v7 = vrot.slane %v5172_v35, %v7059_v28  ;;  %v9273_v33 = vrot.slane %v5489_v4, %v7059_v28 }
 0x811   : > { %v9291_v4 = vrot.slane %v5690_v62, %v7059_v28  ;;  %v4837_v34 = vcombine.high %v4833_v46, %v10004_v57 }
 0x814   : > { %5139 = vrot.lane.b32.xlu1 %v5085_v36, %s6854_s28  ;;  %5107 = vrot.lane.b32.xlu0 %v5013_v56, %s6850_s20  ;;  %v9214_v36 = vpop.permute.xlu0 %6152  ;;  %v9216_v3 = vpop.permute.xlu1 %6164 }
 0x818   : > { %5561 = vrot.lane.b32.xlu1 %v9199_v5, %s6848_s17  ;;  %5337 = vrot.lane.b32.xlu0 %v5304_v54, %s6851_s22  ;;  %v5188_v54 = vcombine.low %v9220_v23, %v8608_v22 }
 0x81a   : > { %v9238_v22 = vrot.slane %v5188_v54, %v7059_v28  ;;  %v4515_v54 = vcombine.high %v4511_v11, %v10004_v57  ;;  %v9278_v11 = vrot.slane %v5674_v49, %v7059_v28  ;;  %v5287_v49 = vrot.slane %v5273_v19, %v7133_v53 }
 0x81b   : > { %v5485_v19 = vcombine.high %v9199_v5, %v10004_v57 }
 0x81c   : > { %5593 = vrot.lane.b32.xlu0 %v5553_v2, %s6852_s26  ;;  %5839 = vrot.lane.b32.xlu1 %v5806_v17, %s6851_s22  ;;  %v9240_v2 = vpop.permute.xlu0 %6160  ;;  %v5204_v6 = vcombine.low %v9247_v7, %v9238_v22  ;;  %v5706_v56 = vcombine.low %v9278_v11, %v9291_v4 }
 0x81e   : > { %v9232_v48 = vpop.permute.xlu1 %5115 }
 0x820   : > { %6063 = vrot.lane.b32.xlu0 %v9227_v16, %s6848_s17  ;;  %6095 = vrot.lane.b32.xlu1 %v6055_v12, %s6852_s26  ;;  %v9260_v17 = vpop.permute.xlu0 %4613  ;;  %v9285_v12 = vrot.slane %v5204_v6, %v7133_v53 }
 0x822   : > { %v9262_v35 = vpop.permute.xlu1 %4617  ;;  %10014 = vst [vmem:[#allocation25_spill] sm:$0xff] %v9285_v12  ;;  %v5236_v26 = vcombine.high %v9285_v12, %v10004_v57  ;;  %v5987_v12 = vcombine.high %v9227_v16, %v10004_v57  ;;  %v5437_v16 = vcombine.high %v8936_v37, %v8971_v40 }
 0x824   : > { %4353 = vrot.lane.b32.xlu0 %v4266_v20, %s6853_s27  ;;  %4385 = vrot.lane.b32.xlu1 %v9244_v1, %s6850_s20  ;;  %v9288_v20 = vrot.slane %v5505_v59, %v7059_v28  ;;  %v9381_v37 = vrot.slane %v5437_v16, %v7059_v28 }
 0x826   : > { %v9280_v43 = vpop.permute.xlu0 %4585  ;;  %v5536_v31 = vcombine.low %v9273_v33, %v9288_v20 }
 0x828   : > { %4609 = vrot.lane.b32.xlu0 %v4515_v54, %s6854_s28  ;;  %4855 = vrot.lane.b32.xlu1 %v4768_v9, %s6853_s27  ;;  %v9293_v54 = vpop.permute.xlu1 %5119  ;;  %v6007_v9 = vcombine.high %v8887_v13, %v8909_v44  ;;  %v5544_v59 = vrot.slane %v5536_v31, %v7133_v53  ;;  %v9325_v13 = vrot.slane %v5706_v56, %v7133_v53 }
 0x829   : > { %v4249_v56 = vcombine.high %v9110_v14, %v9095_v32 }
 0x82a   : > { %10017 = vst [vmem:[#allocation28_spill] sm:$0xff] %v9325_v13  ;;  %v9328_v44 = vrot.slane %v6007_v9, %v7059_v28  ;;  %v5738_v5 = vcombine.high %v9325_v13, %v10004_v57 }
 0x82b   : > { %v4263_v13 = vrot.slane %v4249_v56, %v7133_v53  ;;  %v10021_v56 = vld [vmem:[#allocation21_spill] sm:$0xff] }
 0x82c   : > { %4887 = vrot.lane.b32.xlu0 %v4833_v46, %s6850_s20  ;;  %5111 = vrot.lane.b32.xlu1 %v5017_v52, %s6854_s28  ;;  %v9318_v62 = vpop.permute.xlu1 %4589  ;;  %v6038_v15 = vcombine.low %v9314_v21, %v9328_v44 }
 0x82e   : > { %v9303_v6 = vpop.permute.xlu0 %5087 }
 0x82f   : > { %10015 = vst [vmem:[#allocation26_spill] sm:$0xff] %v9303_v6 }
 0x830   : > { %5309 = vrot.lane.b32.xlu0 %v5236_v26, %s6851_s22  ;;  %5341 = vrot.lane.b32.xlu1 %v5287_v49, %s6848_s17 }
 0x832   : > { %v9320_v52 = vpop.permute.xlu0 %4365 }
 0x833   : > { %10016 = vst [vmem:[#allocation27_spill] sm:$0xff] %v9320_v52 }
 0x834   : > { %5565 = vrot.lane.b32.xlu0 %v5485_v19, %s6852_s26  ;;  %5597 = vrot.lane.b32.xlu1 %v5544_v59, %s6849_s19  ;;  %v6046_v19 = vrot.slane %v6038_v15, %v7133_v53  ;;  %v4335_v15 = vcombine.high %v9244_v1, %v10004_v57  ;;  %v4765_v1 = vrot.slane %v4751_v61, %v7133_v53 }
 0x835   : > { %v5305_v61 = vcombine.high %v5287_v49, %v10004_v57  ;;  %v5554_v49 = vcombine.high %v5544_v59, %v10004_v57 }
 0x836   : > { %v9334_v60 = vpop.permute.xlu1 %4867  ;;  %v9336_v31 = vpop.permute.xlu0 %4621 }
 0x837   : > { %10018 = vst [vmem:[#allocation29_spill] sm:$0xff] %v9334_v60 }
 0x838   : > { %5843 = vrot.lane.b32.xlu1 %v5789_v58, %s6848_s17  ;;  %5811 = vrot.lane.b32.xlu0 %v5738_v5, %s6851_s22  ;;  %v5421_v5 = vcombine.high %v8950_v0, %v8985_v55 }
 0x83a   : > { %v9345_v26 = vpop.permute.xlu1 %5123  ;;  %v9347_v9 = vpop.permute.xlu0 %5091  ;;  %v9370_v47 = vrot.slane %v5421_v5, %v7059_v28  ;;  %v5923_v5 = vcombine.high %v10021_v56, %v9034_v27  ;;  %v5707_v27 = vcombine.high %v9278_v11, %v9291_v4  ;;  %v5807_v4 = vcombine.high %v5789_v58, %v10004_v57 }
 0x83b   : > { %10019 = vst [vmem:[#allocation30_spill] sm:$0xff] %v9347_v9 }
 0x83c   : > { %6099 = vrot.lane.b32.xlu1 %v6046_v19, %s6849_s19  ;;  %6067 = vrot.lane.b32.xlu0 %v5987_v12, %s6852_s26  ;;  %v5205_v12 = vcombine.high %v9247_v7, %v9238_v22  ;;  %v5468_v40 = vcombine.low %v9370_v47, %v9381_v37  ;;  %v10023_v7 = vld [vmem:[#allocation18_spill] sm:$0xff]  ;;  %v5721_v59 = vrot.slane %v5707_v27, %v7133_v53 }
 0x83d   : > { %v5939_v16 = vcombine.high %v10023_v7, %v9021_v39  ;;  %v6732_v7 = vld [vmem:[#allocation2 + $0x24] sm:$0xff] }
 0x83e   : > { %v9358_v32 = vpop.permute.xlu1 %4369  ;;  %v9360_v14 = vpop.permute.xlu0 %4337  ;;  %v5219_v22 = vrot.slane %v5205_v12, %v7133_v53  ;;  %v5476_v12 = vrot.slane %v5468_v40, %v7133_v53  ;;  %v6733_v40 = vld [vmem:[#allocation2 + $0x54] sm:$0xff] }
 0x83f   : > { %10020 = vst [vmem:[#allocation31_spill] sm:$0xff] %v9358_v32  ;;  %v9411_v39 = vrot.slane %v5939_v16, %v7059_v28  ;;  %v5257_v60 = vcombine.high %v6732_v7, %v6733_v40  ;;  %v6734_v16 = vld [vmem:[#allocation2 + $0xc] sm:$0xff]  ;;  %v5743_v7 = vcombine.high %v9073_v10, %v9099_v50  ;;  %v5537_v10 = vcombine.high %v9273_v33, %v9288_v20 }
 0x840   : > { %4389 = vrot.lane.b32.xlu1 %v4335_v15, %s6854_s28  ;;  %4357 = vrot.lane.b32.xlu0 %v4263_v13, %s6850_s20 }
 0x841   : > { %v9432_v27 = vrot.slane %v5257_v60, %v7059_v28  ;;  %v9456_v50 = vrot.slane %v5743_v7, %v7059_v28  ;;  %v5551_v7 = vrot.slane %v5537_v10, %v7133_v53 }
 0x842   : > { %v9372_v0 = vpop.permute.xlu1 %4625  ;;  %v9374_v55 = vpop.permute.xlu0 %4593 }
 0x844   : > { %4891 = vrot.lane.b32.xlu1 %v4837_v34, %s6854_s28  ;;  %4859 = vrot.lane.b32.xlu0 %v4765_v1, %s6850_s20  ;;  %v9400_v34 = vrot.slane %v5923_v5, %v7059_v28 }
 0x846   : > { %v9389_v15 = vpop.permute.xlu1 %4871  ;;  %v9391_v46 = vpop.permute.xlu0 %4839  ;;  %v5970_v5 = vcombine.low %v9400_v34, %v9411_v39 }
 0x847   : > { %10022 = vst [vmem:[#allocation21_spill] sm:$0xff] %v9389_v15 }
 0x848   : > { %5345 = vrot.lane.b32.xlu1 %v5305_v61, %s6852_s26  ;;  %5313 = vrot.lane.b32.xlu0 %v5219_v22, %s6848_s17  ;;  %v5978_v58 = vrot.slane %v5970_v5, %v7133_v53  ;;  %v4267_v5 = vcombine.high %v4263_v13, %v10004_v57 }
 0x84a   : > { %v9404_v56 = vpop.permute.xlu1 %5127  ;;  %v9406_v15 = vpop.permute.xlu0 %5095 }
 0x84b   : > { %10024 = vst [vmem:[#allocation18_spill] sm:$0xff] %v9406_v15 }
 0x84c   : > { %5601 = vrot.lane.b32.xlu1 %v5554_v49, %s6853_s27  ;;  %5569 = vrot.lane.b32.xlu0 %v5476_v12, %s6849_s19  ;;  %v6735_v49 = vld [vmem:[#allocation2 + $0x3c] sm:$0xff] }
 0x84d   : > { %v5241_v32 = vcombine.high %v6734_v16, %v6735_v49  ;;  %v5237_v49 = vcombine.high %v5219_v22, %v10004_v57 }
 0x84e   : > { %v9417_v61 = vpop.permute.xlu1 %4373  ;;  %v9419_v11 = vpop.permute.xlu0 %4341 }
 0x84f   : > { %10025 = vst [vmem:[#allocation32_spill] sm:$0xff] %v9417_v61  ;;  %v6056_v61 = vcombine.high %v6046_v19, %v10004_v57  ;;  %v4769_v19 = vcombine.high %v4765_v1, %v10004_v57 }
 0x850   : > { %5847 = vrot.lane.b32.xlu1 %v5807_v4, %s6852_s26  ;;  %5815 = vrot.lane.b32.xlu0 %v5721_v59, %s6848_s17  ;;  %v9437_v4 = vrot.slane %v5241_v32, %v7059_v28 }
 0x852   : > { %v9425_v52 = vpop.permute.xlu1 %4629  ;;  %v9427_v15 = vpop.permute.xlu0 %4597  ;;  %v5288_v60 = vcombine.low %v9437_v4, %v9432_v27 }
 0x854   : > { %6103 = vrot.lane.b32.xlu1 %v6056_v61, %s6853_s27  ;;  %6071 = vrot.lane.b32.xlu0 %v5978_v58, %s6849_s19  ;;  %v5759_v61 = vcombine.high %v9051_v41, %v9075_v45  ;;  %v5296_v13 = vrot.slane %v5288_v60, %v7133_v53  ;;  %v6737_v60 = vld [vmem:[#allocation2 + $0x4] sm:$0xff] }
 0x856   : > { %v9441_v40 = vpop.permute.xlu1 %4875  ;;  %v9443_v16 = vpop.permute.xlu0 %4843  ;;  %v9465_v41 = vrot.slane %v5759_v61, %v7059_v28  ;;  %v6738_v61 = vld [vmem:[#allocation2 + $0x34] sm:$0xff] }
 0x857   : > { %10026 = vst [vmem:[#allocation33_spill] sm:$0xff] %v9441_v40  ;;  %v6039_v40 = vcombine.high %v9314_v21, %v9328_v44  ;;  %v5675_v21 = vcombine.high %v9123_v51, %v9152_v38  ;;  %v5469_v51 = vcombine.high %v9370_v47, %v9381_v37 }
 0x858   : > { %4863 = vrot.lane.b32.xlu1 %v4769_v19, %s6854_s28  ;;  %4361 = vrot.lane.b32.xlu0 %v4267_v5, %s6854_s28  ;;  %v5790_v45 = vcombine.low %v9456_v50, %v9465_v41  ;;  %v5486_v19 = vcombine.high %v5476_v12, %v10004_v57  ;;  %v6736_v5 = vld [vmem:[#allocation2 + $0x4c] sm:$0xff]  ;;  %v5739_v12 = vcombine.high %v5721_v59, %v10004_v57 }
 0x859   : > { %v5189_v22 = vcombine.high %v9220_v23, %v6736_v5  ;;  %v5988_v59 = vcombine.high %v5978_v58, %v10004_v57  ;;  %v9507_v38 = vrot.slane %v5675_v21, %v7059_v28  ;;  %v5306_v58 = vcombine.high %v5296_v13, %v10004_v57 }
 0x85a   : > { %v9458_v32 = vpop.permute.xlu1 %5131  ;;  %v9460_v1 = vpop.permute.xlu0 %5099  ;;  %v5798_v10 = vrot.slane %v5790_v45, %v7133_v53  ;;  %v6053_v45 = vrot.slane %v6039_v40, %v7133_v53 }
 0x85b   : > { %10027 = vst [vmem:[#allocation34_spill] sm:$0xff] %v9460_v1  ;;  %v9485_v6 = vrot.slane %v5189_v22, %v7059_v28  ;;  %v5691_v22 = vcombine.high %v9101_v18, %v9125_v29 }
 0x85c   : > { %5349 = vrot.lane.b32.xlu1 %v5296_v13, %s6849_s19  ;;  %5317 = vrot.lane.b32.xlu0 %v5237_v49, %s6852_s26  ;;  %v5173_v49 = vcombine.high %v6737_v60, %v6738_v61  ;;  %v5483_v13 = vrot.slane %v5469_v51, %v7133_v53 }
 0x85d   : > { %v9516_v18 = vrot.slane %v5691_v22, %v7059_v28 }
 0x85e   : > { %v6088_v33 = vpop.permute.xlu1 %6087  ;;  %v9471_v20 = vpop.permute.xlu0 %5585  ;;  %v9490_v23 = vrot.slane %v5173_v49, %v7059_v28  ;;  %v5555_v49 = vcombine.high %v5551_v7, %v10004_v57 }
 0x85f   : > { %v5722_v29 = vcombine.low %v9507_v38, %v9516_v18 }
 0x860   : > { %5605 = vrot.lane.b32.xlu1 %v5551_v7, %s6850_s20  ;;  %5573 = vrot.lane.b32.xlu0 %v5486_v19, %s6853_s27  ;;  %v5220_v5 = vcombine.low %v9490_v23, %v9485_v6  ;;  %v10029_v7 = vld [vmem:[#allocation20_spill] sm:$0xff] }
 0x861   : > { %v5730_v22 = vrot.slane %v5722_v29, %v7133_v53  ;;  %v6121_v51 = vsel %vm465_vm4, %v10029_v7, %v6088_v33  ;;  %v10030_v29 = vld [vmem:[#allocation16_spill] sm:$0xff]  ;;  %v10031_v33 = vld [vmem:[#allocation10_spill] sm:$0xff] }
 0x862   : > { %v9480_v1 = vpop.permute.xlu1 %4377  ;;  %v4346_v9 = vpop.permute.xlu0 %4345  ;;  %v5228_v61 = vrot.slane %v5220_v5, %v7133_v53  ;;  %v5808_v5 = vcombine.high %v5798_v10, %v10004_v57 }
 0x864   : > { %5851 = vrot.lane.b32.xlu1 %v5798_v10, %s6849_s19  ;;  %5819 = vrot.lane.b32.xlu0 %v5739_v12, %s6852_s26  ;;  %v5971_v12 = vcombine.high %v9400_v34, %v9411_v39  ;;  %v6057_v34 = vcombine.high %v6053_v45, %v10004_v57 }
 0x866   : > { %v4634_v44 = vpop.permute.xlu1 %4633  ;;  %v9494_v19 = vpop.permute.xlu0 %4601  ;;  %v5985_v39 = vrot.slane %v5971_v12, %v7133_v53 }
 0x868   : > { %6107 = vrot.lane.b32.xlu1 %v6053_v45, %s6850_s20  ;;  %6075 = vrot.lane.b32.xlu0 %v5988_v59, %s6853_s27  ;;  %v4647_v45 = vsel %vm465_vm4, %v10031_v33, %v9260_v17 }
 0x86a   : > { %v9509_v60 = vpop.permute.xlu1 %4879  ;;  %v9511_v40 = vpop.permute.xlu0 %4847 }
 0x86b   : > { %10028 = vst [vmem:[#allocation35_spill] sm:$0xff] %v9509_v60  ;;  %v5289_v60 = vcombine.high %v9437_v4, %v9432_v27  ;;  %v4648_v27 = vsel %vm467_vm5, %v4647_v45, %v9262_v35  ;;  %v5791_v35 = vcombine.high %v9456_v50, %v9465_v41  ;;  %v6260_v50 = vcombine.low %v9154_v8, %v9179_v30  ;;  %v10032_v41 = vld [vmem:[#allocation17_spill] sm:$0xff] }
 0x86c   : > { %5353 = vrot.lane.b32.xlu1 %v5306_v58, %s6853_s27  ;;  %5321 = vrot.lane.b32.xlu0 %v5228_v61, %s6849_s19 }
 0x86e   : > { %v9522_v47 = vpop.permute.xlu1 %5135  ;;  %v9524_v37 = vpop.permute.xlu0 %5103 }
 0x870   : > { %5609 = vrot.lane.b32.xlu1 %v5555_v49, %s6854_s28  ;;  %5577 = vrot.lane.b32.xlu0 %v5483_v13, %s6850_s20 }
 0x872   : > { %v9532_v21 = vpop.permute.xlu1 %5589  ;;  %v9534_v59 = vpop.permute.xlu0 %5557 }
 0x874   : > { %5855 = vrot.lane.b32.xlu1 %v5808_v5, %s6853_s27  ;;  %5823 = vrot.lane.b32.xlu0 %v5730_v22, %s6849_s19  ;;  %v4392_v5 = vsel %vm465_vm4, %v10030_v29, %v9360_v14  ;;  %v5303_v14 = vrot.slane %v5289_v60, %v7133_v53  ;;  %v6244_v60 = vcombine.low %v9177_v25, %v9194_v63 }
 0x875   : > { %v4393_v12 = vsel %vm467_vm5, %v4392_v5, %v9419_v11  ;;  %v5487_v5 = vcombine.high %v5483_v13, %v10004_v57 }
 0x876   : > { %v6092_v58 = vpop.permute.xlu1 %6091  ;;  %v9542_v49 = vpop.permute.xlu0 %6059  ;;  %v4394_v4 = vsel %vm469_vm6, %v4393_v12, %v4346_v9 }
 0x877   : > { %v9549_v10 = vsel %vm467_vm5, %v6121_v51, %v6092_v58  ;;  %v5238_v58 = vcombine.high %v5228_v61, %v10004_v57 }
 0x878   : > { %6111 = vrot.lane.b32.xlu1 %v6057_v34, %s6854_s28  ;;  %6079 = vrot.lane.b32.xlu0 %v5985_v39, %s6850_s20  ;;  %v4649_v34 = vsel %vm469_vm6, %v4648_v27, %v9336_v31  ;;  %v5989_v27 = vcombine.high %v5985_v39, %v10004_v57 }
 0x879   : > { %v4650_v11 = vsel %vm471_vm7, %v4649_v34, %v9372_v0  ;;  %v5740_v0 = vcombine.high %v5730_v22, %v10004_v57  ;;  %v10033_v22 = vld [vmem:[#allocation11_spill] sm:$0xff]  ;;  %v6268_v34 = vrot.slane %v6260_v50, %v7059_v28 }
 0x87a   : > { %v9564_v7 = vpop.permute.xlu1 %4381  ;;  %v4350_v51 = vpop.permute.xlu0 %4349  ;;  %v4651_v9 = vsel %vm473_vm8, %v4650_v11, %v9425_v52  ;;  %v4894_v52 = vsel %vm465_vm4, %v10032_v41, %v9391_v46  ;;  %v5149_v13 = vsel %vm465_vm4, %v10033_v22, %v9232_v48  ;;  %v9606_v46 = vrot.slane %v6244_v60, %v7059_v28 }
 0x87b   : > { %v9571_v17 = vsel %vm471_vm7, %v4394_v4, %v4350_v51  ;;  %v4652_v31 = vsel %vm475_vm9, %v4651_v9, %v4634_v44  ;;  %v5221_v44 = vcombine.high %v9490_v23, %v9485_v6  ;;  %v4895_v12 = vsel %vm467_vm5, %v4894_v52, %v9443_v16 }
 0x87c   : > { %5357 = vrot.lane.b32.xlu1 %v5303_v14, %s6850_s20  ;;  %5325 = vrot.lane.b32.xlu0 %v5238_v58, %s6853_s27  ;;  %v5805_v4 = vrot.slane %v5791_v35, %v7133_v53  ;;  %v6176_v51 = vcombine.low %v9214_v36, %v9240_v2  ;;  %v5150_v6 = vsel %vm467_vm5, %v5149_v13, %v9293_v54 }
 0x87d   : > { %v4896_v23 = vsel %vm469_vm6, %v4895_v12, %v9511_v40  ;;  %v5151_v39 = vsel %vm469_vm6, %v5150_v6, %v9345_v26  ;;  %v6192_v11 = vcombine.low %v9196_v24, %v9216_v3  ;;  %v5307_v26 = vcombine.high %v5303_v14, %v10004_v57 }
 0x87e   : > { %v4638_v61 = vpop.permute.xlu1 %4637  ;;  %v9584_v29 = vpop.permute.xlu0 %4605  ;;  %v5152_v54 = vsel %vm471_vm7, %v5151_v39, %v9404_v56  ;;  %v5235_v35 = vrot.slane %v5221_v44, %v7133_v53  ;;  %v5723_v9 = vcombine.high %v9507_v38, %v9516_v18  ;;  %v6276_v60 = vcombine.low %v9606_v46, %v6268_v34  ;;  %v10034_v44 = vld [vmem:[#allocation19_spill] sm:$0xff]  ;;  %v10035_v39 = vld [vmem:[#allocation22_spill] sm:$0xff] }
 0x87f   : > { %v4653_v33 = vsel %vm477_vm10, %v4652_v31, %v4638_v61  ;;  %v5153_v40 = vsel %vm473_vm8, %v5152_v54, %v9458_v32  ;;  %v6184_v31 = vrot.slane %v6176_v51, %v7059_v28  ;;  %v6200_v32 = vrot.slane %v6192_v11, %v7059_v28 }
 0x880   : > { %v4657_v45 = vrot.slane %v4653_v33, 4  ;;  %5827 = vrot.lane.b32.xlu1 %v5740_v0, %s6853_s27  ;;  %5581 = vrot.lane.b32.xlu0 %v5487_v5, %s6854_s28  ;;  %v5154_v56 = vsel %vm475_vm9, %v5153_v40, %v9522_v47  ;;  %v5809_v38 = vcombine.high %v5805_v4, %v10004_v57  ;;  %v5612_v33 = vsel %vm465_vm4, %v9088_v42, %v9534_v59 }
 0x881   : > { %v6208_v18 = vcombine.low %v6184_v31, %v6200_v32  ;;  %v5737_v41 = vrot.slane %v5723_v9, %v7133_v53  ;;  %v9652_v52 = vrot.slane %v6276_v60, %v7133_v53  ;;  %v5619_v42 = vsel %vm465_vm4, %v10034_v44, %v9471_v20 }
 0x882   : > { %4661 = vst [vmem:[#allocation3 + $0x88] sm:$0xf0] %v4657_v45  ;;  %v9614_v48 = vpop.permute.xlu1 %4883  ;;  %v4852_v16 = vpop.permute.xlu0 %4851  ;;  %v5620_v59 = vsel %vm467_vm5, %v5619_v42, %v9532_v21  ;;  %v5239_v12 = vcombine.high %v5235_v35, %v10004_v57  ;;  %v6245_v20 = vcombine.high %v9177_v25, %v9194_v63  ;;  %v6277_v21 = vcombine.high %v9606_v46, %v6268_v34 }
 0x883   : > { %v9619_v58 = vsel %vm471_vm7, %v4896_v23, %v4852_v16  ;;  %v5741_v6 = vcombine.high %v5737_v41, %v10004_v57  ;;  %v6177_v23 = vcombine.high %v9214_v36, %v9240_v2  ;;  %v6209_v16 = vcombine.high %v6184_v31, %v6200_v32 }
 0x884   : > { %6083 = vrot.lane.b32.xlu1 %v5989_v27, %s6854_s28  ;;  %5859 = vrot.lane.b32.xlu0 %v5805_v4, %s6850_s20  ;;  %v6308_v27 = vcombine.high %v9652_v52, %v10004_v57  ;;  %v9670_v4 = vrot.slane %v6208_v18, %v7133_v53  ;;  %v6114_v11 = vsel %vm465_vm4, %v10035_v39, %v9542_v49  ;;  %v10036_v49 = vld [vmem:[#allocation12_spill] sm:$0xff] }
 0x885   : > { %v6261_v25 = vcombine.high %v9154_v8, %v9179_v30  ;;  %v6193_v36 = vcombine.high %v9196_v24, %v9216_v3  ;;  %v6259_v2 = vrot.slane %v6245_v20, %v7059_v28  ;;  %v4640_v8 = vsel %vm465_vm4, %v10036_v49, %v9280_v43 }
 0x886   : > { %v5140_v61 = vpop.permute.xlu1 %5139  ;;  %v9638_v0 = vpop.permute.xlu0 %5107  ;;  %v6291_v30 = vrot.slane %v6277_v21, %v7133_v53  ;;  %v4641_v34 = vsel %vm467_vm5, %v4640_v8, %v9318_v62  ;;  %v6223_v24 = vrot.slane %v6209_v16, %v7133_v53 }
 0x887   : > { %v5155_v5 = vsel %vm477_vm10, %v5154_v56, %v5140_v61  ;;  %v6275_v9 = vrot.slane %v6261_v25, %v7059_v28  ;;  %v4642_v60 = vsel %vm469_vm6, %v4641_v34, %v9374_v55  ;;  %v6207_v43 = vrot.slane %v6193_v36, %v7059_v28  ;;  %v10037_v56 = vld [vmem:[#allocation26_spill] sm:$0xff]  ;;  %v10038_v61 = vld [vmem:[#allocation13_spill] sm:$0xff] }
 0x888   : > { %v5159_v14 = vrot.slane %v5155_v5, 4  ;;  %5361 = vrot.lane.b32.xlu1 %v5307_v26, %s6854_s28  ;;  %5329 = vrot.lane.b32.xlu0 %v5235_v35, %s6850_s20  ;;  %v6240_v26 = vcombine.high %v9670_v4, %v10004_v57  ;;  %v4643_v31 = vsel %vm471_vm7, %v4642_v60, %v9427_v15  ;;  %v5142_v5 = vsel %vm465_vm4, %v10038_v61, %v10037_v56  ;;  %v6411_v56 = vld [vmem:[%s9968_s2] sm:$0xff]  ;;  %v10046_v61 = vld [vmem:[#allocation31_spill] sm:$0xff] }
 0x889   : > { %v6292_v62 = vcombine.low %v6259_v2, %v6275_v9  ;;  %v4644_v32 = vsel %vm473_vm8, %v4643_v31, %v9494_v19  ;;  %v10041_v19 = vld [vmem:[#allocation34_spill] sm:$0xff]  ;;  %v6293_v39 = vcombine.high %v6259_v2, %v6275_v9  ;;  %v10044_v31 = vld [vmem:[#allocation27_spill] sm:$0xff] }
 0x88a   : > { %5163 = vst [vmem:[#allocation3 + $0x98] sm:$0xf0] %v5159_v14  ;;  %v5562_v47 = vpop.permute.xlu1 %5561  ;;  %v9648_v50 = vpop.permute.xlu0 %5337  ;;  %v6309_v14 = vcombine.high %v6291_v30, %v10004_v57  ;;  %v4645_v15 = vsel %vm475_vm9, %v4644_v32, %v9584_v29 }
 0x88b   : > { %v9655_v45 = vsel %vm467_vm5, %v5612_v33, %v5562_v47  ;;  %v6241_v47 = vcombine.high %v6223_v24, %v10004_v57 }
 0x88c   : > { %5863 = vrot.lane.b32.xlu1 %v5809_v38, %s6854_s28  ;;  %5831 = vrot.lane.b32.xlu0 %v5737_v41, %s6850_s20  ;;  %v10039_v38 = vld [vmem:[#allocation30_spill] sm:$0xff] }
 0x88d   : > { %v10040_v41 = vld [vmem:[#allocation18_spill] sm:$0xff] }
 0x88e   : > { %v9664_v22 = vpop.permute.xlu1 %5839  ;;  %v5594_v13 = vpop.permute.xlu0 %5593 }
 0x88f   : > { %v9673_v51 = vsel %vm469_vm6, %v5620_v59, %v5594_v13 }
 0x890   : > { %5333 = vrot.lane.b32.xlu1 %v5239_v12, %s6854_s28  ;;  %6341 = vrot.lane.b32.xlu0 %v6308_v27, %s6851_s22 }
 0x892   : > { %v6096_v54 = vpop.permute.xlu1 %6095  ;;  %v6064_v40 = vpop.permute.xlu0 %6063 }
 0x893   : > { %v9692_v63 = vsel %vm469_vm6, %v9549_v10, %v6096_v54  ;;  %v9695_v46 = vsel %vm467_vm5, %v6114_v11, %v6064_v40  ;;  %v6191_v10 = vrot.slane %v6177_v23, %v7059_v28  ;;  %v5143_v28 = vsel %vm467_vm5, %v5142_v5, %v10039_v38 }
 0x894   : > { %6313 = vrot.lane.b32.xlu1 %v6240_v26, %s6851_s22  ;;  %5835 = vrot.lane.b32.xlu0 %v5741_v6, %s6854_s28  ;;  %v5144_v44 = vsel %vm469_vm6, %v5143_v28, %v10040_v41  ;;  %v6300_v6 = vrot.slane %v6292_v62, %v7133_v53  ;;  %v10045_v62 = vld [vmem:[#allocation14_spill] sm:$0xff] }
 0x895   : > { %v6224_v55 = vcombine.low %v6191_v10, %v6207_v43  ;;  %v5145_v59 = vsel %vm471_vm7, %v5144_v44, %v10041_v19  ;;  %v6225_v11 = vcombine.high %v6191_v10, %v6207_v43  ;;  %v10043_v10 = vld [vmem:[#allocation24_spill] sm:$0xff]  ;;  %v10050_v44 = vld [vmem:[#allocation21_spill] sm:$0xff] }
 0x896   : > { %v9709_v35 = vpop.permute.xlu1 %4385  ;;  %v9711_v3 = vpop.permute.xlu0 %4353  ;;  %v5146_v29 = vsel %vm473_vm8, %v5145_v59, %v9524_v37  ;;  %v10042_v37 = vld [vmem:[#allocation23_spill] sm:$0xff]  ;;  %v6310_v25 = vcombine.high %v6300_v6, %v10004_v57  ;;  %v5873_v34 = vsel %vm465_vm4, %v10043_v10, %v9664_v22  ;;  %v4399_v22 = vsel %vm465_vm4, %v10045_v62, %v10044_v31 }
 0x897   : > { %v5147_v12 = vsel %vm475_vm9, %v5146_v29, %v9638_v0  ;;  %v6232_v21 = vrot.slane %v6224_v55, %v7133_v53  ;;  %v5371_v0 = vsel %vm465_vm4, %v10042_v37, %v9648_v50  ;;  %v6239_v8 = vrot.slane %v6225_v11, %v7133_v53 }
 0x898   : > { %6317 = vrot.lane.b32.xlu1 %v6223_v24, %s6848_s17  ;;  %6345 = vrot.lane.b32.xlu0 %v6291_v30, %s6848_s17  ;;  %v6307_v50 = vrot.slane %v6293_v39, %v7133_v53  ;;  %s9922_s17 = scalar_lea.hbm %s9969_s3, %s6604_s23 }
 0x899   : > { %v6242_v26 = vcombine.high %v6232_v21, %v10004_v57  ;;  %v6243_v60 = vcombine.high %v6239_v8, %v10004_v57 }
 0x89a   : > { %v9732_v18 = vpop.permute.xlu1 %4855  ;;  %v4610_v33 = vpop.permute.xlu0 %4609  ;;  %v6311_v43 = vcombine.high %v6307_v50, %v10004_v57  ;;  %v4400_v57 = vsel %vm467_vm5, %v4399_v22, %v10046_v61 }
 0x89b   : > { %v4646_v42 = vsel %vm477_vm10, %v4645_v15, %v4610_v33  ;;  %v10048_v15 = vld [vmem:[#allocation29_spill] sm:$0xff]  ;;  %v10049_v33 = vld [vmem:[#allocation15_spill] sm:$0xff] }
 0x89c   : > { %v4656_v13 = vrot.slane %v4646_v42, 4  ;;  %6321 = vrot.lane.b32.xlu1 %v6241_v47, %s6852_s26  ;;  %6349 = vrot.lane.b32.xlu0 %v6309_v14, %s6852_s26  ;;  %v10047_v14 = vld [vmem:[#allocation32_spill] sm:$0xff]  ;;  %v4901_v47 = vsel %vm465_vm4, %v10049_v33, %v10048_v15 }
 0x89d   : > { %v4401_v55 = vsel %vm469_vm6, %v4400_v57, %v10047_v14  ;;  %v4902_v42 = vsel %vm467_vm5, %v4901_v47, %v10050_v44 }
 0x89e   : > { %4660 = vst [vmem:[#allocation3 + $0x80] sm:$0xf0] %v4656_v13  ;;  %v5112_v27 = vpop.permute.xlu1 %5111  ;;  %v4888_v20 = vpop.permute.xlu0 %4887  ;;  %v4402_v28 = vsel %vm471_vm7, %v4401_v55, %v9480_v1  ;;  %v10051_v13 = vld [vmem:[#allocation33_spill] sm:$0xff] }
 0x89f   : > { %v5148_v23 = vsel %vm477_vm10, %v5147_v12, %v5112_v27  ;;  %v4403_v41 = vsel %vm473_vm8, %v4402_v28, %v9564_v7  ;;  %v4903_v29 = vsel %vm469_vm6, %v4902_v42, %v10051_v13  ;;  %v10052_v12 = vld [vmem:[#allocation35_spill] sm:$0xff] }
 0x8a0   : > { %v5158_v16 = vrot.slane %v5148_v23, 4  ;;  %6325 = vrot.lane.b32.xlu1 %v6232_v21, %s6849_s19  ;;  %6353 = vrot.lane.b32.xlu0 %v6300_v6, %s6849_s19  ;;  %v4404_v19 = vsel %vm475_vm9, %v4403_v41, %v9709_v35  ;;  %v4904_v27 = vsel %vm471_vm7, %v4903_v29, %v10052_v12  ;;  %s6502_s19 = scalar_lea.sflag [#allocation6], %s6981_s5 }
 0x8a1   : > { %v4905_v7 = vsel %vm473_vm8, %v4904_v27, %v9614_v48 }
 0x8a2   : > { %5162 = vst [vmem:[#allocation3 + $0x90] sm:$0xf0] %v5158_v16  ;;  %v5342_v54 = vpop.permute.xlu1 %5341  ;;  %v5310_v40 = vpop.permute.xlu0 %5309  ;;  %v4906_v21 = vsel %vm475_vm9, %v4905_v7, %v4888_v20  ;;  %v10053_v16 = vld [vmem:[#allocation25_spill] sm:$0xff] }
 0x8a3   : > { %v9757_v36 = vsel %vm467_vm5, %v5371_v0, %v5342_v54  ;;  %v5364_v39 = vsel %vm465_vm4, %v10053_v16, %v5310_v40  ;;  %v4396_v40 = vsel %vm473_vm8, %v9571_v17, %v9711_v3 }
 0x8a4   : > { %6329 = vrot.lane.b32.xlu1 %v6242_v26, %s6853_s27  ;;  %6357 = vrot.lane.b32.xlu0 %v6310_v25, %s6853_s27 }
 0x8a6   : > { %v9761_v2 = vpop.permute.xlu1 %5597  ;;  %v5566_v49 = vpop.permute.xlu0 %5565 }
 0x8a7   : > { %v9767_v30 = vsel %vm469_vm6, %v9655_v45, %v5566_v49  ;;  %v6855_v45 = vmov 0   ;;  %v5622_v33 = vsel %vm471_vm7, %v9673_v51, %v9761_v2 }
 0x8a8   : > { %6333 = vrot.lane.b32.xlu1 %v6239_v8, %s6850_s20  ;;  %6361 = vrot.lane.b32.xlu0 %v6307_v50, %s6850_s20  ;;  %s6856_s20 = smov [#allocation7]  }
 0x8a9   : > { %6693 = vset.pattern.permute.xlu0 %v6855_v45  ;;  %s6773_s22 = sshll.u32 %s6856_s20, 4  ;;  %s6774_s22 = int_to_ptr.vmem [resolvable:$false] %s6773_s22 }
 0x8aa   : > { %v5844_v24 = vpop.permute.xlu1 %5843  ;;  %v9774_v9 = vpop.permute.xlu0 %5811  ;;  %s6775_s26 = scalar_lea.vmem %s6774_s22, 512  ;;  %p6776_p8 = scmp.lt.s32.totalorder %s9924_s6, %s6774_s22 }
 0x8ab   : > { %v9779_v53 = vsel %vm467_vm5, %v5873_v34, %v5844_v24  ;;  %v4898_v34 = vsel %vm473_vm8, %v9619_v58, %v9732_v18  ;;  %p6777_p10 = scmp.lt.s32.totalorder %s6775_s26, %s6769_s16 }
 0x8ac   : > { %6337 = vrot.lane.b32.xlu1 %v6243_v60, %s6854_s28  ;;  %6365 = vrot.lane.b32.xlu0 %v6311_v43, %s6854_s28 }
 0x8ad   : > { %p6778_p0 = por %p6777_p10, %p6776_p8 }
 0x8ae   : > { %v9791_v5 = vpop.permute.xlu1 %6099  ;;  %v6068_v32 = vpop.permute.xlu0 %6067 }
 0x8af   : > { %v9797_v38 = vsel %vm469_vm6, %v9695_v46, %v6068_v32  ;;  %v6124_v29 = vsel %vm471_vm7, %v9692_v63, %v9791_v5  ;;  %p6779_p2 = pnand %p6778_p0, %p6772_p13 }
 0x8b0   : > { %6414 = vperm.xlu0 %6693, %v6411_v56  }
 0x8b2   : > { %v4390_v59 = vpop.permute.xlu1 %4389  ;;  %v4358_v46 = vpop.permute.xlu0 %4357 }
 0x8b3   : > { %v4405_v1 = vsel %vm477_vm10, %v4404_v19, %v4390_v59  ;;  %v4397_v24 = vsel %vm475_vm9, %v4396_v40, %v4358_v46 }
 0x8b4   : > { %4407 = vst [vmem:[#allocation3 + $0x88] sm:$0xf] %v4405_v1 }
 0x8b6   : > { %v4892_v6 = vpop.permute.xlu1 %4891  ;;  %v4860_v23 = vpop.permute.xlu0 %4859 }
 0x8b7   : > { %v4907_v35 = vsel %vm477_vm10, %v4906_v21, %v4892_v6  ;;  %v4899_v60 = vsel %vm475_vm9, %v4898_v34, %v4860_v23 }
 0x8b8   : > { %4909 = vst [vmem:[#allocation3 + $0x98] sm:$0xf] %v4907_v35 }
 0x8ba   : > { %v9821_v11 = vpop.permute.xlu1 %5345  ;;  %v5314_v37 = vpop.permute.xlu0 %5313 }
 0x8bb   : > { %v9824_v0 = vsel %vm467_vm5, %v5364_v39, %v5314_v37  ;;  %v6402_v25 = vld [vmem:[#allocation3 + $0x88] sm:$0xff] }
 0x8be   : > { %v5602_v54 = vpop.permute.xlu1 %5601  ;;  %v5570_v26 = vpop.permute.xlu0 %5569 }
 0x8bf   : > { %v6404_v48 = vld [vmem:[#allocation3 + $0x98] sm:$0xff]  ;;  %v5623_v47 = vsel %vm473_vm8, %v5622_v33, %v5602_v54  ;;  %v5615_v23 = vsel %vm471_vm7, %v9767_v30, %v5570_v26  ;;  %v5373_v30 = vsel %vm469_vm6, %v9757_v36, %v9821_v11 }
 0x8c0   : > { %v6621_v49 = vpack.c.bf16 %v6404_v48, %v6402_v25 }
 0x8c2   : > { %v9826_v20 = vpop.permute.xlu1 %5847  ;;  %6622 = vmatprep.subr.bf16.mxu0 %v6621_v49  ;;  %v9828_v8 = vpop.permute.xlu0 %5815 }
 0x8c6   : > { %v6104_v50 = vpop.permute.xlu1 %6103  ;;  %v6072_v10 = vpop.permute.xlu0 %6071 }
 0x8c7   : > { %v6125_v1 = vsel %vm473_vm8, %v6124_v29, %v6104_v50  ;;  %v6117_v37 = vsel %vm471_vm7, %v9797_v38, %v6072_v10 }
 0x8ca   : > { %v4864_v43 = vpop.permute.xlu1 %4863  ;;  %v4362_v45 = vpop.permute.xlu0 %4361 }
 0x8cb   : > { %v4900_v31 = vsel %vm477_vm10, %v4899_v60, %v4864_v43  ;;  %v4398_v62 = vsel %vm477_vm10, %v4397_v24, %v4362_v45  ;;  %v5875_v43 = vsel %vm469_vm6, %v9779_v53, %v9826_v20  ;;  %v10054_v53 = vld [vmem:[#allocation28_spill] sm:$0xff] }
 0x8cc   : > { %4908 = vst [vmem:[#allocation3 + $0x90] sm:$0xf] %v4900_v31  ;;  %4406 = vst [vmem:[#allocation3 + $0x80] sm:$0xf] %v4398_v62  ;;  %v5866_v20 = vsel %vm465_vm4, %v10054_v53, %v9774_v9 }
 0x8ce   : > { %v5350_v22 = vpop.permute.xlu1 %5349  ;;  %v9840_v56 = vpop.permute.xlu0 %5317 }
 0x8cf   : > { %v5374_v40 = vsel %vm471_vm7, %v5373_v30, %v5350_v22 }
 0x8d2   : > { %v5606_v17 = vpop.permute.xlu1 %5605  ;;  %v5574_v3 = vpop.permute.xlu0 %5573 }
 0x8d3   : > { %v6401_v61 = vld [vmem:[#allocation3 + $0x80] sm:$0xff]  ;;  %v6403_v57 = vld [vmem:[#allocation3 + $0x90] sm:$0xff]  ;;  %v5624_v41 = vsel %vm475_vm9, %v5623_v47, %v5606_v17  ;;  %v5616_v35 = vsel %vm473_vm8, %v5615_v23, %v5574_v3  ;;  %v5366_v17 = vsel %vm469_vm6, %v9824_v0, %v9840_v56 }
 0x8d4   : > { %v6623_v58 = vpack.c.bf16 %v6403_v57, %v6401_v61 }
 0x8d6   : > { %v5852_v18 = vpop.permute.xlu1 %5851  ;;  %6624 = vmatpush1.bf16.msra.mxu0 %v6623_v58  ;;  %v9842_v32 = vpop.permute.xlu0 %5819  ;;  %v5867_v58 = vsel %vm467_vm5, %v5866_v20, %v9828_v8 }
 0x8d7   : > { %v5876_v36 = vsel %vm471_vm7, %v5875_v43, %v5852_v18  ;;  %v5868_v0 = vsel %vm469_vm6, %v5867_v58, %v9842_v32 }
 0x8da   : > { %v6108_v14 = vpop.permute.xlu1 %6107  ;;  %v6076_v55 = vpop.permute.xlu0 %6075 }
 0x8db   : > { %v6126_v51 = vsel %vm475_vm9, %v6125_v1, %v6108_v14  ;;  %v6118_v25 = vsel %vm473_vm8, %v6117_v37, %v6076_v55 }
 0x8de   : > { %v5354_v28 = vpop.permute.xlu1 %5353  ;;  %v5322_v15 = vpop.permute.xlu0 %5321 }
 0x8df   : > { %v5375_v24 = vsel %vm473_vm8, %v5374_v40, %v5354_v28  ;;  %v5367_v61 = vsel %vm471_vm7, %v5366_v17, %v5322_v15 }
 0x8e2   : > { %v5610_v44 = vpop.permute.xlu1 %5609  ;;  %v5578_v42 = vpop.permute.xlu0 %5577 }
 0x8e3   : > { %v5625_v19 = vsel %vm477_vm10, %v5624_v41, %v5610_v44  ;;  %v5617_v16 = vsel %vm475_vm9, %v5616_v35, %v5578_v42 }
 0x8e4   : > { %v5629_v59 = vrot.slane %v5625_v19, 4 }
 0x8e6   : > { %5633 = vst [vmem:[#allocation3 + $0xa8] sm:$0xf0] %v5629_v59  ;;  %v5856_v46 = vpop.permute.xlu1 %5855  ;;  %v5824_v13 = vpop.permute.xlu0 %5823 }
 0x8e7   : > { %v5877_v11 = vsel %vm473_vm8, %v5876_v36, %v5856_v46  ;;  %v5869_v28 = vsel %vm471_vm7, %v5868_v0, %v5824_v13 }
 0x8ea   : > { %v6112_v2 = vpop.permute.xlu1 %6111  ;;  %v6080_v12 = vpop.permute.xlu0 %6079 }
 0x8eb   : > { %v6127_v27 = vsel %vm477_vm10, %v6126_v51, %v6112_v2  ;;  %v6119_v48 = vsel %vm475_vm9, %v6118_v25, %v6080_v12 }
 0x8ec   : > { %v6131_v7 = vrot.slane %v6127_v27, 4 }
 0x8ee   : > { %6135 = vst [vmem:[#allocation3 + $0xb8] sm:$0xf0] %v6131_v7  ;;  %v5358_v21 = vpop.permute.xlu1 %5357  ;;  %v5326_v6 = vpop.permute.xlu0 %5325 }
 0x8ef   : > { %v5376_v38 = vsel %vm475_vm9, %v5375_v24, %v5358_v21  ;;  %v5368_v57 = vsel %vm473_vm8, %v5367_v61, %v5326_v6 }
 0x8f2   : > { %v5828_v63 = vpop.permute.xlu1 %5827  ;;  %v5582_v5 = vpop.permute.xlu0 %5581 }
 0x8f3   : > { %v5618_v39 = vsel %vm477_vm10, %v5617_v16, %v5582_v5  ;;  %v5870_v15 = vsel %vm473_vm8, %v5869_v28, %v5828_v63 }
 0x8f4   : > { %v5628_v54 = vrot.slane %v5618_v39, 4 }
 0x8f6   : > { %5632 = vst [vmem:[#allocation3 + $0xa0] sm:$0xf0] %v5628_v54  ;;  %v6084_v49 = vpop.permute.xlu1 %6083  ;;  %v5860_v50 = vpop.permute.xlu0 %5859 }
 0x8f7   : > { %v6120_v26 = vsel %vm477_vm10, %v6119_v48, %v6084_v49  ;;  %v5878_v31 = vsel %vm475_vm9, %v5877_v11, %v5860_v50 }
 0x8f8   : > { %v6130_v34 = vrot.slane %v6120_v26, 4 }
 0x8fa   : > { %6134 = vst [vmem:[#allocation3 + $0xb0] sm:$0xf0] %v6130_v34  ;;  %v5362_v10 = vpop.permute.xlu1 %5361  ;;  %v5330_v60 = vpop.permute.xlu0 %5329  ;;  %v6384_v34 = vld [vmem:[%s9967_s1] sm:$0xff] }
 0x8fb   : > { %v5377_v45 = vsel %vm477_vm10, %v5376_v38, %v5362_v10  ;;  %v5369_v18 = vsel %vm475_vm9, %v5368_v57, %v5330_v60 }
 0x8fc   : > { %5379 = vst [vmem:[#allocation3 + $0xa8] sm:$0xf] %v5377_v45 }
 0x8fe   : > { %v5864_v62 = vpop.permute.xlu1 %5863  ;;  %v5832_v22 = vpop.permute.xlu0 %5831 }
 0x8ff   : > { %v5879_v3 = vsel %vm477_vm10, %v5878_v31, %v5864_v62  ;;  %v5871_v9 = vsel %vm475_vm9, %v5870_v15, %v5832_v22 }
 0x900   : > { %5881 = vst [vmem:[#allocation3 + $0xb8] sm:$0xf] %v5879_v3 }
 0x902   : > { %v5334_v14 = vpop.permute.xlu1 %5333  ;;  %v6342_v55 = vpop.permute.xlu0 %6341 }
 0x903   : > { %v5370_v56 = vsel %vm477_vm10, %v5369_v18, %v5334_v14  ;;  %v6406_v41 = vld [vmem:[#allocation3 + $0xa8] sm:$0xff]  ;;  %v6375_v7 = vsel %vm465_vm4, %v9652_v52, %v6342_v55 }
 0x904   : > { %5378 = vst [vmem:[#allocation3 + $0xa0] sm:$0xf] %v5370_v56 }
 0x906   : > { %v6314_v33 = vpop.permute.xlu1 %6313  ;;  %v5836_v47 = vpop.permute.xlu0 %5835 }
 0x907   : > { %v5872_v8 = vsel %vm477_vm10, %v5871_v9, %v5836_v47  ;;  %v6408_v44 = vld [vmem:[#allocation3 + $0xb8] sm:$0xff]  ;;  %v6368_v21 = vsel %vm465_vm4, %v9670_v4, %v6314_v33 }
 0x908   : > { %5880 = vst [vmem:[#allocation3 + $0xb0] sm:$0xf] %v5872_v8  ;;  %v6625_v42 = vpack.c.bf16 %v6408_v44, %v6406_v41 }
 0x90a   : > { %v6318_v19 = vpop.permute.xlu1 %6317  ;;  %6626 = vmatprep.subr.bf16.mxu0 %v6625_v42  ;;  %v6346_v32 = vpop.permute.xlu0 %6345 }
 0x90b   : > { %v6405_v29 = vld [vmem:[#allocation3 + $0xa0] sm:$0xff]  ;;  %v6369_v6 = vsel %vm467_vm5, %v6368_v21, %v6318_v19  ;;  %v6376_v23 = vsel %vm467_vm5, %v6375_v7, %v6346_v32 }
 0x90e   : > { %v6322_v59 = vpop.permute.xlu1 %6321  ;;  %v6350_v46 = vpop.permute.xlu0 %6349 }
 0x90f   : > { %v6407_v13 = vld [vmem:[#allocation3 + $0xb0] sm:$0xff]  ;;  %v6370_v63 = vsel %vm469_vm6, %v6369_v6, %v6322_v59  ;;  %v6377_v5 = vsel %vm469_vm6, %v6376_v23, %v6350_v46 }
 0x910   : > { %v6627_v1 = vpack.c.bf16 %v6407_v13, %v6405_v29 }
 0x912   : > { %v6326_v51 = vpop.permute.xlu1 %6325  ;;  %6628 = vmatpush1.bf16.msra.mxu0 %v6627_v1  ;;  %v6354_v2 = vpop.permute.xlu0 %6353 }
 0x913   : > { %v6371_v39 = vsel %vm471_vm7, %v6370_v63, %v6326_v51  ;;  %v6378_v37 = vsel %vm471_vm7, %v6377_v5, %v6354_v2 }
 0x916   : > { %v6330_v12 = vpop.permute.xlu1 %6329  ;;  %v6358_v27 = vpop.permute.xlu0 %6357 }
 0x917   : > { %v6372_v54 = vsel %vm473_vm8, %v6371_v39, %v6330_v12  ;;  %v6379_v52 = vsel %vm473_vm8, %v6378_v37, %v6358_v27 }
 0x91a   : > { %v6334_v35 = vpop.permute.xlu1 %6333  ;;  %v6362_v16 = vpop.permute.xlu0 %6361 }
 0x91b   : > { %v6373_v4 = vsel %vm475_vm9, %v6372_v54, %v6334_v35  ;;  %v6380_v25 = vsel %vm475_vm9, %v6379_v52, %v6362_v16 }
 0x91e   : > { %v6338_v48 = vpop.permute.xlu1 %6337  ;;  %v6366_v49 = vpop.permute.xlu0 %6365 }
 0x91f   : > { %v6374_v50 = vsel %vm477_vm10, %v6373_v4, %v6338_v48  ;;  %v6381_v30 = vsel %vm477_vm10, %v6380_v25, %v6366_v49 }
 0x920   : > { %6382 = vst [vmem:[#allocation3 + $0xc0] sm:$0xf] %v6374_v50  ;;  %6383 = vst [vmem:[#allocation3 + $0xc8] sm:$0xf] %v6381_v30 }
 0x927   : > { %v6410_v26 = vld [vmem:[#allocation3 + $0xc8] sm:$0xf]  ;;  %v6409_v40 = vld [vmem:[#allocation3 + $0xc0] sm:$0xf] }
 0x928   : > { %6595 = vmatprep.subr.msk.mxu0 %vm6421_vm11, %v6410_v26 }
 0x929   : > { %6596 = vmatpush1.msk.msra.mxu0 %vm6421_vm11, %v6409_v40 }
 0x92a   : > { %6597 = vmatmul.mubr.msk.f32.vlgmr.msra.gmra.mrb[0].mxu0 %vm6417_vm12, %v6384_v34 }
 0x92f   : > { %v6415_v24 = vpop.permute.xlu0 %6414 }
 0x9fd   : > { %v6494_v38 = vpop.f32.mrb[0].mxu0 }
 0x9fe   : > { %v6495_v10 = vadd.f32 %v6494_v38, %v6415_v24  ;;  %v6496_v60 = vpop.f32.mrb[1].mxu0 }
 0x9ff   : > { %v6497_v43 = vadd.f32 %v6496_v60, %v6415_v24 }
 0xa00   : > { %6499 = vst [vmem:[%s188_s4] sm:$0xff] %v6495_v10 }
 0xa01   : > { %6500 = vst [vmem:[%s188_s4 + $0x8] sm:$0xff] %v6497_v43 }
 0xa02   : > { %6782 = shalt.err (!%p6779_p2)
}
 0xa03   : > { %s6783_s5 = scalar_lea.hbm %s9922_s17, 256  ;;  %s6787_s29 = scalar_lea.hbm %s9969_s3, 512 }
 0xa04   : > { %p6784_p4 = scmp.ne.s32.totalorder %s9922_s17, %s6783_s5  ;;  %p6788_p9 = scmp.lt.u32.totalorder %s9922_s17, %s9969_s3 }
 0xa05   : > { %p6789_p1 = scmp.lt.u32.totalorder %s6787_s29, %s6783_s5  ;;  %p6791_p6 = scmp.lt.u32.totalorder %s6783_s5, %s9922_s17 }
 0xa06   : > { %p6785_p5 = pnand %p6784_p4, %p10055_p11 }
 0xa07   : > { %p6790_p3 = por %p6789_p1, %p6788_p9 }
 0xa08   : > { %p6786_p7 = pneg %p6785_p5 }
 0xa09   : > { %p6792_p12 = por %p6791_p6, %p6790_p3 }
 0xa0b   : > { %p6793_p13 = pnand %p6792_p12, %p6786_p7 }
 0xa0d   : > { %6796 = shalt.err (!%p6793_p13)
}
 0xa0e   : > { %6631 = dma.vmem_to_hbm [thread:$0]  (%p10055_p11), %s9924_s6, 256, %s9922_s17, %s6502_s19  }
 0xa0f PF: > { %s6528_s10 = sand.u32 1, %s6823_s12   ;;  %p10056_p8 = scmp.ne.s32.totalorder %s9994_s25, 0 }
 0xa10   : > { %p10057_p10 = scmp.ge.s32.totalorder %s6835_s15, 2  ;;  %s6529_s11 = scalar_lea.sflag [#allocation6], %s6528_s10 }
 0xa12   : > { %p6638_p0 = pnand %p10057_p10, %p10056_p8 }
 0xa14   : > { %6818 = dma.done.wait (!%p6638_p0), %s6529_s11, 256  }
 0xa15   : > { %6820 = vsyncadd (!%p6638_p0), %s6529_s11, 4294967040  ;;  %p16_p2 = scmp.ge.s32.totalorder %s6902_s18, 4   ;;  %s10058_s12 = smov %s6827_s13 }
 0xa16   : > { %s10059_s13 = smov %s6831_s14  ;;  %s10060_s14 = smov %s6914_s21 }
 0xa17   : > { %s10061_s15 = smov %s6902_s18  ;;  %18 = sbr.rel (!%p16_p2) target bundleno = 5 (0x5), region = 77 }
 0xa1e   :  { %6534 = vsyncpa [#allocation5], 1 }
 0xa1f   :  { %6536 = vsyncpa [#allocation5 + $0x1], 1 }
 0xa20   :  { %6537 = vsyncpa [#allocation6], 1 }
 0xa21   :  { %6539 = vsyncpa [#allocation6 + $0x1], 1 }

</bundles_post_ra>
